<compile_context>
chip_gen: v6e
topology: v6e:2x2x1
jax: 0.10.0
libtpu: 0.0.40
codegen_flags: <defaults>
</compile_context>

<pallas_src>
import functools

import jax
import jax.numpy as jnp
from jax.experimental import pallas as pl
from jax.experimental.pallas import tpu as pltpu

_PADW = 8  # zero-pad width along W (8 keeps the sublane concat tile-aligned)


def _conv_block_kernel(x_ref, w1_ref, s1_ref, t1_ref, w2_ref, s2_ref, t2_ref,
                       o_ref, *, H, W):
    """One batch element: fused (conv3x3 + BN + ReLU) x 2, all in VMEM."""

    def pad_image(img):
        # (H, W, C) -> (H+2, W+2*_PADW, C) with a zero border.
        C = img.shape[-1]
        zc = jnp.zeros((H, _PADW, C), img.dtype)
        img = jnp.concatenate([zc, img, zc], axis=1)       # aligned sublane concat
        zr = jnp.zeros((1, W + 2 * _PADW, C), img.dtype)
        return jnp.concatenate([zr, img, zr], axis=0)      # outer-dim concat

    def conv_bn_relu(img, w, s, t):
        # img: (H, W, C) f32 | w: (9*C, CO) bf16 | s, t: (1, CO) f32
        C = img.shape[-1]
        xp = pad_image(img)
        # im2col: 9 shifted views -> one (H*W, 9*C) patch -> a single MXU matmul.
        taps = [
            xp[kh:kh + H, _PADW - 1 + kw:_PADW - 1 + kw + W, :].reshape(H * W, C)
            for kh in range(3) for kw in range(3)
        ]
        patch = jnp.concatenate(taps, axis=-1).astype(jnp.bfloat16)  # (HW, 9C)
        y = jnp.dot(patch, w, preferred_element_type=jnp.float32)    # (HW, CO)
        y = jnp.maximum(y * s + t, 0.0)                              # BN + ReLU (f32)
        return y

    x = x_ref[0].astype(jnp.float32)                                  # (H, W, Cin)
    y1 = conv_bn_relu(x, w1_ref[...], s1_ref[...], t1_ref[...])       # (HW, Cmid)
    y1 = y1.reshape(H, W, y1.shape[-1])                               # stays in VMEM
    y2 = conv_bn_relu(y1, w2_ref[...], s2_ref[...], t2_ref[...])      # (HW, COP)
    o_ref[0] = y2.reshape(H, W, y2.shape[-1]).astype(o_ref.dtype)     # lane-dense store


def conv_block(x_nchw, params1, params2):
    """ConvBlock forward. Input/output in NCHW (PyTorch convention)."""
    w1, b1, sc1, sh1 = params1
    w2, b2, sc2, sh2 = params2
    N, Cin, H, W = x_nchw.shape
    Cmid = w1.shape[-1]
    Cout = w2.shape[-1]
    COP = ((Cout + 127) // 128) * 128          # lane-dense padded output channels

    # NCHW -> NHWC, bf16 activations for the HBM->VMEM DMA / MXU feed.
    x = jnp.transpose(x_nchw, (0, 2, 3, 1)).astype(jnp.bfloat16)

    # im2col weight layout (kh, kw, ci) -> rows; fold conv bias into BN shift.
    w1m = w1.reshape(9 * Cin, Cmid).astype(jnp.bfloat16)
    s1 = sc1.astype(jnp.float32)
    t1 = (sh1 + sc1 * b1).astype(jnp.float32)

    w2m = w2.reshape(9 * Cmid, Cout).astype(jnp.bfloat16)
    w2m = jnp.pad(w2m, ((0, 0), (0, COP - Cout)))          # zero cols -> padded lanes = 0
    s2 = jnp.pad(sc2.astype(jnp.float32), ((0, 0), (0, COP - Cout)))
    t2 = jnp.pad((sh2 + sc2 * b2).astype(jnp.float32), ((0, 0), (0, COP - Cout)))

    kernel = functools.partial(_conv_block_kernel, H=H, W=W)
    out = pl.pallas_call(
        kernel,
        out_shape=jax.ShapeDtypeStruct((N, H, W, COP), jnp.float32),
        grid_spec=pltpu.PrefetchScalarGridSpec(
            num_scalar_prefetch=0,
            grid=(N,),
            in_specs=[
                pl.BlockSpec((1, H, W, Cin), lambda n: (n, 0, 0, 0)),
                pl.BlockSpec((9 * Cin, Cmid), lambda n: (0, 0)),
                pl.BlockSpec((1, Cmid), lambda n: (0, 0)),
                pl.BlockSpec((1, Cmid), lambda n: (0, 0)),
                pl.BlockSpec((9 * Cmid, COP), lambda n: (0, 0)),
                pl.BlockSpec((1, COP), lambda n: (0, 0)),
                pl.BlockSpec((1, COP), lambda n: (0, 0)),
            ],
            out_specs=pl.BlockSpec((1, H, W, COP), lambda n: (n, 0, 0, 0)),
        ),
        compiler_params=pltpu.CompilerParams(
            dimension_semantics=("parallel",)),
    )(x, w1m, s1, t1, w2m, s2, t2)

    out = out[..., :Cout]                          # drop padded lanes
    return jnp.transpose(out, (0, 3, 1, 2))        # NHWC -> NCHW


def make_params(key, ch_in, ch_out):
    """Deterministic synthetic parameters for one Conv2d + BatchNorm2d pair."""
    k1, k2, k3, k4 = jax.random.split(key, 4)
    w = jax.random.normal(k1, (3, 3, ch_in, ch_out), jnp.float32) * 0.1  # HWIO
    b = jax.random.normal(k2, (1, ch_out), jnp.float32) * 0.1
    gamma = 1.0 + 0.1 * jax.random.normal(k3, (1, ch_out), jnp.float32)
    beta = 0.1 * jax.random.normal(k4, (1, ch_out), jnp.float32)
    running_mean = jnp.zeros((1, ch_out), jnp.float32)
    running_var = jnp.ones((1, ch_out), jnp.float32)
    eps = 1e-5
    scale = gamma / jnp.sqrt(running_var + eps)
    shift = beta - running_mean * scale
    return w, b, scale, shift


def _reference(x_nchw, params1, params2):
    """Pure-JAX reference mirroring the kernel's bf16 matmul inputs."""
    def layer(x, w, b, scale, shift):
        xq = x.astype(jnp.bfloat16).astype(jnp.float32)
        wq = w.astype(jnp.bfloat16).astype(jnp.float32)
        y = jax.lax.conv_general_dilated(
            xq, wq, window_strides=(1, 1), padding=((1, 1), (1, 1)),
            dimension_numbers=("NCHW", "HWIO", "NCHW"),
            precision=jax.lax.Precision.HIGHEST)
        y = y + b[0][None, :, None, None]
        y = y * scale[0][None, :, None, None] + shift[0][None, :, None, None]
        return jnp.maximum(y, 0.0)
    x = layer(x_nchw, *params1)
    x = layer(x, *params2)
    return x


if __name__ == "__main__":
    key = jax.random.PRNGKey(0)
    kx, kp1, kp2 = jax.random.split(key, 3)

    N, CH_IN, CH_OUT, H, W = 2, 4, 8, 16, 16
    x = jax.random.normal(kx, (N, CH_IN, H, W), jnp.float32)

    params1 = make_params(kp1, CH_IN, CH_OUT)
    params2 = make_params(kp2, CH_OUT, CH_OUT)

    fwd = jax.jit(conv_block)
    out = jax.block_until_ready(fwd(x, params1, params2))

    ref = jax.block_until_ready(_reference(x, params1, params2))
    assert out.shape == (N, CH_OUT, H, W)
    max_err = float(jnp.max(jnp.abs(out - ref)))
    assert jnp.allclose(out, ref, atol=2e-2, rtol=2e-2), \
        f"mismatch vs reference (max abs err {max_err})"

    print("KERNEL_OK")
</pallas_src>

<mosaic_0001>
module attributes {stable_mosaic.version = 11 : i64} {
  func.func @_conv_block_kernel(%arg0: i32, %arg1: memref<1x16x16x4xbf16, #tpu.memory_space<vmem>>, %arg2: memref<36x8xbf16, #tpu.memory_space<vmem>>, %arg3: memref<1x8xf32, #tpu.memory_space<vmem>>, %arg4: memref<1x8xf32, #tpu.memory_space<vmem>>, %arg5: memref<72x128xbf16, #tpu.memory_space<vmem>>, %arg6: memref<1x128xf32, #tpu.memory_space<vmem>>, %arg7: memref<1x128xf32, #tpu.memory_space<vmem>>, %arg8: memref<1x16x16x128xf32, #tpu.memory_space<vmem>>) attributes {dimension_semantics = [#tpu.dimension_semantics<parallel>], iteration_bounds = array<i64: 2>, scalar_prefetch = 0 : i64, scratch_operands = 0 : i64, tpu.core_type = #tpu.core_type<tc>, window_params = [{transform_indices = @transform_0, window_bounds = array<i64: 1, 16, 16, 4>}, {pipeline_mode = #tpu.pipeline_mode<synchronous>, transform_indices = @transform_1, window_bounds = array<i64: 36, 8>}, {pipeline_mode = #tpu.pipeline_mode<synchronous>, transform_indices = @transform_2, window_bounds = array<i64: 1, 8>}, {pipeline_mode = #tpu.pipeline_mode<synchronous>, transform_indices = @transform_3, window_bounds = array<i64: 1, 8>}, {pipeline_mode = #tpu.pipeline_mode<synchronous>, transform_indices = @transform_4, window_bounds = array<i64: 72, 128>}, {pipeline_mode = #tpu.pipeline_mode<synchronous>, transform_indices = @transform_5, window_bounds = array<i64: 1, 128>}, {pipeline_mode = #tpu.pipeline_mode<synchronous>, transform_indices = @transform_6, window_bounds = array<i64: 1, 128>}, {transform_indices = @transform_7, window_bounds = array<i64: 1, 16, 16, 128>}]} {
    %c0 = arith.constant 0 : index
    %c0_0 = arith.constant 0 : index
    %c0_1 = arith.constant 0 : index
    %c0_2 = arith.constant 0 : index
    %0 = vector.load %arg1[%c0, %c0_0, %c0_1, %c0_2] : memref<1x16x16x4xbf16, #tpu.memory_space<vmem>>, vector<1x16x16x4xbf16>
    %1 = vector.shape_cast %0 : vector<1x16x16x4xbf16> to vector<16x16x4xbf16>
    %2 = arith.extf %1 : vector<16x16x4xbf16> to vector<16x16x4xf32>
    %c0_3 = arith.constant 0 : index
    %c0_4 = arith.constant 0 : index
    %3 = vector.load %arg2[%c0_3, %c0_4] : memref<36x8xbf16, #tpu.memory_space<vmem>>, vector<36x8xbf16>
    %c0_5 = arith.constant 0 : index
    %c0_6 = arith.constant 0 : index
    %4 = vector.load %arg3[%c0_5, %c0_6] : memref<1x8xf32, #tpu.memory_space<vmem>>, vector<1x8xf32>
    %c0_7 = arith.constant 0 : index
    %c0_8 = arith.constant 0 : index
    %5 = vector.load %arg4[%c0_7, %c0_8] : memref<1x8xf32, #tpu.memory_space<vmem>>, vector<1x8xf32>
    %cst = arith.constant 0.000000e+00 : f32
    %6 = vector.broadcast %cst : f32 to vector<16x8x4xf32>
    %7 = tpu.concatenate %6, %2, %6 in 1 : vector<16x8x4xf32>, vector<16x16x4xf32>, vector<16x8x4xf32> -> vector<16x32x4xf32>
    %cst_9 = arith.constant 0.000000e+00 : f32
    %8 = vector.broadcast %cst_9 : f32 to vector<1x32x4xf32>
    %9 = tpu.concatenate %8, %7, %8 in 0 : vector<1x32x4xf32>, vector<16x32x4xf32>, vector<1x32x4xf32> -> vector<18x32x4xf32>
    %10 = vector.extract_strided_slice %9 {offsets = [0, 7, 0], sizes = [16, 16, 4], strides = [1, 1, 1]} : vector<18x32x4xf32> to vector<16x16x4xf32>
    %11 = vector.shape_cast %10 : vector<16x16x4xf32> to vector<256x4xf32>
    %12 = vector.extract_strided_slice %9 {offsets = [0, 8, 0], sizes = [16, 16, 4], strides = [1, 1, 1]} : vector<18x32x4xf32> to vector<16x16x4xf32>
    %13 = vector.shape_cast %12 : vector<16x16x4xf32> to vector<256x4xf32>
    %14 = vector.extract_strided_slice %9 {offsets = [0, 9, 0], sizes = [16, 16, 4], strides = [1, 1, 1]} : vector<18x32x4xf32> to vector<16x16x4xf32>
    %15 = vector.shape_cast %14 : vector<16x16x4xf32> to vector<256x4xf32>
    %16 = vector.extract_strided_slice %9 {offsets = [1, 7, 0], sizes = [16, 16, 4], strides = [1, 1, 1]} : vector<18x32x4xf32> to vector<16x16x4xf32>
    %17 = vector.shape_cast %16 : vector<16x16x4xf32> to vector<256x4xf32>
    %18 = vector.extract_strided_slice %9 {offsets = [1, 8, 0], sizes = [16, 16, 4], strides = [1, 1, 1]} : vector<18x32x4xf32> to vector<16x16x4xf32>
    %19 = vector.shape_cast %18 : vector<16x16x4xf32> to vector<256x4xf32>
    %20 = vector.extract_strided_slice %9 {offsets = [1, 9, 0], sizes = [16, 16, 4], strides = [1, 1, 1]} : vector<18x32x4xf32> to vector<16x16x4xf32>
    %21 = vector.shape_cast %20 : vector<16x16x4xf32> to vector<256x4xf32>
    %22 = vector.extract_strided_slice %9 {offsets = [2, 7, 0], sizes = [16, 16, 4], strides = [1, 1, 1]} : vector<18x32x4xf32> to vector<16x16x4xf32>
    %23 = vector.shape_cast %22 : vector<16x16x4xf32> to vector<256x4xf32>
    %24 = vector.extract_strided_slice %9 {offsets = [2, 8, 0], sizes = [16, 16, 4], strides = [1, 1, 1]} : vector<18x32x4xf32> to vector<16x16x4xf32>
    %25 = vector.shape_cast %24 : vector<16x16x4xf32> to vector<256x4xf32>
    %26 = vector.extract_strided_slice %9 {offsets = [2, 9, 0], sizes = [16, 16, 4], strides = [1, 1, 1]} : vector<18x32x4xf32> to vector<16x16x4xf32>
    %27 = vector.shape_cast %26 : vector<16x16x4xf32> to vector<256x4xf32>
    %28 = tpu.concatenate %11, %13, %15, %17, %19, %21, %23, %25, %27 in 1 : vector<256x4xf32>, vector<256x4xf32>, vector<256x4xf32>, vector<256x4xf32>, vector<256x4xf32>, vector<256x4xf32>, vector<256x4xf32>, vector<256x4xf32>, vector<256x4xf32> -> vector<256x36xf32>
    %29 = arith.truncf %28 : vector<256x36xf32> to vector<256x36xbf16>
    %cst_10 = arith.constant dense<0.000000e+00> : vector<256x8xf32>
    %30 = tpu.matmul %29, %3, %cst_10 {dimension_numbers = #tpu.dot_dimension_numbers<[1], [0], [0], [1], [0, 0, 1, 1], [], []>} : vector<256x36xbf16>, vector<36x8xbf16>, vector<256x8xf32> -> vector<256x8xf32>
    %31 = vector.broadcast %4 : vector<1x8xf32> to vector<256x8xf32>
    %32 = arith.mulf %30, %31 : vector<256x8xf32>
    %33 = vector.broadcast %5 : vector<1x8xf32> to vector<256x8xf32>
    %34 = arith.addf %32, %33 : vector<256x8xf32>
    %cst_11 = arith.constant 0.000000e+00 : f32
    %35 = vector.broadcast %cst_11 : f32 to vector<256x8xf32>
    %36 = arith.maximumf %34, %35 : vector<256x8xf32>
    %37 = vector.shape_cast %36 : vector<256x8xf32> to vector<16x16x8xf32>
    %c0_12 = arith.constant 0 : index
    %c0_13 = arith.constant 0 : index
    %38 = vector.load %arg5[%c0_12, %c0_13] : memref<72x128xbf16, #tpu.memory_space<vmem>>, vector<72x128xbf16>
    %c0_14 = arith.constant 0 : index
    %c0_15 = arith.constant 0 : index
    %39 = vector.load %arg6[%c0_14, %c0_15] : memref<1x128xf32, #tpu.memory_space<vmem>>, vector<1x128xf32>
    %c0_16 = arith.constant 0 : index
    %c0_17 = arith.constant 0 : index
    %40 = vector.load %arg7[%c0_16, %c0_17] : memref<1x128xf32, #tpu.memory_space<vmem>>, vector<1x128xf32>
    %cst_18 = arith.constant 0.000000e+00 : f32
    %41 = vector.broadcast %cst_18 : f32 to vector<16x8x8xf32>
    %42 = tpu.concatenate %41, %37, %41 in 1 : vector<16x8x8xf32>, vector<16x16x8xf32>, vector<16x8x8xf32> -> vector<16x32x8xf32>
    %cst_19 = arith.constant 0.000000e+00 : f32
    %43 = vector.broadcast %cst_19 : f32 to vector<1x32x8xf32>
    %44 = tpu.concatenate %43, %42, %43 in 0 : vector<1x32x8xf32>, vector<16x32x8xf32>, vector<1x32x8xf32> -> vector<18x32x8xf32>
    %45 = vector.extract_strided_slice %44 {offsets = [0, 7, 0], sizes = [16, 16, 8], strides = [1, 1, 1]} : vector<18x32x8xf32> to vector<16x16x8xf32>
    %46 = vector.shape_cast %45 : vector<16x16x8xf32> to vector<256x8xf32>
    %47 = vector.extract_strided_slice %44 {offsets = [0, 8, 0], sizes = [16, 16, 8], strides = [1, 1, 1]} : vector<18x32x8xf32> to vector<16x16x8xf32>
    %48 = vector.shape_cast %47 : vector<16x16x8xf32> to vector<256x8xf32>
    %49 = vector.extract_strided_slice %44 {offsets = [0, 9, 0], sizes = [16, 16, 8], strides = [1, 1, 1]} : vector<18x32x8xf32> to vector<16x16x8xf32>
    %50 = vector.shape_cast %49 : vector<16x16x8xf32> to vector<256x8xf32>
    %51 = vector.extract_strided_slice %44 {offsets = [1, 7, 0], sizes = [16, 16, 8], strides = [1, 1, 1]} : vector<18x32x8xf32> to vector<16x16x8xf32>
    %52 = vector.shape_cast %51 : vector<16x16x8xf32> to vector<256x8xf32>
    %53 = vector.extract_strided_slice %44 {offsets = [1, 8, 0], sizes = [16, 16, 8], strides = [1, 1, 1]} : vector<18x32x8xf32> to vector<16x16x8xf32>
    %54 = vector.shape_cast %53 : vector<16x16x8xf32> to vector<256x8xf32>
    %55 = vector.extract_strided_slice %44 {offsets = [1, 9, 0], sizes = [16, 16, 8], strides = [1, 1, 1]} : vector<18x32x8xf32> to vector<16x16x8xf32>
    %56 = vector.shape_cast %55 : vector<16x16x8xf32> to vector<256x8xf32>
    %57 = vector.extract_strided_slice %44 {offsets = [2, 7, 0], sizes = [16, 16, 8], strides = [1, 1, 1]} : vector<18x32x8xf32> to vector<16x16x8xf32>
    %58 = vector.shape_cast %57 : vector<16x16x8xf32> to vector<256x8xf32>
    %59 = vector.extract_strided_slice %44 {offsets = [2, 8, 0], sizes = [16, 16, 8], strides = [1, 1, 1]} : vector<18x32x8xf32> to vector<16x16x8xf32>
    %60 = vector.shape_cast %59 : vector<16x16x8xf32> to vector<256x8xf32>
    %61 = vector.extract_strided_slice %44 {offsets = [2, 9, 0], sizes = [16, 16, 8], strides = [1, 1, 1]} : vector<18x32x8xf32> to vector<16x16x8xf32>
    %62 = vector.shape_cast %61 : vector<16x16x8xf32> to vector<256x8xf32>
    %63 = tpu.concatenate %46, %48, %50, %52, %54, %56, %58, %60, %62 in 1 : vector<256x8xf32>, vector<256x8xf32>, vector<256x8xf32>, vector<256x8xf32>, vector<256x8xf32>, vector<256x8xf32>, vector<256x8xf32>, vector<256x8xf32>, vector<256x8xf32> -> vector<256x72xf32>
    %64 = arith.truncf %63 : vector<256x72xf32> to vector<256x72xbf16>
    %cst_20 = arith.constant dense<0.000000e+00> : vector<256x128xf32>
    %65 = tpu.matmul %64, %38, %cst_20 {dimension_numbers = #tpu.dot_dimension_numbers<[1], [0], [0], [1], [0, 0, 1, 1], [], []>} : vector<256x72xbf16>, vector<72x128xbf16>, vector<256x128xf32> -> vector<256x128xf32>
    %66 = vector.broadcast %39 : vector<1x128xf32> to vector<256x128xf32>
    %67 = arith.mulf %65, %66 : vector<256x128xf32>
    %68 = vector.broadcast %40 : vector<1x128xf32> to vector<256x128xf32>
    %69 = arith.addf %67, %68 : vector<256x128xf32>
    %cst_21 = arith.constant 0.000000e+00 : f32
    %70 = vector.broadcast %cst_21 : f32 to vector<256x128xf32>
    %71 = arith.maximumf %69, %70 : vector<256x128xf32>
    %72 = vector.shape_cast %71 : vector<256x128xf32> to vector<16x16x128xf32>
    %c0_22 = arith.constant 0 : index
    %c0_23 = arith.constant 0 : index
    %c0_24 = arith.constant 0 : index
    %c0_25 = arith.constant 0 : index
    %73 = vector.load %arg8[%c0_22, %c0_23, %c0_24, %c0_25] : memref<1x16x16x128xf32, #tpu.memory_space<vmem>>, vector<1x16x16x128xf32>
    %74 = vector.shape_cast %73 : vector<1x16x16x128xf32> to vector<16x16x128xf32>
    %75 = vector.shape_cast %72 : vector<16x16x128xf32> to vector<1x16x16x128xf32>
    tpu.vector_store %arg8[%c0_22, %c0_23, %c0_24, %c0_25], %75 {strides = array<i32>} : memref<1x16x16x128xf32, #tpu.memory_space<vmem>>, vector<1x16x16x128xf32>,
    return
  }
  func.func @transform_0(%arg0: i32) -> (i32, i32, i32, i32) {
    %c0_i32 = arith.constant 0 : i32
    %c0_i32_0 = arith.constant 0 : i32
    %c0_i32_1 = arith.constant 0 : i32
    %c0_i32_2 = arith.constant 0 : i32
    return %arg0, %c0_i32, %c0_i32_0, %c0_i32_1 : i32, i32, i32, i32
  }
  func.func @transform_1(%arg0: i32) -> (i32, i32) {
    %c0_i32 = arith.constant 0 : i32
    %c0_i32_0 = arith.constant 0 : i32
    %c0_i32_1 = arith.constant 0 : i32
    return %c0_i32, %c0_i32_0 : i32, i32
  }
  func.func @transform_2(%arg0: i32) -> (i32, i32) {
    %c0_i32 = arith.constant 0 : i32
    %c0_i32_0 = arith.constant 0 : i32
    %c0_i32_1 = arith.constant 0 : i32
    return %c0_i32, %c0_i32_0 : i32, i32
  }
  func.func @transform_3(%arg0: i32) -> (i32, i32) {
    %c0_i32 = arith.constant 0 : i32
    %c0_i32_0 = arith.constant 0 : i32
    %c0_i32_1 = arith.constant 0 : i32
    return %c0_i32, %c0_i32_0 : i32, i32
  }
  func.func @transform_4(%arg0: i32) -> (i32, i32) {
    %c0_i32 = arith.constant 0 : i32
    %c0_i32_0 = arith.constant 0 : i32
    %c0_i32_1 = arith.constant 0 : i32
    return %c0_i32, %c0_i32_0 : i32, i32
  }
  func.func @transform_5(%arg0: i32) -> (i32, i32) {
    %c0_i32 = arith.constant 0 : i32
    %c0_i32_0 = arith.constant 0 : i32
    %c0_i32_1 = arith.constant 0 : i32
    return %c0_i32, %c0_i32_0 : i32, i32
  }
  func.func @transform_6(%arg0: i32) -> (i32, i32) {
    %c0_i32 = arith.constant 0 : i32
    %c0_i32_0 = arith.constant 0 : i32
    %c0_i32_1 = arith.constant 0 : i32
    return %c0_i32, %c0_i32_0 : i32, i32
  }
  func.func @transform_7(%arg0: i32) -> (i32, i32, i32, i32) {
    %c0_i32 = arith.constant 0 : i32
    %c0_i32_0 = arith.constant 0 : i32
    %c0_i32_1 = arith.constant 0 : i32
    %c0_i32_2 = arith.constant 0 : i32
    return %arg0, %c0_i32, %c0_i32_0, %c0_i32_1 : i32, i32, i32, i32
  }
}

</mosaic_0001>

<bundles_post_ra>
// kernel: conv_block.1
= control target key start
LH: loop header
LB: loop body
LE: loop exit
PB: predicated region body
PF: predicated region fallthrough
CT: control target
= control target key end

     0   :  { %s5168_s24 = smov 0   ;;  %s8624_s0 = inlined_call_operand.vmem [shape: bf16[2,16,16,4], index: 0, kind: input, shape index: {}]   ;;  %s8625_s1 = inlined_call_operand.vmem [shape: bf16[36,8], index: 1, kind: input, shape index: {}]   ;;  %s8626_s2 = inlined_call_operand.vmem [shape: f32[1,8], index: 2, kind: input, shape index: {}]   ;;  %s8627_s3 = inlined_call_operand.vmem [shape: f32[1,8], index: 3, kind: input, shape index: {}]   ;;  %s8628_s4 = inlined_call_operand.vmem [shape: bf16[72,128], index: 4, kind: input, shape index: {}]   ;;  %s8629_s5 = inlined_call_operand.vmem [shape: f32[1,128], index: 5, kind: input, shape index: {}]   ;;  %s8630_s6 = inlined_call_operand.vmem [shape: f32[1,128], index: 6, kind: input, shape index: {}]   ;;  %s8631_s7 = inlined_call_operand.vmem [shape: f32[2,16,16,128], index: 7, kind: output, shape index: {}]  }
   0x1 LB: > { %s3581_s25 = sadd.s32 4294967295, %s5113_s24   ;;  %p3585_p0 = scmp.ge.s32.totalorder %s5113_s24, 1  ;;  %s5113_s24 = sphi %s5168_s24, %s17_s24  }
   0x2   : > { %p237_p1 = scmp.lt.s32.totalorder %s5113_s24, 3 }
   0x4   : > { %p238_p2 = pnand %p3585_p0, %p237_p1 }
   0x6   : > { %241 = sbr.rel (%p238_p2) target bundleno = 1311 (0x51f), region = 48 }
   0xb   : > { %p269_p3 = scmp.lt.s32.totalorder %s3581_s25, 1  ;;  %s5115_s30 = smov 4   ;;  %v8632_v53 = vmov 0.0   ;;  %vm476_vm0 = vcmask 1046528   ;;  %vm382_vm1 = vcmask 1040384   ;;  %vm1644_vm2 = vcmask 1041408  }
   0xc   : > { %v5287_v54 = vrot.slane %v8632_v53, 1  ;;  %s5117_s8 = smov 8   ;;  %s5118_s9 = smov 12   ;;  %vm1302_vm3 = vcmask 31744   ;;  %vm1334_vm4 = vcmask 64512   ;;  %vm1366_vm5 = vcmask 97280  }
   0xd   : > { %s9081_s25 = smov (!%p269_p3, %s3581_s25), 1  ;;  %s5119_s10 = smov 16   ;;  %vm1399_vm6 = vcmask 130048   ;;  %vm1432_vm7 = vcmask 162816   ;;  %vm1465_vm8 = vcmask 195584   ;;  %vm1498_vm9 = vcmask 228352  }
   0xe   : > { %s3636_s26 = sshll.u32 %s9081_s25, 7  ;;  %8777 = vst [vmem:[#allocation2_spill] sm:$0xff] %v5287_v54  ;;  %s5120_s11 = smov 20   ;;  %vm1531_vm10 = vcmask 261120   ;;  %vm1595_vm11 = vcmask 293888   ;;  %vm3221_vm12 = vcmask 1043456  }
   0xf   : > { %s5182_s29 = scalar_lea.vmem %s8624_s0, %s3636_s26  ;;  %s5121_s12 = smov 24   ;;  %vm2997_vm13 = vcmask 326656   ;;  %vm3030_vm14 = vcmask 392192   ;;  %vm3063_vm15 = vcmask 457728  }
  0x10   : > { %v3702_v0 = vld [vmem:[%s5182_s29 + $0x8] sm:$0xff]   ;;  %v3703_v1 = vld [vmem:[%s5182_s29 + $0x10] sm:$0xff]   ;;  %v3639_v2 = vld [vmem:[%s5182_s29] sm:$0xff]   ;;  %s5122_s17 = smov 28   ;;  %s5123_s20 = smov 32  }
  0x11   : > { %v5187_v3 = vunpack.c.h.bf16 %v3702_v0  ;;  %v5189_v4 = vunpack.c.l.bf16 %v3703_v1  ;;  %v5191_v5 = vunpack.c.h.bf16 %v3703_v1  ;;  %v3704_v6 = vld [vmem:[%s5182_s29 + $0x18] sm:$0xff]   ;;  %v5194_v7 = vunpack.c.l.bf16 %v3702_v0  ;;  %v3705_v11 = vld [vmem:[%s5182_s29 + $0x20] sm:$0xff]   ;;  %v3706_v12 = vld [vmem:[%s5182_s29 + $0x28] sm:$0xff]   ;;  %s5124_s27 = smov 56   ;;  %s5125_s28 = smov 40  }
  0x12   : > { %v5196_v8 = vunpack.c.l.bf16 %v3639_v2  ;;  %v5198_v9 = vunpack.c.h.bf16 %v3639_v2  ;;  %v5200_v10 = vunpack.c.l.bf16 %v3704_v6  ;;  %v5209_v15 = vunpack.c.h.bf16 %v3705_v11  ;;  %v3707_v17 = vld [vmem:[%s5182_s29 + $0x30] sm:$0xff]   ;;  %v3708_v21 = vld [vmem:[%s5182_s29 + $0x38] sm:$0xff]   ;;  %v3709_v28 = vld [vmem:[%s5182_s29 + $0x40] sm:$0xff]   ;;  %s3637_s14 = sshll.u32 %s9081_s25, 8 }
  0x13   : > { %v3870_v13 = vpack.i.bf16 %v5189_v4, %v5187_v3  ;;  %v5211_v16 = vunpack.c.l.bf16 %v3706_v12  ;;  %v5218_v19 = vunpack.c.h.bf16 %v3704_v6  ;;  %v5220_v20 = vunpack.c.l.bf16 %v3705_v11  ;;  %v3710_v29 = vld [vmem:[%s5182_s29 + $0x48] sm:$0xff]   ;;  %v3711_v36 = vld [vmem:[%s5182_s29 + $0x50] sm:$0xff]   ;;  %v3712_v37 = vld [vmem:[%s5182_s29 + $0x58] sm:$0xff]  }
  0x14   : > { %v3875_v14 = vpack.i.bf16 %v5200_v10, %v5191_v5  ;;  %3861 = vrot.lane.b32.xlu0 %v5196_v8, %s5115_s30  ;;  %v3865_v18 = vpack.i.bf16 %v5194_v7, %v5198_v9  ;;  %v5226_v23 = vunpack.c.h.bf16 %v3707_v17  ;;  %v5228_v24 = vunpack.c.l.bf16 %v3708_v21  ;;  %v3713_v44 = vld [vmem:[%s5182_s29 + $0x60] sm:$0xff]   ;;  %v3714_v45 = vld [vmem:[%s5182_s29 + $0x68] sm:$0xff]   ;;  %v3715_v52 = vld [vmem:[%s5182_s29 + $0x70] sm:$0xff]  }
  0x15   : > { %3871 = vrot.lane.b32.xlu1 %v3870_v13, %s5115_s30  ;;  %v3885_v22 = vpack.i.bf16 %v5211_v16, %v5209_v15  ;;  %v3880_v25 = vpack.i.bf16 %v5220_v20, %v5218_v19  ;;  %v5233_v26 = vunpack.c.h.bf16 %v3706_v12  ;;  %v5235_v27 = vunpack.c.l.bf16 %v3707_v17  ;;  %v3716_v53 = vld [vmem:[%s5182_s29 + $0x78] sm:$0xff]   ;;  %s5126_s29 = smov 48  }
  0x16   : > { %v3895_v30 = vpack.i.bf16 %v5228_v24, %v5226_v23  ;;  %v5242_v31 = vunpack.c.h.bf16 %v3709_v28  ;;  %v5244_v32 = vunpack.c.l.bf16 %v3710_v29  ;;  %v5249_v34 = vunpack.c.h.bf16 %v3708_v21 }
  0x17   : > { %v3890_v33 = vpack.i.bf16 %v5235_v27, %v5233_v26  ;;  %v5251_v35 = vunpack.c.l.bf16 %v3709_v28  ;;  %v5258_v39 = vunpack.c.h.bf16 %v3711_v36  ;;  %v5260_v40 = vunpack.c.l.bf16 %v3712_v37 }
  0x18   : > { %3866 = vrot.lane.b32.xlu0 %v3865_v18, %s5115_s30  ;;  %v3905_v38 = vpack.i.bf16 %v5244_v32, %v5242_v31  ;;  %v5265_v42 = vunpack.c.h.bf16 %v3710_v29  ;;  %v5267_v43 = vunpack.c.l.bf16 %v3711_v36  ;;  %v5274_v47 = vunpack.c.h.bf16 %v3713_v44 }
  0x19   : > { %3876 = vrot.lane.b32.xlu1 %v3875_v14, %s5115_s30  ;;  %v3900_v41 = vpack.i.bf16 %v5251_v35, %v5249_v34  ;;  %v3915_v46 = vpack.i.bf16 %v5260_v40, %v5258_v39  ;;  %v5276_v48 = vunpack.c.l.bf16 %v3714_v45  ;;  %v5281_v50 = vunpack.c.h.bf16 %v3712_v37 }
  0x1a   : > { %v3910_v49 = vpack.i.bf16 %v5267_v43, %v5265_v42  ;;  %v5283_v51 = vunpack.c.l.bf16 %v3713_v44  ;;  %v480_v56 = vrot.slane %v5198_v9, 1  ;;  %v483_v57 = vrot.slane %v5194_v7, 1 }
  0x1b   : > { %v3925_v55 = vpack.i.bf16 %v5276_v48, %v5274_v47  ;;  %v484_v58 = vrot.slane %v5187_v3, 1  ;;  %v5298_v60 = vunpack.c.l.bf16 %v3715_v52  ;;  %v5300_v61 = vunpack.c.h.bf16 %v3714_v45 }
  0x1c   : > { %3881 = vrot.lane.b32.xlu0 %v3880_v25, %s5115_s30  ;;  %v3920_v59 = vpack.i.bf16 %v5283_v51, %v5281_v50  ;;  %v479_v62 = vrot.slane %v5196_v8, 1  ;;  %v5303_v63 = vunpack.c.h.bf16 %v3715_v52  ;;  %v488_v0 = vrot.slane %v5191_v5, 1 }
  0x1d   : > { %3886 = vrot.lane.b32.xlu1 %v3885_v22, %s5115_s30  ;;  %v5309_v1 = vsel %vm476_vm0, %v480_v56, %v5287_v54  ;;  %v5312_v2 = vsel %vm476_vm0, %v483_v57, %v484_v58  ;;  %v491_v6 = vrot.slane %v5200_v10, 1  ;;  %v492_v11 = vrot.slane %v5218_v19, 1 }
  0x1e   : > { %v3930_v12 = vpack.i.bf16 %v5298_v60, %v5300_v61  ;;  %v5320_v13 = vsel %vm476_vm0, %v479_v62, %v480_v56  ;;  %v487_v14 = vrot.slane %v5189_v4, 1  ;;  %v3940_v17 = vpack.i.bf16 %v5312_v2, %v5309_v1 }
  0x1f   : > { %v5327_v18 = vsel %vm476_vm0, %v488_v0, %v5287_v54  ;;  %v5332_v21 = vsel %vm476_vm0, %v491_v6, %v492_v11  ;;  %v496_v22 = vrot.slane %v5209_v15, 1  ;;  %v499_v25 = vrot.slane %v5211_v16, 1 }
  0x20   : > { %3891 = vrot.lane.b32.xlu0 %v3890_v33, %s5115_s30  ;;  %v500_v28 = vrot.slane %v5233_v26, 1  ;;  %v3935_v29 = vpack.i.bf16 %v5320_v13, %v5287_v54  ;;  %v5345_v33 = vsel %vm476_vm0, %v487_v14, %v488_v0  ;;  %v495_v36 = vrot.slane %v5220_v20, 1 }
  0x21   : > { %3896 = vrot.lane.b32.xlu1 %v3895_v30, %s5115_s30  ;;  %v5342_v30 = vsel %vm476_vm0, %v484_v58, %v5287_v54  ;;  %v3950_v37 = vpack.i.bf16 %v5332_v21, %v5327_v18  ;;  %v507_v45 = vrot.slane %v5228_v24, 1  ;;  %v5366_v52 = vsel %vm476_vm0, %v492_v11, %v5287_v54 }
  0x22   : > { %v5357_v44 = vsel %vm476_vm0, %v499_v25, %v500_v28  ;;  %v503_v56 = vrot.slane %v5235_v27, 1  ;;  %v515_v0 = vrot.slane %v5244_v32, 1  ;;  %v516_v6 = vrot.slane %v5265_v42, 1 }
  0x23   : > { %v511_v11 = vrot.slane %v5251_v35, 1  ;;  %v5391_v14 = vsel %vm476_vm0, %v500_v28, %v5287_v54 }
  0x24   : > { %3901 = vrot.lane.b32.xlu0 %v3900_v41, %s5115_s30  ;;  %v5354_v41 = vsel %vm476_vm0, %v496_v22, %v5287_v54  ;;  %v5409_v28 = vsel %vm476_vm0, %v515_v0, %v516_v6 }
  0x25   : > { %3906 = vrot.lane.b32.xlu1 %v3905_v38, %s5115_s30  ;;  %v504_v38 = vrot.slane %v5226_v23, 1  ;;  %8778 = vst [vmem:[#allocation3_spill] sm:$0xff] %v5354_v41  ;;  %v3960_v57 = vpack.i.bf16 %v5357_v44, %v5354_v41  ;;  %8785 = vst [vmem:[#allocation10_spill] sm:$0xff] %v5409_v28 }
  0x27   : > { %v5376_v58 = vsel %vm476_vm0, %v504_v38, %v5287_v54 }
  0x28   : > { %3911 = vrot.lane.b32.xlu0 %v3910_v49, %s5115_s30  ;;  %v3945_v49 = vpack.i.bf16 %v5345_v33, %v5342_v30  ;;  %8780 = vst [vmem:[#allocation5_spill] sm:$0xff] %v5376_v58 }
  0x29   : > { %3916 = vrot.lane.b32.xlu1 %v3915_v46, %s5115_s30  ;;  %v508_v46 = vrot.slane %v5249_v34, 1 }
  0x2b   : > { %v5381_v62 = vsel %vm476_vm0, %v507_v45, %v508_v46  ;;  %v524_v45 = vrot.slane %v5281_v50, 1 }
  0x2c   : > { %3921 = vrot.lane.b32.xlu0 %v3920_v59, %s5115_s30  ;;  %v512_v59 = vrot.slane %v5242_v31, 1  ;;  %8781 = vst [vmem:[#allocation6_spill] sm:$0xff] %v5381_v62 }
  0x2d   : > { %3926 = vrot.lane.b32.xlu1 %v3925_v55, %s5115_s30  ;;  %v5369_v55 = vsel %vm476_vm0, %v495_v36, %v496_v22  ;;  %v3970_v22 = vpack.i.bf16 %v5381_v62, %v5376_v58  ;;  %v520_v36 = vrot.slane %v5258_v39, 1  ;;  %v8791_v58 = vmov 0.0  }
  0x2e   : > { %8779 = vst [vmem:[#allocation4_spill] sm:$0xff] %v5369_v55  ;;  %v5400_v25 = vsel %vm476_vm0, %v512_v59, %v5287_v54 }
  0x2f   : > { %8783 = vst [vmem:[#allocation8_spill] sm:$0xff] %v5400_v25 }
  0x30   : > { %3931 = vrot.lane.b32.xlu0 %v3930_v12, %s5115_s30  ;;  %v3955_v12 = vpack.i.bf16 %v5369_v55, %v5366_v52 }
  0x31   : > { %609 = vrot.lane.b32.xlu1 %v5303_v63, %s5115_s30  ;;  %s5127_s30 = smov 64  }
  0x34   : > { %3936 = vrot.lane.b32.xlu0 %v3935_v29, %s5117_s8  ;;  %v5404_v29 = vsel %vm476_vm0, %v508_v46, %v5287_v54 }
  0x35   : > { %3941 = vrot.lane.b32.xlu1 %v3940_v17, %s5117_s8  ;;  %v5394_v17 = vsel %vm476_vm0, %v503_v56, %v504_v38  ;;  %8784 = vst [vmem:[#allocation9_spill] sm:$0xff] %v5404_v29  ;;  %v523_v38 = vrot.slane %v5260_v40, 1  ;;  %v3980_v56 = vpack.i.bf16 %v5409_v28, %v5400_v25  ;;  %v535_v28 = vrot.slane %v5298_v60, 1 }
  0x36   : > { %8782 = vst [vmem:[#allocation7_spill] sm:$0xff] %v5394_v17  ;;  %v3965_v46 = vpack.i.bf16 %v5394_v17, %v5391_v14  ;;  %v5449_v17 = vrot.slane %v8791_v58, 7 }
  0x37   : > { %v5430_v0 = vsel %vm476_vm0, %v523_v38, %v524_v45  ;;  %v532_v38 = vrot.slane %v5300_v61, 1 }
  0x38   : > { %3946 = vrot.lane.b32.xlu0 %v3945_v49, %s5117_s8  ;;  %v519_v49 = vrot.slane %v5267_v43, 1  ;;  %8788 = vst [vmem:[#allocation13_spill] sm:$0xff] %v5430_v0  ;;  %8792 = vst [vmem:[#allocation16_spill] sm:$0xff] %v5449_v17 }
  0x39   : > { %3951 = vrot.lane.b32.xlu1 %v3950_v37, %s5117_s8  ;;  %v5412_v37 = vsel %vm476_vm0, %v511_v11, %v512_v59  ;;  %v5426_v59 = vsel %vm476_vm0, %v520_v36, %v5287_v54  ;;  %v5434_v11 = vsel %vm476_vm0, %v516_v6, %v5287_v54  ;;  %v536_v6 = vrot.slane %v5303_v63, 1 }
  0x3a   : > { %8786 = vst [vmem:[#allocation11_spill] sm:$0xff] %v5412_v37  ;;  %8787 = vst [vmem:[#allocation12_spill] sm:$0xff] %v5426_v59  ;;  %v5441_v25 = vsel %vm476_vm0, %v519_v49, %v520_v36  ;;  %v3990_v36 = vpack.i.bf16 %v5430_v0, %v5426_v59  ;;  %v5458_v49 = vsel %vm476_vm0, %v524_v45, %v5287_v54  ;;  %v391_v0 = vrot.slane %v5187_v3, 7 }
  0x3b   : > { %8789 = vst [vmem:[#allocation14_spill] sm:$0xff] %v5434_v11  ;;  %8790 = vst [vmem:[#allocation15_spill] sm:$0xff] %v5441_v25  ;;  %v5474_v59 = vsel %vm476_vm0, %v532_v38, %v5287_v54  ;;  %v5478_v45 = vsel %vm476_vm0, %v536_v6, %v5287_v54 }
  0x3c   : > { %3956 = vrot.lane.b32.xlu0 %v3955_v12, %s5117_s8  ;;  %v528_v12 = vrot.slane %v5274_v47, 1  ;;  %8793 = vst [vmem:[#allocation17_spill] sm:$0xff] %v5458_v49  ;;  %8797 = vst [vmem:[#allocation21_spill] sm:$0xff] %v5474_v59 }
  0x3d   : > { %3961 = vrot.lane.b32.xlu1 %v3960_v57, %s5117_s8  ;;  %v3975_v57 = vpack.i.bf16 %v5412_v37, %v5404_v29  ;;  %v527_v37 = vrot.slane %v5283_v51, 1  ;;  %8798 = vst [vmem:[#allocation22_spill] sm:$0xff] %v5478_v45 }
  0x3e   : > { %v5464_v29 = vsel %vm476_vm0, %v528_v12, %v5287_v54 }
  0x3f   : > { %8794 = vst [vmem:[#allocation18_spill] sm:$0xff] %v5464_v29 }
  0x40   : > { %3966 = vrot.lane.b32.xlu0 %v3965_v46, %s5117_s8  ;;  %v3985_v46 = vpack.i.bf16 %v5441_v25, %v5434_v11  ;;  %v389_v25 = vrot.slane %v5194_v7, 7  ;;  %v5487_v11 = vunpack.c.h.bf16 %v3716_v53 }
  0x41   : > { %3971 = vrot.lane.b32.xlu1 %v3970_v22, %s5117_s8  ;;  %v531_v22 = vrot.slane %v5276_v48, 1 }
  0x43   : > { %v5467_v62 = vsel %vm476_vm0, %v531_v22, %v532_v38  ;;  %v5485_v22 = vunpack.c.l.bf16 %v3716_v53  ;;  %v385_v38 = vrot.slane %v5196_v8, 7 }
  0x44   : > { %3976 = vrot.lane.b32.xlu0 %v3975_v57, %s5117_s8  ;;  %8795 = vst [vmem:[#allocation19_spill] sm:$0xff] %v5467_v62  ;;  %v5481_v57 = vsel %vm476_vm0, %v535_v28, %v536_v6  ;;  %v4000_v28 = vpack.i.bf16 %v5467_v62, %v5464_v29  ;;  %v4010_v6 = vpack.i.bf16 %v8791_v58, %v5478_v45  ;;  %v546_v29 = vrot.slane %v5487_v11, 1 }
  0x45   : > { %3981 = vrot.lane.b32.xlu1 %v3980_v56, %s5117_s8  ;;  %v5470_v56 = vsel %vm476_vm0, %v527_v37, %v528_v12  ;;  %8799 = vst [vmem:[#allocation23_spill] sm:$0xff] %v5481_v57  ;;  %v5493_v12 = vpack.i.bf16 %v5327_v18, %v5345_v33  ;;  %v387_v37 = vrot.slane %v5198_v9, 7  ;;  %v4005_v18 = vpack.i.bf16 %v5481_v57, %v5474_v59 }
  0x46   : > { %8796 = vst [vmem:[#allocation20_spill] sm:$0xff] %v5470_v56  ;;  %v3995_v53 = vpack.i.bf16 %v5470_v56, %v5458_v49  ;;  %v5509_v33 = vsel %vm382_vm1, %v5449_v17, %v389_v25  ;;  %v397_v56 = vrot.slane %v5200_v10, 7  ;;  %v541_v58 = vrot.slane %v5485_v22, 7 }
  0x47   : > { %8800 = vst [vmem:[#allocation24_spill] sm:$0xff] %v5509_v33  ;;  %v543_v45 = vrot.slane %v5487_v11, 7  ;;  %v5522_v57 = vsel %vm382_vm1, %v5449_v17, %v385_v38  ;;  %v399_v59 = vrot.slane %v5218_v19, 7  ;;  %v393_v49 = vrot.slane %v5189_v4, 7 }
  0x48   : > { %3986 = vrot.lane.b32.xlu0 %v3985_v46, %s5117_s8  ;;  %v5514_v46 = vsel %vm382_vm1, %v389_v25, %v391_v0  ;;  %8802 = vst [vmem:[#allocation26_spill] sm:$0xff] %v5522_v57  ;;  %v548_v25 = vsel %vm476_vm0, %v546_v29, %v5287_v54  ;;  %v5530_v0 = vsel %vm382_vm1, %v385_v38, %v387_v37  ;;  %v401_v54 = vrot.slane %v5220_v20, 7 }
  0x49   : > { %3991 = vrot.lane.b32.xlu1 %v3990_v36, %s5117_s8  ;;  %v545_v36 = vrot.slane %v5485_v22, 1  ;;  %8801 = vst [vmem:[#allocation25_spill] sm:$0xff] %v5514_v46  ;;  %8803 = vst [vmem:[#allocation27_spill] sm:$0xff] %v5530_v0  ;;  %v5538_v55 = vpack.i.bf16 %v5514_v46, %v5509_v33  ;;  %v4015_v37 = vpack.i.bf16 %v5530_v0, %v5522_v57  ;;  %v411_v33 = vrot.slane %v5226_v23, 7 }
  0x4a   : > { %v5548_v38 = vsel %vm382_vm1, %v5449_v17, %v397_v56  ;;  %v417_v57 = vrot.slane %v5251_v35, 7  ;;  %v431_v46 = vrot.slane %v5281_v50, 7 }
  0x4b   : > { %v547_v62 = vsel %vm476_vm0, %v545_v36, %v546_v29  ;;  %v542_v36 = vsel %vm382_vm1, %v5449_v17, %v541_v58  ;;  %v544_v29 = vsel %vm382_vm1, %v541_v58, %v543_v45  ;;  %8804 = vst [vmem:[#allocation28_spill] sm:$0xff] %v5548_v38  ;;  %v405_v45 = vrot.slane %v5211_v16, 7 }
  0x4c   : > { %3996 = vrot.lane.b32.xlu0 %v3995_v53, %s5117_s8  ;;  %v5534_v41 = vpack.i.bf16 %v548_v25, %v547_v62  ;;  %v5551_v62 = vsel %vm382_vm1, %v397_v56, %v399_v59  ;;  %v5553_v53 = vpack.i.bf16 %v544_v29, %v542_v36  ;;  %v5558_v25 = vsel %vm382_vm1, %v5449_v17, %v393_v49 }
  0x4d   : > { %4001 = vrot.lane.b32.xlu1 %v4000_v28, %s5117_s8  ;;  %v395_v28 = vrot.slane %v5191_v5, 7  ;;  %8805 = vst [vmem:[#allocation29_spill] sm:$0xff] %v5551_v62  ;;  %8806 = vst [vmem:[#allocation30_spill] sm:$0xff] %v5558_v25  ;;  %v403_v59 = vrot.slane %v5209_v15, 7  ;;  %v5571_v56 = vpack.i.bf16 %v5551_v62, %v5548_v38  ;;  %v413_v36 = vrot.slane %v5228_v24, 7 }
  0x4e   : > { %v415_v29 = vrot.slane %v5249_v34, 7  ;;  %v5589_v62 = vsel %vm382_vm1, %v5449_v17, %v401_v54  ;;  %v423_v38 = vrot.slane %v5265_v42, 7 }
  0x4f   : > { %v5561_v58 = vsel %vm382_vm1, %v393_v49, %v395_v28  ;;  %8810 = vst [vmem:[#allocation34_spill] sm:$0xff] %v5589_v62  ;;  %v5592_v0 = vsel %vm382_vm1, %v401_v54, %v403_v59  ;;  %v5611_v59 = vsel %vm382_vm1, %v5449_v17, %v413_v36 }
  0x50   : > { %4006 = vrot.lane.b32.xlu0 %v4005_v18, %s5117_s8  ;;  %8807 = vst [vmem:[#allocation31_spill] sm:$0xff] %v5561_v58  ;;  %v5575_v49 = vpack.i.bf16 %v5561_v58, %v5558_v25  ;;  %v5580_v18 = vsel %vm382_vm1, %v5449_v17, %v405_v45  ;;  %8811 = vst [vmem:[#allocation35_spill] sm:$0xff] %v5592_v0  ;;  %v5607_v54 = vpack.i.bf16 %v5592_v0, %v5589_v62 }
  0x51   : > { %4011 = vrot.lane.b32.xlu1 %v4010_v6, %s5117_s8  ;;  %v407_v6 = vrot.slane %v5233_v26, 7  ;;  %8808 = vst [vmem:[#allocation32_spill] sm:$0xff] %v5580_v18  ;;  %8813 = vst [vmem:[#allocation37_spill] sm:$0xff] %v5611_v59  ;;  %v5614_v58 = vsel %vm382_vm1, %v413_v36, %v415_v29  ;;  %v419_v62 = vrot.slane %v5242_v31, 7  ;;  %v429_v0 = vrot.slane %v5260_v40, 7 }
  0x52   : > { %8814 = vst [vmem:[#allocation38_spill] sm:$0xff] %v5614_v58  ;;  %v5630_v36 = vpack.i.bf16 %v5614_v58, %v5611_v59  ;;  %v5649_v58 = vsel %vm382_vm1, %v5449_v17, %v417_v57  ;;  %v425_v25 = vrot.slane %v5267_v43, 7 }
  0x53   : > { %v5583_v28 = vsel %vm382_vm1, %v405_v45, %v407_v6  ;;  %v421_v6 = vrot.slane %v5244_v32, 7  ;;  %8820 = vst [vmem:[#allocation44_spill] sm:$0xff] %v5649_v58  ;;  %v5652_v59 = vsel %vm382_vm1, %v417_v57, %v419_v62  ;;  %v5671_v62 = vsel %vm382_vm1, %v5449_v17, %v429_v0 }
  0x54   : > { %4016 = vrot.lane.b32.xlu0 %v4015_v37, %s5118_s9  ;;  %8809 = vst [vmem:[#allocation33_spill] sm:$0xff] %v5583_v28  ;;  %v409_v37 = vrot.slane %v5235_v27, 7  ;;  %v5600_v45 = vpack.i.bf16 %v5583_v28, %v5580_v18  ;;  %8817 = vst [vmem:[#allocation41_spill] sm:$0xff] %v5630_v36  ;;  %v5667_v57 = vpack.i.bf16 %v5652_v59, %v5649_v58  ;;  %v435_v58 = vrot.slane %v5274_v47, 7 }
  0x55   : > { %4021 = vrot.lane.b32.xlu1 %v5538_v55, %s5118_s9  ;;  %v5634_v29 = vsel %vm382_vm1, %v5449_v17, %v421_v6  ;;  %8821 = vst [vmem:[#allocation45_spill] sm:$0xff] %v5652_v59  ;;  %8823 = vst [vmem:[#allocation47_spill] sm:$0xff] %v5671_v62 }
  0x56   : > { %8812 = vst [vmem:[#allocation36_spill] sm:$0xff] %v5600_v45  ;;  %v5619_v28 = vsel %vm382_vm1, %v5449_v17, %v409_v37  ;;  %v5622_v18 = vsel %vm382_vm1, %v409_v37, %v411_v33  ;;  %8818 = vst [vmem:[#allocation42_spill] sm:$0xff] %v5634_v29  ;;  %v5643_v37 = vsel %vm382_vm1, %v421_v6, %v423_v38  ;;  %v437_v6 = vrot.slane %v5276_v48, 7 }
  0x57   : > { %8815 = vst [vmem:[#allocation39_spill] sm:$0xff] %v5619_v28  ;;  %8816 = vst [vmem:[#allocation40_spill] sm:$0xff] %v5622_v18  ;;  %v5640_v33 = vpack.i.bf16 %v5622_v18, %v5619_v28  ;;  %v5660_v38 = vpack.i.bf16 %v5643_v37, %v5634_v29  ;;  %v5674_v28 = vsel %vm382_vm1, %v429_v0, %v431_v46  ;;  %v439_v18 = vrot.slane %v5300_v61, 7 }
  0x58   : > { %4026 = vrot.lane.b32.xlu0 %v5575_v49, %s5118_s9  ;;  %8819 = vst [vmem:[#allocation43_spill] sm:$0xff] %v5643_v37  ;;  %8824 = vst [vmem:[#allocation48_spill] sm:$0xff] %v5674_v28  ;;  %v5679_v37 = vsel %vm382_vm1, %v5449_v17, %v425_v25  ;;  %v5690_v46 = vpack.i.bf16 %v5674_v28, %v5671_v62  ;;  %v441_v62 = vrot.slane %v5298_v60, 7 }
  0x59   : > { %4031 = vrot.lane.b32.xlu1 %v5571_v56, %s5118_s9  ;;  %8822 = vst [vmem:[#allocation46_spill] sm:$0xff] %v5660_v38  ;;  %8825 = vst [vmem:[#allocation49_spill] sm:$0xff] %v5679_v37 }
  0x5c   : > { %4036 = vrot.lane.b32.xlu0 %v5607_v54, %s5118_s9 }
  0x5d   : > { %4041 = vrot.lane.b32.xlu1 %v5600_v45, %s5118_s9  ;;  %v427_v45 = vrot.slane %v5258_v39, 7 }
  0x5f   : > { %v5682_v29 = vsel %vm382_vm1, %v425_v25, %v427_v45  ;;  %v5700_v25 = vsel %vm382_vm1, %v5449_v17, %v437_v6  ;;  %v5703_v45 = vsel %vm382_vm1, %v437_v6, %v439_v18 }
  0x60   : > { %4046 = vrot.lane.b32.xlu0 %v5640_v33, %s5118_s9  ;;  %8826 = vst [vmem:[#allocation50_spill] sm:$0xff] %v5682_v29  ;;  %v5696_v0 = vpack.i.bf16 %v5682_v29, %v5679_v37  ;;  %8827 = vst [vmem:[#allocation51_spill] sm:$0xff] %v5700_v25  ;;  %v5718_v37 = vpack.i.bf16 %v5703_v45, %v5700_v25 }
  0x61   : > { %4051 = vrot.lane.b32.xlu1 %v5630_v36, %s5118_s9  ;;  %v433_v36 = vrot.slane %v5283_v51, 7  ;;  %8828 = vst [vmem:[#allocation52_spill] sm:$0xff] %v5703_v45  ;;  %v5745_v45 = vpack.i.bf16 %v5187_v3, %v5194_v7  ;;  %v5761_v3 = vpack.i.bf16 %v5191_v5, %v5189_v4  ;;  %v5767_v7 = vpack.i.bf16 %v5233_v26, %v5211_v16 }
  0x62   : > { %v5779_v4 = vpack.i.bf16 %v5249_v34, %v5228_v24  ;;  %v5785_v5 = vpack.i.bf16 %v5226_v23, %v5235_v27  ;;  %v5809_v16 = vpack.i.bf16 %v5258_v39, %v5267_v43  ;;  %v5819_v23 = vpack.i.bf16 %v5300_v61, %v5276_v48  ;;  %v8835_v61 = vld [vmem:[#allocation3_spill] sm:$0xff] }
  0x63   : > { %v5707_v59 = vsel %vm382_vm1, %v5449_v17, %v433_v36  ;;  %v5710_v28 = vsel %vm382_vm1, %v433_v36, %v435_v58  ;;  %v5728_v58 = vsel %vm382_vm1, %v5449_v17, %v441_v62  ;;  %v5825_v24 = vpack.i.bf16 %v5274_v47, %v5283_v51 }
  0x64   : > { %4056 = vrot.lane.b32.xlu0 %v5667_v57, %s5118_s9  ;;  %8829 = vst [vmem:[#allocation53_spill] sm:$0xff] %v5707_v59  ;;  %8830 = vst [vmem:[#allocation54_spill] sm:$0xff] %v5710_v28  ;;  %v5724_v18 = vpack.i.bf16 %v5710_v28, %v5707_v59  ;;  %v5851_v39 = vpack.i.bf16 %v5342_v30, %v5312_v2  ;;  %v5863_v43 = vpack.i.bf16 %v5366_v52, %v5332_v21  ;;  %v8839_v21 = vld [vmem:[#allocation9_spill] sm:$0xff] }
  0x65   : > { %4061 = vrot.lane.b32.xlu1 %v5660_v38, %s5118_s9  ;;  %v443_v38 = vrot.slane %v5303_v63, 7  ;;  %v8832_v47 = vpack.i.bf16 %v5309_v1, %v5320_v13  ;;  %v5877_v51 = vpack.i.bf16 %v5391_v14, %v5357_v44  ;;  %v8838_v13 = vld [vmem:[#allocation6_spill] sm:$0xff]  ;;  %v8840_v44 = vld [vmem:[#allocation7_spill] sm:$0xff]  ;;  %v8841_v52 = vld [vmem:[#allocation5_spill] sm:$0xff] }
  0x66   : > { %v5893_v30 = vpack.i.bf16 %v8839_v21, %v8838_v13  ;;  %v5899_v14 = vpack.i.bf16 %v8841_v52, %v8840_v44  ;;  %v8847_v13 = vld [vmem:[#allocation8_spill] sm:$0xff]  ;;  %v8848_v59 = vld [vmem:[#allocation13_spill] sm:$0xff] }
  0x67   : > { %v5731_v36 = vsel %vm382_vm1, %v441_v62, %v443_v38  ;;  %v5753_v38 = vpack.i.bf16 %v5218_v19, %v5200_v10  ;;  %v8831_v62 = vpack.i.bf16 %v5198_v9, %v5196_v8  ;;  %v5773_v10 = vpack.i.bf16 %v5209_v15, %v5220_v20  ;;  %v8849_v28 = vld [vmem:[#allocation17_spill] sm:$0xff] }
  0x68   : > { %4066 = vrot.lane.b32.xlu0 %v5696_v0, %s5118_s9  ;;  %v5739_v6 = vpack.i.bf16 %v5731_v36, %v5728_v58  ;;  %v5791_v8 = vpack.i.bf16 %v5265_v42, %v5244_v32  ;;  %v5797_v9 = vpack.i.bf16 %v5242_v31, %v5251_v35  ;;  %v5803_v15 = vpack.i.bf16 %v5281_v50, %v5260_v40 }
  0x69   : > { %4071 = vrot.lane.b32.xlu1 %v5690_v46, %s5118_s9  ;;  %v5835_v31 = vpack.i.bf16 %v5487_v11, %v5485_v22  ;;  %v5841_v32 = vpack.i.bf16 %v5303_v63, %v5298_v60  ;;  %v8834_v60 = vld [vmem:[#allocation4_spill] sm:$0xff]  ;;  %v5925_v25 = vpack.i.bf16 %v8849_v28, %v8848_v59  ;;  %v8857_v59 = vld [vmem:[#allocation18_spill] sm:$0xff] }
  0x6a   : > { %v5883_v63 = vpack.i.bf16 %v8835_v61, %v8834_v60  ;;  %v8846_v61 = vld [vmem:[#allocation11_spill] sm:$0xff]  ;;  %v8856_v28 = vld [vmem:[#allocation20_spill] sm:$0xff] }
  0x6b   : > { %v5915_v21 = vpack.i.bf16 %v8847_v13, %v8846_v61 }
  0x6c   : > { %4076 = vrot.lane.b32.xlu0 %v5724_v18, %s5118_s9 }
  0x6d   : > { %4081 = vrot.lane.b32.xlu1 %v5718_v37, %s5118_s9 }
  0x70   : > { %4086 = vrot.lane.b32.xlu0 %v5739_v6, %s5118_s9 }
  0x71   : > { %4091 = vrot.lane.b32.xlu1 %v5553_v53, %s5118_s9 }
  0x74   : > { %4096 = vrot.lane.b32.xlu0 %v8831_v62, %s5119_s10  ;;  %v8844_v62 = vld [vmem:[#allocation10_spill] sm:$0xff] }
  0x75   : > { %4101 = vrot.lane.b32.xlu1 %v5745_v45, %s5119_s10 }
  0x78   : > { %4106 = vrot.lane.b32.xlu0 %v5761_v3, %s5119_s10 }
  0x79   : > { %4111 = vrot.lane.b32.xlu1 %v5753_v38, %s5119_s10 }
  0x7c   : > { %4116 = vrot.lane.b32.xlu0 %v5773_v10, %s5119_s10 }
  0x7d   : > { %4121 = vrot.lane.b32.xlu1 %v5767_v7, %s5119_s10 }
  0x80   : > { %4126 = vrot.lane.b32.xlu0 %v5785_v5, %s5119_s10 }
  0x81   : > { %4131 = vrot.lane.b32.xlu1 %v5779_v4, %s5119_s10 }
  0x84   : > { %4136 = vrot.lane.b32.xlu0 %v5797_v9, %s5119_s10 }
  0x85   : > { %4141 = vrot.lane.b32.xlu1 %v5791_v8, %s5119_s10 }
  0x86   : > { %v5813_v20 = vpop.permute.xlu0 %3861 }
  0x87   : > { %v5811_v19 = vpop.permute.xlu1 %3871 }
  0x88   : > { %4146 = vrot.lane.b32.xlu0 %v5809_v16, %s5119_s10 }
  0x89   : > { %4151 = vrot.lane.b32.xlu1 %v5803_v15, %s5119_s10 }
  0x8a   : > { %v5829_v27 = vpop.permute.xlu0 %3866 }
  0x8b   : > { %v5827_v26 = vpop.permute.xlu1 %3876 }
  0x8c   : > { %4156 = vrot.lane.b32.xlu0 %v5825_v24, %s5119_s10 }
  0x8d   : > { %4161 = vrot.lane.b32.xlu1 %v5819_v23, %s5119_s10 }
  0x8e   : > { %v5845_v35 = vpop.permute.xlu0 %3881 }
  0x8f   : > { %v5843_v34 = vpop.permute.xlu1 %3886 }
  0x90   : > { %4166 = vrot.lane.b32.xlu0 %v5841_v32, %s5119_s10 }
  0x91   : > { %4171 = vrot.lane.b32.xlu1 %v5835_v31, %s5119_s10 }
  0x92   : > { %v5857_v42 = vpop.permute.xlu0 %3891 }
  0x93   : > { %v5855_v40 = vpop.permute.xlu1 %3896 }
  0x94   : > { %4176 = vrot.lane.b32.xlu0 %v8832_v47, %s5120_s11  ;;  %v8845_v47 = vld [vmem:[#allocation14_spill] sm:$0xff] }
  0x95   : > { %4181 = vrot.lane.b32.xlu1 %v5851_v39, %s5120_s11  ;;  %v5909_v60 = vpack.i.bf16 %v8845_v47, %v8844_v62  ;;  %v8850_v62 = vld [vmem:[#allocation15_spill] sm:$0xff]  ;;  %v8851_v47 = vld [vmem:[#allocation12_spill] sm:$0xff] }
  0x96   : > { %v5871_v50 = vpop.permute.xlu0 %3901  ;;  %v5931_v29 = vpack.i.bf16 %v8851_v47, %v8850_v62 }
  0x97   : > { %v5869_v48 = vpop.permute.xlu1 %3906  ;;  %8833 = vst [vmem:[#allocation55_spill] sm:$0xff] %v5871_v50 }
  0x98   : > { %4186 = vrot.lane.b32.xlu0 %v5493_v12, %s5120_s11 }
  0x99   : > { %4191 = vrot.lane.b32.xlu1 %v5863_v43, %s5120_s11 }
  0x9a   : > { %v5887_v2 = vpop.permute.xlu0 %3911 }
  0x9b   : > { %v5885_v1 = vpop.permute.xlu1 %3916  ;;  %8837 = vst [vmem:[#allocation3_spill] sm:$0xff] %v5887_v2 }
  0x9c   : > { %8836 = vst [vmem:[#allocation4_spill] sm:$0xff] %v5885_v1  ;;  %4196 = vrot.lane.b32.xlu0 %v5883_v63, %s5120_s11  ;;  %v5947_v1 = vpack.i.bf16 %v8857_v59, %v8856_v28 }
  0x9d   : > { %4201 = vrot.lane.b32.xlu1 %v5877_v51, %s5120_s11 }
  0x9e   : > { %v5903_v22 = vpop.permute.xlu0 %3921 }
  0x9f   : > { %v5901_v11 = vpop.permute.xlu1 %3926  ;;  %8843 = vst [vmem:[#allocation9_spill] sm:$0xff] %v5903_v22  ;;  %v8854_v22 = vld [vmem:[#allocation19_spill] sm:$0xff] }
  0xa0   : > { %8842 = vst [vmem:[#allocation6_spill] sm:$0xff] %v5901_v11  ;;  %4206 = vrot.lane.b32.xlu0 %v5899_v14, %s5120_s11  ;;  %v8855_v11 = vld [vmem:[#allocation21_spill] sm:$0xff] }
  0xa1   : > { %4211 = vrot.lane.b32.xlu1 %v5893_v30, %s5120_s11  ;;  %v5941_v2 = vpack.i.bf16 %v8855_v11, %v8854_v22  ;;  %v8859_v11 = vld [vmem:[#allocation22_spill] sm:$0xff] }
  0xa2   : > { %v5919_v52 = vpop.permute.xlu0 %3931 }
  0xa3   : > { %v5917_v44 = vpop.permute.xlu1 %609 }
  0xa4   : > { %4216 = vrot.lane.b32.xlu0 %v5915_v21, %s5120_s11 }
  0xa5   : > { %4221 = vrot.lane.b32.xlu1 %v5909_v60, %s5120_s11 }
  0xa6   : > { %v5935_v13 = vpop.permute.xlu0 %3936 }
  0xa7   : > { %v5933_v61 = vpop.permute.xlu1 %3941  ;;  %8853 = vst [vmem:[#allocation5_spill] sm:$0xff] %v5935_v13  ;;  %v8858_v13 = vld [vmem:[#allocation23_spill] sm:$0xff] }
  0xa8   : > { %8852 = vst [vmem:[#allocation7_spill] sm:$0xff] %v5933_v61  ;;  %4226 = vrot.lane.b32.xlu0 %v5931_v29, %s5120_s11  ;;  %v5959_v22 = vpack.i.bf16 %v8859_v11, %v8858_v13 }
  0xa9   : > { %4231 = vrot.lane.b32.xlu1 %v5925_v25, %s5120_s11 }
  0xaa   : > { %v5951_v47 = vpop.permute.xlu0 %3946 }
  0xab   : > { %v5949_v62 = vpop.permute.xlu1 %3951 }
  0xac   : > { %4236 = vrot.lane.b32.xlu0 %v5947_v1, %s5120_s11 }
  0xad   : > { %4241 = vrot.lane.b32.xlu1 %v5941_v2, %s5120_s11 }
  0xae   : > { %v5963_v50 = vpop.permute.xlu0 %3956 }
  0xaf   : > { %v5961_v61 = vpop.permute.xlu1 %3961 }
  0xb0   : > { %4246 = vrot.lane.b32.xlu0 %v5959_v22, %s5120_s11 }
  0xb1   : > { %4251 = vrot.lane.b32.xlu1 %v5534_v41, %s5120_s11 }
  0xb2   : > { %v5971_v59 = vpop.permute.xlu0 %3966 }
  0xb3   : > { %v5969_v28 = vpop.permute.xlu1 %3971  ;;  %8861 = vst [vmem:[#allocation14_spill] sm:$0xff] %v5971_v59 }
  0xb4   : > { %8860 = vst [vmem:[#allocation10_spill] sm:$0xff] %v5969_v28  ;;  %4256 = vrot.lane.b32.xlu0 %v5538_v55, %s5121_s12 }
  0xb5   : > { %4261 = vrot.lane.b32.xlu1 %v5575_v49, %s5121_s12  ;;  %v8864_v49 = vld [vmem:[#allocation36_spill] sm:$0xff] }
  0xb6   : > { %v5979_v11 = vpop.permute.xlu0 %3976 }
  0xb7   : > { %v5977_v13 = vpop.permute.xlu1 %3981 }
  0xb8   : > { %8862 = vst [vmem:[#allocation11_spill] sm:$0xff] %v5977_v13  ;;  %4266 = vrot.lane.b32.xlu0 %v5571_v56, %s5121_s12 }
  0xb9   : > { %4271 = vrot.lane.b32.xlu1 %v5607_v54, %s5121_s12  ;;  %v8866_v54 = vld [vmem:[#allocation41_spill] sm:$0xff] }
  0xba   : > { %v5987_v59 = vpop.permute.xlu0 %3986 }
  0xbb   : > { %v5985_v28 = vpop.permute.xlu1 %3991 }
  0xbc   : > { %8863 = vst [vmem:[#allocation8_spill] sm:$0xff] %v5985_v28  ;;  %4276 = vrot.lane.b32.xlu0 %v8864_v49, %s5121_s12 }
  0xbd   : > { %4281 = vrot.lane.b32.xlu1 %v5640_v33, %s5121_s12  ;;  %v8868_v33 = vld [vmem:[#allocation46_spill] sm:$0xff] }
  0xbe   : > { %v5995_v13 = vpop.permute.xlu0 %3996 }
  0xbf   : > { %v5993_v55 = vpop.permute.xlu1 %4001 }
  0xc0   : > { %8865 = vst [vmem:[#allocation13_spill] sm:$0xff] %v5993_v55  ;;  %4286 = vrot.lane.b32.xlu0 %v8866_v54, %s5121_s12 }
  0xc1   : > { %4291 = vrot.lane.b32.xlu1 %v5667_v57, %s5121_s12 }
  0xc2   : > { %v6003_v28 = vpop.permute.xlu0 %4006 }
  0xc3   : > { %v6001_v56 = vpop.permute.xlu1 %4011 }
  0xc4   : > { %8867 = vst [vmem:[#allocation17_spill] sm:$0xff] %v6001_v56  ;;  %4296 = vrot.lane.b32.xlu0 %v8868_v33, %s5121_s12 }
  0xc5   : > { %4301 = vrot.lane.b32.xlu1 %v5696_v0, %s5121_s12  ;;  %v5095_v0 = vld [vmem:[%s8625_s1 + $0x10] ss:$0 sps:$4 sm:$0x33]  }
  0xc6   : > { %v6011_v55 = vpop.permute.xlu0 %4016  ;;  %3837 = vmatprep.subr.msk.bf16.mxu0 %vm1644_vm2, %v5095_v0 }
  0xc7   : > { %v6009_v49 = vpop.permute.xlu1 %4021 }
  0xc8   : > { %4306 = vrot.lane.b32.xlu0 %v5690_v46, %s5121_s12 }
  0xc9   : > { %4311 = vrot.lane.b32.xlu1 %v5724_v18, %s5121_s12  ;;  %v1646_v18 = vsel %vm1644_vm2, %v5095_v0, 0  ;;  %v5097_v0 = vld [vmem:[%s8625_s1] sm:$0xff]   ;;  %vm3096_vm2 = vcmask 523264  }
  0xca   : > { %v6019_v54 = vpop.permute.xlu0 %4026  ;;  %3758 = vmatpush3.bf16.msra.mxu0 %v1646_v18 }
  0xcb   : > { %v6017_v57 = vpop.permute.xlu1 %4031  ;;  %8869 = vst [vmem:[#allocation15_spill] sm:$0xff] %v6019_v54 }
  0xcc   : > { %4316 = vrot.lane.b32.xlu0 %v5718_v37, %s5121_s12 }
  0xcd   : > { %4321 = vrot.lane.b32.xlu1 %v5739_v6, %s5121_s12  ;;  %v5096_v6 = vld [vmem:[%s8625_s1 + $0x8] sm:$0xff]  }
  0xce   : > { %v6030_v46 = vpop.permute.xlu0 %4036  ;;  %3759 = vmatprep.subr.bf16.mxu0 %v5096_v6 }
  0xcf   : > { %v6028_v33 = vpop.permute.xlu1 %4041  ;;  %3760 = vmatpush3.bf16.msra.mxu0 %v5096_v6 }
  0xd0   : > { %4326 = vrot.lane.b32.xlu0 %v5553_v53, %s5121_s12  ;;  %3761 = vmatprep.subr.bf16.mxu0 %v5097_v0 }
  0xd1   : > { %1083 = vrot.lane.b32.xlu1 %v5449_v17, %s5121_s12 }
  0xd2   : > { %v6041_v37 = vpop.permute.xlu0 %4046 }
  0xd3   : > { %v6039_v54 = vpop.permute.xlu1 %4051  ;;  %3762 = vmatpush3.bf16.msra.mxu0 %v5097_v0  ;;  %v3934_v0 = vunpack.i.h.bf16 %v5919_v52 }
  0xd4   : > { %4331 = vrot.lane.b32.xlu0 %v5745_v45, %s5122_s17 }
  0xd5   : > { %4336 = vrot.lane.b32.xlu1 %v5761_v3, %s5122_s17 }
  0xd6   : > { %v6052_v53 = vpop.permute.xlu0 %4056 }
  0xd7   : > { %v6050_v18 = vpop.permute.xlu1 %4061  ;;  %8870 = vst [vmem:[#allocation12_spill] sm:$0xff] %v6052_v53 }
  0xd8   : > { %4341 = vrot.lane.b32.xlu0 %v5753_v38, %s5122_s17  ;;  %v4009_v38 = vunpack.i.h.bf16 %v6003_v28 }
  0xd9   : > { %4346 = vrot.lane.b32.xlu1 %v5773_v10, %s5122_s17  ;;  %v4013_v10 = vunpack.i.l.bf16 %v6001_v56 }
  0xda   : > { %v6060_v6 = vpop.permute.xlu0 %4066 }
  0xdb   : > { %v6058_v3 = vpop.permute.xlu1 %4071  ;;  %8872 = vst [vmem:[#allocation21_spill] sm:$0xff] %v6060_v6 }
  0xdc   : > { %8871 = vst [vmem:[#allocation19_spill] sm:$0xff] %v6058_v3  ;;  %4351 = vrot.lane.b32.xlu0 %v5767_v7, %s5122_s17 }
  0xdd   : > { %4356 = vrot.lane.b32.xlu1 %v5785_v5, %s5122_s17  ;;  %v1333_v5 = vsel %vm1302_vm3, %v5731_v36, %v5917_v44 }
  0xde   : > { %v6069_v53 = vpop.permute.xlu0 %4076  ;;  %v1365_v3 = vsel %vm1334_vm4, %v1333_v5, %v4013_v10  ;;  %v3878_v10 = vunpack.i.l.bf16 %v5827_v26 }
  0xdf   : > { %v6066_v45 = vpop.permute.xlu1 %4081  ;;  %8874 = vst [vmem:[#allocation18_spill] sm:$0xff] %v6069_v53  ;;  %v1332_v53 = vsel %vm1302_vm3, %v5728_v58, %v3934_v0  ;;  %v3879_v0 = vunpack.i.h.bf16 %v5827_v26  ;;  %v3884_v26 = vunpack.i.h.bf16 %v5845_v35 }
  0xe0   : > { %8873 = vst [vmem:[#allocation20_spill] sm:$0xff] %v6066_v45  ;;  %4361 = vrot.lane.b32.xlu0 %v5851_v39, %s5123_s20 }
  0xe1   : > { %4366 = vrot.lane.b32.xlu1 %v5493_v12, %s5123_s20  ;;  %v1364_v12 = vsel %vm1334_vm4, %v1332_v53, %v4009_v38 }
  0xe2   : > { %v6082_v6 = vpop.permute.xlu0 %4086 }
  0xe3   : > { %v4092_v7 = vpop.permute.xlu1 %4091  ;;  %8875 = vst [vmem:[#allocation23_spill] sm:$0xff] %v6082_v6 }
  0xe4   : > { %v4094_v56 = vunpack.i.h.bf16 %v4092_v7  ;;  %v4093_v45 = vunpack.i.l.bf16 %v4092_v7  ;;  %4371 = vrot.lane.b32.xlu0 %v5863_v43, %s5123_s20  ;;  %v3868_v7 = vunpack.i.l.bf16 %v5829_v27 }
  0xe5   : > { %4376 = vrot.lane.b32.xlu1 %v5883_v63, %s5123_s20 }
  0xe6   : > { %v6089_v39 = vsel %vm1366_vm5, %v1364_v12, %v4093_v45  ;;  %v6092_v36 = vsel %vm1366_vm5, %v1365_v3, %v4094_v56  ;;  %v6098_v44 = vpop.permute.xlu0 %4096  ;;  %v8896_v12 = vld [vmem:[#allocation25_spill] sm:$0xff] }
  0xe7   : > { %v6096_v58 = vpop.permute.xlu1 %4101  ;;  %8877 = vst [vmem:[#allocation36_spill] sm:$0xff] %v6098_v44  ;;  %v8929_v44 = vld [vmem:[#allocation49_spill] sm:$0xff] }
  0xe8   : > { %8876 = vst [vmem:[#allocation22_spill] sm:$0xff] %v6096_v58  ;;  %4381 = vrot.lane.b32.xlu0 %v5877_v51, %s5123_s20  ;;  %v8930_v58 = vld [vmem:[#allocation43_spill] sm:$0xff] }
  0xe9   : > { %4386 = vrot.lane.b32.xlu1 %v5899_v14, %s5123_s20 }
  0xea   : > { %v6106_v53 = vpop.permute.xlu0 %4106 }
  0xeb   : > { %v6104_v63 = vpop.permute.xlu1 %4111  ;;  %8879 = vst [vmem:[#allocation46_spill] sm:$0xff] %v6106_v53  ;;  %v8925_v53 = vld [vmem:[#allocation38_spill] sm:$0xff] }
  0xec   : > { %8878 = vst [vmem:[#allocation41_spill] sm:$0xff] %v6104_v63  ;;  %4391 = vrot.lane.b32.xlu0 %v5779_v4, %s5122_s17 }
  0xed   : > { %4396 = vrot.lane.b32.xlu1 %v5797_v9, %s5122_s17 }
  0xee   : > { %v6114_v56 = vpop.permute.xlu0 %4116 }
  0xef   : > { %v6112_v43 = vpop.permute.xlu1 %4121  ;;  %8881 = vst [vmem:[#allocation57_spill] sm:$0xff] %v6114_v56 }
  0xf0   : > { %8880 = vst [vmem:[#allocation56_spill] sm:$0xff] %v6112_v43  ;;  %4401 = vrot.lane.b32.xlu0 %v5893_v30, %s5123_s20  ;;  %v8924_v43 = vld [vmem:[#allocation5_spill] sm:$0xff] }
  0xf1   : > { %4406 = vrot.lane.b32.xlu1 %v5915_v21, %s5123_s20 }
  0xf2   : > { %v6122_v14 = vpop.permute.xlu0 %4126 }
  0xf3   : > { %v6120_v51 = vpop.permute.xlu1 %4131  ;;  %8883 = vst [vmem:[#allocation59_spill] sm:$0xff] %v6122_v14 }
  0xf4   : > { %8882 = vst [vmem:[#allocation58_spill] sm:$0xff] %v6120_v51  ;;  %4411 = vrot.lane.b32.xlu0 %v5791_v8, %s5122_s17  ;;  %v8923_v51 = vld [vmem:[#allocation7_spill] sm:$0xff] }
  0xf5   : > { %4416 = vrot.lane.b32.xlu1 %v5809_v16, %s5122_s17  ;;  %v3944_v56 = vunpack.i.h.bf16 %v8923_v51 }
  0xf6   : > { %v6130_v9 = vpop.permute.xlu0 %4136 }
  0xf7   : > { %v6128_v4 = vpop.permute.xlu1 %4141  ;;  %8885 = vst [vmem:[#allocation61_spill] sm:$0xff] %v6130_v9 }
  0xf8   : > { %8884 = vst [vmem:[#allocation60_spill] sm:$0xff] %v6128_v4  ;;  %4421 = vrot.lane.b32.xlu0 %v5909_v60, %s5123_s20 }
  0xf9   : > { %4426 = vrot.lane.b32.xlu1 %v5931_v29, %s5123_s20 }
  0xfa   : > { %v6138_v21 = vpop.permute.xlu0 %4146 }
  0xfb   : > { %v6136_v30 = vpop.permute.xlu1 %4151  ;;  %8887 = vst [vmem:[#allocation63_spill] sm:$0xff] %v6138_v21 }
  0xfc   : > { %8886 = vst [vmem:[#allocation62_spill] sm:$0xff] %v6136_v30  ;;  %4431 = vrot.lane.b32.xlu0 %v5803_v15, %s5122_s17  ;;  %v3874_v15 = vunpack.i.h.bf16 %v5811_v19 }
  0xfd   : > { %4436 = vrot.lane.b32.xlu1 %v5825_v24, %s5122_s17 }
  0xfe   : > { %v6146_v16 = vpop.permute.xlu0 %4156 }
  0xff   : > { %v6144_v8 = vpop.permute.xlu1 %4161  ;;  %8889 = vst [vmem:[#allocation65_spill] sm:$0xff] %v6146_v16  ;;  %v8903_v16 = vld [vmem:[#allocation27_spill] sm:$0xff] }
 0x100   : > { %8888 = vst [vmem:[#allocation64_spill] sm:$0xff] %v6144_v8  ;;  %4441 = vrot.lane.b32.xlu0 %v5925_v25, %s5123_s20  ;;  %v3863_v25 = vunpack.i.l.bf16 %v5813_v20  ;;  %v8904_v8 = vld [vmem:[#allocation32_spill] sm:$0xff] }
 0x101   : > { %4446 = vrot.lane.b32.xlu1 %v5947_v1, %s5123_s20  ;;  %v3873_v1 = vunpack.i.l.bf16 %v5811_v19  ;;  %v3869_v19 = vunpack.i.h.bf16 %v5829_v27  ;;  %v8897_v27 = vmov 0.0  }
 0x102   : > { %v6154_v60 = vpop.permute.xlu0 %4166 }
 0x103   : > { %v6152_v29 = vpop.permute.xlu1 %4171  ;;  %8890 = vst [vmem:[#allocation66_spill] sm:$0xff] %v6154_v60  ;;  %v8902_v60 = vld [vmem:[#allocation24_spill] sm:$0xff] }
 0x104   : > { %4451 = vrot.lane.b32.xlu0 %v5819_v23, %s5122_s17  ;;  %v3864_v23 = vunpack.i.h.bf16 %v5813_v20  ;;  %v6192_v20 = vsel %vm1302_vm3, %v5449_v17, %v3863_v25  ;;  %v8898_v25 = vld [vmem:[#allocation26_spill] sm:$0xff]  ;;  %v8899_v17 = vld [vmem:[#allocation28_spill] sm:$0xff] }
 0x105   : > { %4456 = vrot.lane.b32.xlu1 %v5841_v32, %s5122_s17  ;;  %v8893_v32 = vld [vmem:[#allocation30_spill] sm:$0xff] }
 0x106   : > { %v6163_v3 = vpop.permute.xlu0 %4176  ;;  %v6173_v45 = vsel %vm1302_vm3, %v8893_v32, %v3874_v15  ;;  %v6188_v15 = vsel %vm1302_vm3, %v8896_v12, %v3873_v1  ;;  %v3883_v32 = vunpack.i.l.bf16 %v5845_v35  ;;  %v3893_v1 = vunpack.i.l.bf16 %v5857_v42 }
 0x107   : > { %v6161_v24 = vpop.permute.xlu1 %4181  ;;  %8892 = vst [vmem:[#allocation68_spill] sm:$0xff] %v6163_v3  ;;  %v1304_v12 = vsel %vm1302_vm3, %v8898_v25, %v3864_v23  ;;  %v6208_v35 = vsel %vm1302_vm3, %v8899_v17, %v3879_v0  ;;  %v8900_v3 = vld [vmem:[#allocation31_spill] sm:$0xff] }
 0x108   : > { %8891 = vst [vmem:[#allocation67_spill] sm:$0xff] %v6161_v24  ;;  %4461 = vrot.lane.b32.xlu0 %v5941_v2, %s5123_s20  ;;  %v3888_v2 = vunpack.i.l.bf16 %v5843_v34  ;;  %v8905_v17 = vld [vmem:[#allocation35_spill] sm:$0xff] }
 0x109   : > { %4466 = vrot.lane.b32.xlu1 %v5959_v22, %s5123_s20  ;;  %v3889_v22 = vunpack.i.h.bf16 %v5843_v34  ;;  %v3898_v34 = vunpack.i.l.bf16 %v5855_v40 }
 0x10a   : > { %v6184_v5 = vpop.permute.xlu0 %4186  ;;  %v6227_v0 = vsel %vm1302_vm3, %v8905_v17, %v3888_v2  ;;  %v8911_v2 = vld [vmem:[#allocation40_spill] sm:$0xff] }
 0x10b   : > { %v6178_v38 = vpop.permute.xlu1 %4191  ;;  %8895 = vst [vmem:[#allocation69_spill] sm:$0xff] %v6184_v5  ;;  %v3894_v5 = vunpack.i.h.bf16 %v5857_v42  ;;  %v1306_v42 = vsel %vm1302_vm3, %v8902_v60, %v3869_v19  ;;  %v6223_v23 = vsel %vm1302_vm3, %v8904_v8, %v3889_v22  ;;  %v8909_v19 = vld [vmem:[#allocation55_spill] sm:$0xff]  ;;  %v8910_v8 = vld [vmem:[#allocation37_spill] sm:$0xff]  ;;  %v6247_v17 = vsel %vm1302_vm3, %v8911_v2, %v3898_v34 }
 0x10c   : > { %8894 = vst [vmem:[#allocation30_spill] sm:$0xff] %v6178_v38  ;;  %v3899_v38 = vunpack.i.h.bf16 %v5855_v40  ;;  %4471 = vrot.lane.b32.xlu0 %v5835_v31, %s5122_s17  ;;  %v3909_v40 = vunpack.i.h.bf16 %v5869_v48  ;;  %v1305_v31 = vsel %vm1302_vm3, %v8903_v16, %v3868_v7  ;;  %v3908_v16 = vunpack.i.l.bf16 %v5869_v48  ;;  %v8914_v48 = vld [vmem:[#allocation42_spill] sm:$0xff] }
 0x10d   : > { %1176 = vrot.lane.b32.xlu1 %v8897_v27, %s5122_s17  ;;  %v6212_v27 = vsel %vm1302_vm3, %v8900_v3, %v3878_v10  ;;  %v8907_v10 = vld [vmem:[#allocation34_spill] sm:$0xff]  ;;  %v3904_v7 = vunpack.i.h.bf16 %v8909_v19  ;;  %s8241_s17 = scalar_lea.vmem %s8631_s7, %s3637_s14 }
 0x10e   : > { %v6229_v3 = vpop.permute.xlu0 %4196  ;;  %v6233_v25 = vsel %vm1302_vm3, %v8907_v10, %v3884_v26  ;;  %v6243_v22 = vsel %vm1302_vm3, %v8910_v8, %v3899_v38  ;;  %v8913_v10 = vld [vmem:[#allocation33_spill] sm:$0xff]  ;;  %v3903_v38 = vunpack.i.l.bf16 %v8909_v19  ;;  %v8915_v8 = vld [vmem:[#allocation4_spill] sm:$0xff] }
 0x10f   : > { %v6215_v24 = vpop.permute.xlu1 %4201  ;;  %8906 = vst [vmem:[#allocation26_spill] sm:$0xff] %v6229_v3  ;;  %v8912_v3 = vld [vmem:[#allocation39_spill] sm:$0xff]  ;;  %v3919_v34 = vunpack.i.h.bf16 %v8915_v8  ;;  %v3918_v2 = vunpack.i.l.bf16 %v8915_v8  ;;  %v8921_v19 = vld [vmem:[#allocation44_spill] sm:$0xff]  ;;  %v8922_v8 = vld [vmem:[#allocation9_spill] sm:$0xff] }
 0x110   : > { %8901 = vst [vmem:[#allocation25_spill] sm:$0xff] %v6215_v24  ;;  %v8908_v24 = vld [vmem:[#allocation29_spill] sm:$0xff]  ;;  %v6251_v26 = vsel %vm1302_vm3, %v8912_v3, %v3894_v5  ;;  %4476 = vrot.lane.b32.xlu0 %v5534_v41, %s5123_s20  ;;  %v8917_v5 = vld [vmem:[#allocation3_spill] sm:$0xff]  ;;  %v6280_v4 = vsel %vm1302_vm3, %v8921_v19, %v3904_v7  ;;  %v3923_v14 = vunpack.i.l.bf16 %v8922_v8  ;;  %v8927_v7 = vld [vmem:[#allocation50_spill] sm:$0xff] }
 0x111   : > { %v6237_v60 = vsel %vm1302_vm3, %v8908_v24, %v3883_v32  ;;  %v6255_v24 = vsel %vm1302_vm3, %v8913_v10, %v3893_v1  ;;  %v6261_v32 = vsel %vm1302_vm3, %v8914_v48, %v3909_v40  ;;  %v3914_v3 = vunpack.i.h.bf16 %v8917_v5  ;;  %v8918_v10 = vld [vmem:[#allocation6_spill] sm:$0xff]  ;;  %v8920_v40 = vld [vmem:[#allocation45_spill] sm:$0xff] }
 0x112   : > { %v3913_v1 = vunpack.i.l.bf16 %v8917_v5  ;;  %v3929_v30 = vunpack.i.h.bf16 %v8918_v10  ;;  %v3928_v41 = vunpack.i.l.bf16 %v8918_v10  ;;  %v6272_v9 = vpop.permute.xlu0 %4206  ;;  %v6276_v48 = vsel %vm1302_vm3, %v8920_v40, %v3908_v16  ;;  %v8926_v40 = vld [vmem:[#allocation47_spill] sm:$0xff] }
 0x113   : > { %v6266_v21 = vpop.permute.xlu1 %4211  ;;  %8919 = vst [vmem:[#allocation31_spill] sm:$0xff] %v6272_v9  ;;  %v3933_v5 = vunpack.i.l.bf16 %v5919_v52  ;;  %v3943_v10 = vunpack.i.l.bf16 %v8923_v51  ;;  %v3938_v9 = vunpack.i.l.bf16 %v8924_v43  ;;  %v1319_v16 = vsel %vm1302_vm3, %v8925_v53, %v3903_v38  ;;  %v8931_v53 = vld [vmem:[#allocation51_spill] sm:$0xff] }
 0x114   : > { %8916 = vst [vmem:[#allocation28_spill] sm:$0xff] %v6266_v21  ;;  %v3924_v21 = vunpack.i.h.bf16 %v8922_v8  ;;  %v6292_v63 = vsel %vm1302_vm3, %v8926_v40, %v3919_v34  ;;  %v6296_v19 = vsel %vm1302_vm3, %v8927_v7, %v3918_v2  ;;  %v3939_v8 = vunpack.i.h.bf16 %v8924_v43  ;;  %v8932_v34 = vld [vmem:[#allocation54_spill] sm:$0xff]  ;;  %v8934_v43 = vld [vmem:[#allocation53_spill] sm:$0xff] }
 0x115   : > { %v6303_v51 = vsel %vm1302_vm3, %v8929_v44, %v3914_v3  ;;  %v6307_v6 = vsel %vm1302_vm3, %v8930_v58, %v3913_v1  ;;  %v6311_v38 = vsel %vm1302_vm3, %v8931_v53, %v3929_v30  ;;  %v6315_v2 = vsel %vm1302_vm3, %v8932_v34, %v3928_v41  ;;  %v8935_v44 = vld [vmem:[#allocation48_spill] sm:$0xff] }
 0x116   : > { %v6317_v40 = vpop.permute.xlu0 %4216  ;;  %v6321_v7 = vsel %vm1302_vm3, %v8934_v43, %v3924_v21  ;;  %v6325_v3 = vsel %vm1302_vm3, %v8935_v44, %v3923_v14  ;;  %v3954_v58 = vunpack.i.h.bf16 %v5949_v62  ;;  %v3953_v1 = vunpack.i.l.bf16 %v5949_v62  ;;  %v8936_v30 = vld [vmem:[#allocation52_spill] sm:$0xff] }
 0x117   : > { %v6299_v52 = vpop.permute.xlu1 %4221  ;;  %8933 = vst [vmem:[#allocation27_spill] sm:$0xff] %v6317_v40  ;;  %v6331_v53 = vsel %vm1302_vm3, %v8936_v30, %v3933_v5  ;;  %v6334_v41 = vsel %vm1334_vm4, %v1305_v31, %v3943_v10  ;;  %v6337_v34 = vsel %vm1334_vm4, %v1306_v42, %v3944_v56  ;;  %v6341_v21 = vsel %vm1334_vm4, %v6192_v20, %v3938_v9  ;;  %v8938_v10 = vld [vmem:[#allocation10_spill] sm:$0xff] }
 0x118   : > { %8928 = vst [vmem:[#allocation24_spill] sm:$0xff] %v6299_v52  ;;  %v6344_v14 = vsel %vm1334_vm4, %v1304_v12, %v3939_v8  ;;  %v3949_v43 = vunpack.i.h.bf16 %v5951_v47  ;;  %v3948_v62 = vunpack.i.l.bf16 %v5951_v47  ;;  %v3964_v5 = vunpack.i.h.bf16 %v5961_v61 }
 0x119   : > { %v3963_v31 = vunpack.i.l.bf16 %v5961_v61  ;;  %v3959_v56 = vunpack.i.h.bf16 %v5963_v50  ;;  %v3958_v42 = vunpack.i.l.bf16 %v5963_v50  ;;  %v3974_v9 = vunpack.i.h.bf16 %v8938_v10  ;;  %v8940_v61 = vld [vmem:[#allocation14_spill] sm:$0xff] }
 0x11a   : > { %v6355_v20 = vpop.permute.xlu0 %4226  ;;  %v6359_v12 = vsel %vm1334_vm4, %v6208_v35, %v3954_v58  ;;  %v6363_v47 = vsel %vm1334_vm4, %v6212_v27, %v3953_v1  ;;  %v3973_v8 = vunpack.i.l.bf16 %v8938_v10  ;;  %v3969_v30 = vunpack.i.h.bf16 %v8940_v61 }
 0x11b   : > { %v6349_v44 = vpop.permute.xlu1 %4231  ;;  %8939 = vst [vmem:[#allocation35_spill] sm:$0xff] %v6355_v20  ;;  %v3968_v50 = vunpack.i.l.bf16 %v8940_v61  ;;  %v3979_v20 = vunpack.i.h.bf16 %v5979_v11  ;;  %v6373_v35 = vsel %vm1334_vm4, %v6173_v45, %v3949_v43  ;;  %v6377_v27 = vsel %vm1334_vm4, %v6188_v15, %v3948_v62 }
 0x11c   : > { %8937 = vst [vmem:[#allocation32_spill] sm:$0xff] %v6349_v44  ;;  %v8941_v44 = vld [vmem:[#allocation11_spill] sm:$0xff]  ;;  %v6381_v58 = vsel %vm1334_vm4, %v6223_v23, %v3964_v5  ;;  %v3978_v1 = vunpack.i.l.bf16 %v5979_v11  ;;  %v6392_v45 = vsel %vm1334_vm4, %v6233_v25, %v3959_v56  ;;  %v6396_v15 = vsel %vm1334_vm4, %v6237_v60, %v3958_v42 }
 0x11d   : > { %v3984_v40 = vunpack.i.h.bf16 %v8941_v44  ;;  %v3983_v52 = vunpack.i.l.bf16 %v8941_v44  ;;  %v6388_v44 = vsel %vm1334_vm4, %v6227_v0, %v3963_v31  ;;  %v6400_v23 = vsel %vm1334_vm4, %v6243_v22, %v3974_v9 }
 0x11e   : > { %v6402_v43 = vpop.permute.xlu0 %4236  ;;  %v6406_v11 = vsel %vm1334_vm4, %v6247_v17, %v3973_v8  ;;  %v6410_v0 = vsel %vm1334_vm4, %v6251_v26, %v3969_v30  ;;  %v4174_v25 = vunpack.i.h.bf16 %v6152_v29  ;;  %v4173_v62 = vunpack.i.l.bf16 %v6152_v29  ;;  %v8942_v29 = vld [vmem:[#allocation8_spill] sm:$0xff] }
 0x11f   : > { %v6384_v10 = vpop.permute.xlu1 %4241  ;;  %v6416_v60 = vsel %vm1334_vm4, %v6255_v24, %v3968_v50  ;;  %v6420_v22 = vsel %vm1334_vm4, %v6261_v32, %v3984_v40  ;;  %v6424_v17 = vsel %vm1334_vm4, %v6276_v48, %v3983_v52  ;;  %v6428_v26 = vsel %vm1334_vm4, %v6280_v4, %v3979_v20  ;;  %v8943_v40 = vld [vmem:[#allocation13_spill] sm:$0xff] }
 0x120   : > { %v6431_v5 = vsel %vm1334_vm4, %v1319_v16, %v3978_v1  ;;  %v3994_v31 = vunpack.i.h.bf16 %v8942_v29  ;;  %v3993_v24 = vunpack.i.l.bf16 %v8942_v29  ;;  %v3989_v56 = vunpack.i.h.bf16 %v5987_v59 }
 0x121   : > { %v3988_v32 = vunpack.i.l.bf16 %v5987_v59  ;;  %v4004_v9 = vunpack.i.h.bf16 %v8943_v40  ;;  %v4003_v4 = vunpack.i.l.bf16 %v8943_v40  ;;  %v3999_v16 = vunpack.i.h.bf16 %v5995_v13 }
 0x122   : > { %v6438_v8 = vpop.permute.xlu0 %4246  ;;  %v1430_v20 = vsel %vm1399_vm6, %v6089_v39, %v4173_v62  ;;  %v1431_v61 = vsel %vm1399_vm6, %v6092_v36, %v4174_v25  ;;  %v3998_v30 = vunpack.i.l.bf16 %v5995_v13  ;;  %v4008_v59 = vunpack.i.l.bf16 %v6003_v28 }
 0x123   : > { %v4252_v42 = vpop.permute.xlu1 %4251  ;;  %8944 = vst [vmem:[#allocation34_spill] sm:$0xff] %v6438_v8  ;;  %v6456_v29 = vsel %vm1334_vm4, %v6292_v63, %v3994_v31  ;;  %v6460_v39 = vsel %vm1334_vm4, %v6296_v19, %v3993_v24  ;;  %v4024_v36 = vunpack.i.h.bf16 %v6009_v49  ;;  %v4023_v13 = vunpack.i.l.bf16 %v6009_v49 }
 0x124   : > { %v4254_v48 = vunpack.i.h.bf16 %v4252_v42  ;;  %v4253_v52 = vunpack.i.l.bf16 %v4252_v42  ;;  %v1356_v28 = vsel %vm1334_vm4, %v6303_v51, %v3989_v56  ;;  %v6470_v62 = vsel %vm1334_vm4, %v6307_v6, %v3988_v32  ;;  %v8947_v56 = vld [vmem:[#allocation15_spill] sm:$0xff] }
 0x125   : > { %v4019_v63 = vunpack.i.h.bf16 %v6011_v55  ;;  %v4018_v31 = vunpack.i.l.bf16 %v6011_v55  ;;  %v6478_v19 = vsel %vm1334_vm4, %v6311_v38, %v4004_v9  ;;  %v6482_v49 = vsel %vm1334_vm4, %v6315_v2, %v4003_v4 }
 0x126   : > { %v6449_v50 = vsel %vm1432_vm7, %v1430_v20, %v4253_v52  ;;  %v6452_v1 = vsel %vm1432_vm7, %v1431_v61, %v4254_v48  ;;  %v6474_v42 = vpop.permute.xlu0 %4256  ;;  %v1360_v51 = vsel %vm1334_vm4, %v6321_v7, %v3999_v16  ;;  %v4033_v6 = vunpack.i.l.bf16 %v6017_v57 }
 0x127   : > { %8945 = vst [vmem:[#allocation29_spill] sm:$0xff] %v6449_v50  ;;  %8946 = vst [vmem:[#allocation55_spill] sm:$0xff] %v6452_v1  ;;  %v6464_v25 = vpop.permute.xlu1 %4261  ;;  %v6489_v24 = vsel %vm1334_vm4, %v6325_v3, %v3998_v30  ;;  %v6493_v55 = vsel %vm1334_vm4, %v6331_v53, %v4008_v59  ;;  %v4034_v38 = vunpack.i.h.bf16 %v6017_v57  ;;  %v4029_v32 = vunpack.i.h.bf16 %v8947_v56 }
 0x128   : > { %v6499_v2 = vsel %vm1366_vm5, %v6344_v14, %v4023_v13  ;;  %v6503_v7 = vsel %vm1366_vm5, %v6334_v41, %v4024_v36  ;;  %v4028_v40 = vunpack.i.l.bf16 %v8947_v56  ;;  %v4043_v3 = vunpack.i.l.bf16 %v6028_v33  ;;  %v8950_v56 = vld [vmem:[#allocation21_spill] sm:$0xff] }
 0x129   : > { %v6511_v53 = vsel %vm1366_vm5, %v6341_v21, %v4019_v63  ;;  %v6515_v57 = vsel %vm1366_vm5, %v6341_v21, %v4018_v31  ;;  %v4044_v14 = vunpack.i.h.bf16 %v6028_v33  ;;  %v4039_v48 = vunpack.i.h.bf16 %v6030_v46 }
 0x12a   : > { %v6519_v41 = vpop.permute.xlu0 %4266  ;;  %v6523_v52 = vsel %vm1366_vm5, %v6373_v35, %v4033_v6  ;;  %v4038_v4 = vunpack.i.l.bf16 %v6030_v46  ;;  %v4054_v16 = vunpack.i.h.bf16 %v6039_v54  ;;  %v4053_v20 = vunpack.i.l.bf16 %v6039_v54 }
 0x12b   : > { %v6507_v9 = vpop.permute.xlu1 %4271  ;;  %v6530_v21 = vsel %vm1366_vm5, %v6363_v47, %v4034_v38  ;;  %v6534_v33 = vsel %vm1366_vm5, %v6377_v27, %v4029_v32  ;;  %v4049_v61 = vunpack.i.h.bf16 %v6041_v37  ;;  %v4048_v30 = vunpack.i.l.bf16 %v6041_v37 }
 0x12c   : > { %v6540_v35 = vsel %vm1366_vm5, %v6337_v34, %v4028_v40  ;;  %v6544_v46 = vsel %vm1366_vm5, %v6392_v45, %v4043_v3  ;;  %v4064_v54 = vunpack.i.h.bf16 %v6050_v18  ;;  %v4063_v47 = vunpack.i.l.bf16 %v6050_v18  ;;  %v8948_v34 = vld [vmem:[#allocation12_spill] sm:$0xff] }
 0x12d   : > { %v6552_v27 = vsel %vm1366_vm5, %v6388_v44, %v4044_v14  ;;  %v6556_v37 = vsel %vm1366_vm5, %v6396_v15, %v4039_v48  ;;  %v4059_v36 = vunpack.i.h.bf16 %v8948_v34  ;;  %v4058_v13 = vunpack.i.l.bf16 %v8948_v34  ;;  %v8949_v15 = vld [vmem:[#allocation19_spill] sm:$0xff]  ;;  %v8954_v34 = vld [vmem:[#allocation22_spill] sm:$0xff] }
 0x12e   : > { %v6560_v45 = vpop.permute.xlu0 %4276  ;;  %v6564_v63 = vsel %vm1366_vm5, %v6359_v12, %v4038_v4  ;;  %v6568_v18 = vsel %vm1366_vm5, %v6410_v0, %v4053_v20  ;;  %v6572_v44 = vsel %vm1366_vm5, %v6406_v11, %v4054_v16  ;;  %v4073_v31 = vunpack.i.l.bf16 %v8949_v15  ;;  %v8952_v4 = vld [vmem:[#allocation18_spill] sm:$0xff] }
 0x12f   : > { %v6548_v59 = vpop.permute.xlu1 %4281  ;;  %v6577_v6 = vsel %vm1366_vm5, %v6416_v60, %v4049_v61  ;;  %v6581_v38 = vsel %vm1366_vm5, %v6381_v58, %v4048_v30  ;;  %v4074_v12 = vunpack.i.h.bf16 %v8949_v15  ;;  %v4069_v32 = vunpack.i.h.bf16 %v8950_v56  ;;  %v8951_v60 = vld [vmem:[#allocation20_spill] sm:$0xff]  ;;  %v8953_v30 = vld [vmem:[#allocation23_spill] sm:$0xff] }
 0x130   : > { %v6587_v0 = vsel %vm1366_vm5, %v6428_v26, %v4063_v47  ;;  %v6591_v11 = vsel %vm1366_vm5, %v6424_v17, %v4064_v54  ;;  %v4068_v40 = vunpack.i.l.bf16 %v8950_v56  ;;  %v4083_v3 = vunpack.i.l.bf16 %v8951_v60 }
 0x131   : > { %v6599_v58 = vsel %vm1366_vm5, %v6431_v5, %v4059_v36  ;;  %v6603_v48 = vsel %vm1366_vm5, %v6400_v23, %v4058_v13  ;;  %v4084_v26 = vunpack.i.h.bf16 %v8951_v60  ;;  %v4079_v16 = vunpack.i.h.bf16 %v8952_v4  ;;  %v8956_v60 = vld [vmem:[#allocation41_spill] sm:$0xff] }
 0x132   : > { %v6607_v17 = vpop.permute.xlu0 %4286  ;;  %v6610_v20 = vsel %vm1366_vm5, %v1356_v28, %v4073_v31  ;;  %v4078_v61 = vunpack.i.l.bf16 %v8952_v4  ;;  %v4089_v54 = vunpack.i.h.bf16 %v8953_v30  ;;  %v4088_v5 = vunpack.i.l.bf16 %v8953_v30  ;;  %v8955_v31 = vld [vmem:[#allocation36_spill] sm:$0xff] }
 0x133   : > { %v6595_v14 = vpop.permute.xlu1 %4291  ;;  %v6617_v47 = vsel %vm1366_vm5, %v6460_v39, %v4074_v12  ;;  %v6621_v23 = vsel %vm1366_vm5, %v6470_v62, %v4069_v32  ;;  %v4104_v36 = vunpack.i.h.bf16 %v8954_v34  ;;  %v4103_v13 = vunpack.i.l.bf16 %v8954_v34 }
 0x134   : > { %v6627_v28 = vsel %vm1366_vm5, %v6420_v22, %v4068_v40  ;;  %v6630_v15 = vsel %vm1366_vm5, %v1360_v51, %v4083_v3  ;;  %v4099_v56 = vunpack.i.h.bf16 %v8955_v31  ;;  %v4098_v39 = vunpack.i.l.bf16 %v8955_v31  ;;  %v8960_v31 = vld [vmem:[#allocation58_spill] sm:$0xff] }
 0x135   : > { %v6638_v62 = vsel %vm1366_vm5, %v6482_v49, %v4084_v26  ;;  %v6642_v32 = vsel %vm1366_vm5, %v6489_v24, %v4079_v16  ;;  %v4114_v22 = vunpack.i.h.bf16 %v8956_v60  ;;  %v4113_v40 = vunpack.i.l.bf16 %v8956_v60  ;;  %v8957_v24 = vld [vmem:[#allocation46_spill] sm:$0xff] }
 0x136   : > { %v6646_v51 = vpop.permute.xlu0 %4296  ;;  %v6650_v3 = vsel %vm1366_vm5, %v6456_v29, %v4078_v61  ;;  %v6654_v4 = vsel %vm1366_vm5, %v6493_v55, %v4089_v54  ;;  %v6658_v49 = vsel %vm1366_vm5, %v6478_v19, %v4088_v5  ;;  %v4108_v26 = vunpack.i.l.bf16 %v8957_v24  ;;  %v8958_v61 = vld [vmem:[#allocation56_spill] sm:$0xff] }
 0x137   : > { %v6634_v12 = vpop.permute.xlu1 %4301  ;;  %v6663_v16 = vsel %vm1399_vm6, %v6499_v2, %v4103_v13  ;;  %v6667_v30 = vsel %vm1399_vm6, %v6503_v7, %v4104_v36  ;;  %v4109_v29 = vunpack.i.h.bf16 %v8957_v24  ;;  %v4123_v34 = vunpack.i.l.bf16 %v8958_v61  ;;  %v8959_v2 = vld [vmem:[#allocation57_spill] sm:$0xff]  ;;  %v8961_v24 = vld [vmem:[#allocation59_spill] sm:$0xff] }
 0x138   : > { %v6673_v55 = vsel %vm1399_vm6, %v6515_v57, %v4098_v39  ;;  %v6677_v19 = vsel %vm1399_vm6, %v6511_v53, %v4099_v56  ;;  %v4124_v54 = vunpack.i.h.bf16 %v8958_v61  ;;  %v4118_v5 = vunpack.i.l.bf16 %v8959_v2 }
 0x139   : > { %v6685_v7 = vsel %vm1399_vm6, %v6523_v52, %v4113_v40  ;;  %v6689_v36 = vsel %vm1399_vm6, %v6530_v21, %v4114_v22  ;;  %v4119_v57 = vunpack.i.h.bf16 %v8959_v2  ;;  %v4133_v39 = vunpack.i.l.bf16 %v8960_v31  ;;  %v8962_v40 = vld [vmem:[#allocation60_spill] sm:$0xff] }
 0x13a   : > { %v6693_v53 = vpop.permute.xlu0 %4306  ;;  %v6697_v56 = vsel %vm1399_vm6, %v6540_v35, %v4108_v26  ;;  %v4134_v60 = vunpack.i.h.bf16 %v8960_v31  ;;  %v4129_v61 = vunpack.i.h.bf16 %v8961_v24  ;;  %v4128_v52 = vunpack.i.l.bf16 %v8961_v24  ;;  %v8963_v31 = vld [vmem:[#allocation61_spill] sm:$0xff] }
 0x13b   : > { %v6681_v13 = vpop.permute.xlu1 %4311  ;;  %v6704_v21 = vsel %vm1399_vm6, %v6534_v33, %v4109_v29  ;;  %v6708_v22 = vsel %vm1399_vm6, %v6544_v46, %v4123_v34  ;;  %v4144_v2 = vunpack.i.h.bf16 %v8962_v40  ;;  %v4143_v1 = vunpack.i.l.bf16 %v8962_v40 }
 0x13c   : > { %v6714_v35 = vsel %vm1399_vm6, %v6552_v27, %v4124_v54  ;;  %v6718_v26 = vsel %vm1399_vm6, %v6564_v63, %v4118_v5  ;;  %v4139_v24 = vunpack.i.h.bf16 %v8963_v31  ;;  %v4138_v33 = vunpack.i.l.bf16 %v8963_v31  ;;  %v8965_v27 = vld [vmem:[#allocation62_spill] sm:$0xff] }
 0x13d   : > { %v6726_v46 = vsel %vm1399_vm6, %v6556_v37, %v4119_v57  ;;  %v6730_v34 = vsel %vm1399_vm6, %v6568_v18, %v4133_v39  ;;  %v4154_v54 = vunpack.i.h.bf16 %v8965_v27  ;;  %v4153_v40 = vunpack.i.l.bf16 %v8965_v27  ;;  %v8966_v18 = vld [vmem:[#allocation63_spill] sm:$0xff] }
 0x13e   : > { %v6734_v63 = vpop.permute.xlu0 %4316  ;;  %v6738_v5 = vsel %vm1399_vm6, %v6572_v44, %v4134_v60  ;;  %v6742_v31 = vsel %vm1399_vm6, %v6581_v38, %v4128_v52  ;;  %v6746_v37 = vsel %vm1399_vm6, %v6577_v6, %v4129_v61  ;;  %v4148_v57 = vunpack.i.l.bf16 %v8966_v18  ;;  %v8967_v60 = vld [vmem:[#allocation64_spill] sm:$0xff] }
 0x13f   : > { %v6722_v29 = vpop.permute.xlu1 %4321  ;;  %v6751_v39 = vsel %vm1399_vm6, %v6587_v0, %v4143_v1  ;;  %v6755_v27 = vsel %vm1399_vm6, %v6591_v11, %v4144_v2  ;;  %v4149_v44 = vunpack.i.h.bf16 %v8966_v18  ;;  %v4163_v50 = vunpack.i.l.bf16 %v8967_v60  ;;  %v8968_v1 = vld [vmem:[#allocation65_spill] sm:$0xff] }
 0x140   : > { %8964 = vst [vmem:[#allocation37_spill] sm:$0xff] %v6722_v29  ;;  %v6761_v38 = vsel %vm1399_vm6, %v6603_v48, %v4138_v33  ;;  %v6765_v6 = vsel %vm1399_vm6, %v6599_v58, %v4139_v24  ;;  %v4164_v61 = vunpack.i.h.bf16 %v8967_v60  ;;  %v4158_v0 = vunpack.i.l.bf16 %v8968_v1  ;;  %v8970_v33 = vld [vmem:[#allocation66_spill] sm:$0xff] }
 0x141   : > { %v6773_v11 = vsel %vm1399_vm6, %v6610_v20, %v4153_v40  ;;  %v6777_v2 = vsel %vm1399_vm6, %v6617_v47, %v4154_v54  ;;  %v4159_v48 = vunpack.i.h.bf16 %v8968_v1  ;;  %v4168_v18 = vunpack.i.l.bf16 %v8970_v33  ;;  %v8974_v40 = vld [vmem:[#allocation68_spill] sm:$0xff] }
 0x142   : > { %v6781_v58 = vpop.permute.xlu0 %4326  ;;  %v6785_v24 = vsel %vm1399_vm6, %v6627_v28, %v4148_v57  ;;  %v4169_v60 = vunpack.i.h.bf16 %v8970_v33  ;;  %v6792_v47 = vsel %vm1399_vm6, %v6621_v23, %v4149_v44  ;;  %v6796_v54 = vsel %vm1399_vm6, %v6630_v15, %v4163_v50 }
 0x143   : > { %v6769_v52 = vpop.permute.xlu1 %1083  ;;  %8971 = vst [vmem:[#allocation39_spill] sm:$0xff] %v6781_v58  ;;  %8973 = vst [vmem:[#allocation33_spill] sm:$0xff] %v6796_v54  ;;  %v4179_v1 = vunpack.i.h.bf16 %v8974_v40  ;;  %v4178_v58 = vunpack.i.l.bf16 %v8974_v40  ;;  %v6802_v28 = vsel %vm1399_vm6, %v6638_v62, %v4164_v61  ;;  %v6806_v57 = vsel %vm1399_vm6, %v6650_v3, %v4158_v0  ;;  %v8978_v40 = vld [vmem:[#allocation69_spill] sm:$0xff] }
 0x144   : > { %8969 = vst [vmem:[#allocation40_spill] sm:$0xff] %v6769_v52  ;;  %v8972_v52 = vld [vmem:[#allocation67_spill] sm:$0xff]  ;;  %8975 = vst [vmem:[#allocation42_spill] sm:$0xff] %v6802_v28  ;;  %v6812_v50 = vsel %vm1399_vm6, %v6642_v32, %v4159_v48  ;;  %v6816_v15 = vsel %vm1399_vm6, %v6658_v49, %v4168_v18  ;;  %v4189_v62 = vunpack.i.h.bf16 %v8978_v40  ;;  %v4188_v61 = vunpack.i.l.bf16 %v8978_v40  ;;  %v8980_v48 = vld [vmem:[#allocation25_spill] sm:$0xff] }
 0x145   : > { %v4184_v29 = vunpack.i.h.bf16 %v8972_v52  ;;  %v4183_v20 = vunpack.i.l.bf16 %v8972_v52  ;;  %v8976_v52 = vld [vmem:[#allocation30_spill] sm:$0xff]  ;;  %8977 = vst [vmem:[#allocation4_spill] sm:$0xff] %v6816_v15  ;;  %v6824_v3 = vsel %vm1399_vm6, %v6654_v4, %v4169_v60  ;;  %v1433_v49 = vsel %vm1432_vm7, %v6673_v55, %v4178_v58 }
 0x146   : > { %v4194_v23 = vunpack.i.h.bf16 %v8976_v52  ;;  %v4193_v44 = vunpack.i.l.bf16 %v8976_v52  ;;  %v6820_v28 = vpop.permute.xlu0 %4331  ;;  %8979 = vst [vmem:[#allocation3_spill] sm:$0xff] %v6824_v3  ;;  %v4203_v52 = vunpack.i.l.bf16 %v8980_v48  ;;  %v1434_v18 = vsel %vm1432_vm7, %v6677_v19, %v4179_v1  ;;  %v8981_v15 = vld [vmem:[#allocation26_spill] sm:$0xff]  ;;  %v8983_v1 = vld [vmem:[#allocation31_spill] sm:$0xff] }
 0x147   : > { %v4337_v33 = vpop.permute.xlu1 %4336  ;;  %v1435_v0 = vsel %vm1432_vm7, %v6663_v16, %v4183_v20  ;;  %v1436_v32 = vsel %vm1432_vm7, %v6667_v30, %v4184_v29  ;;  %v4204_v40 = vunpack.i.h.bf16 %v8980_v48  ;;  %v4198_v4 = vunpack.i.l.bf16 %v8981_v15  ;;  %v8982_v29 = vld [vmem:[#allocation28_spill] sm:$0xff] }
 0x148   : > { %v6839_v60 = vsel %vm1432_vm7, %v6685_v7, %v4193_v44  ;;  %v6843_v16 = vsel %vm1432_vm7, %v6689_v36, %v4194_v23  ;;  %v4199_v30 = vunpack.i.h.bf16 %v8981_v15  ;;  %v4213_v20 = vunpack.i.l.bf16 %v8982_v29 }
 0x149   : > { %v1437_v19 = vsel %vm1432_vm7, %v6697_v56, %v4188_v61  ;;  %v1438_v58 = vsel %vm1432_vm7, %v6704_v21, %v4189_v62  ;;  %v4214_v7 = vunpack.i.h.bf16 %v8982_v29  ;;  %v4208_v44 = vunpack.i.l.bf16 %v8983_v1 }
 0x14a   : > { %v4342_v48 = vpop.permute.xlu0 %4341  ;;  %v6857_v36 = vsel %vm1432_vm7, %v6708_v22, %v4203_v52  ;;  %v4209_v23 = vunpack.i.h.bf16 %v8983_v1  ;;  %v4264_v15 = vunpack.i.h.bf16 %v6464_v25  ;;  %v4263_v3 = vunpack.i.l.bf16 %v6464_v25 }
 0x14b   : > { %v6847_v55 = vpop.permute.xlu1 %4346  ;;  %v6864_v56 = vsel %vm1432_vm7, %v6714_v35, %v4204_v40  ;;  %v6868_v21 = vsel %vm1432_vm7, %v6718_v26, %v4198_v4  ;;  %v4259_v62 = vunpack.i.h.bf16 %v6474_v42  ;;  %v4258_v61 = vunpack.i.l.bf16 %v6474_v42 }
 0x14c   : > { %v6874_v22 = vsel %vm1432_vm7, %v6726_v46, %v4199_v30  ;;  %v6878_v52 = vsel %vm1432_vm7, %v6730_v34, %v4213_v20  ;;  %v4269_v25 = vunpack.i.h.bf16 %v6519_v41  ;;  %v4268_v35 = vunpack.i.l.bf16 %v6519_v41  ;;  %v8984_v41 = vld [vmem:[#allocation24_spill] sm:$0xff] }
 0x14d   : > { %v6886_v26 = vsel %vm1432_vm7, %v6738_v5, %v4214_v7  ;;  %v6890_v42 = vsel %vm1432_vm7, %v6742_v31, %v4208_v44  ;;  %v4339_v46 = vunpack.i.h.bf16 %v4337_v33  ;;  %v4338_v4 = vunpack.i.l.bf16 %v4337_v33 }
 0x14e   : > { %v6892_v30 = vpop.permute.xlu0 %4351  ;;  %v6896_v34 = vsel %vm1432_vm7, %v6746_v37, %v4209_v23  ;;  %v1468_v20 = vsel %vm1465_vm8, %v1435_v0, %v4263_v3  ;;  %v1469_v1 = vsel %vm1465_vm8, %v1436_v32, %v4264_v15  ;;  %v4334_v5 = vunpack.i.h.bf16 %v6820_v28 }
 0x14f   : > { %v6882_v40 = vpop.permute.xlu1 %4356  ;;  %v4333_v7 = vunpack.i.l.bf16 %v6820_v28  ;;  %v1466_v31 = vsel %vm1465_vm8, %v1433_v49, %v4258_v61  ;;  %v1467_v33 = vsel %vm1465_vm8, %v1434_v18, %v4259_v62  ;;  %v4274_v44 = vunpack.i.h.bf16 %v6507_v9 }
 0x150   : > { %v4273_v54 = vunpack.i.l.bf16 %v6507_v9  ;;  %v1470_v37 = vsel %vm1465_vm8, %v1437_v19, %v4268_v35  ;;  %v1471_v23 = vsel %vm1465_vm8, %v1438_v58, %v4269_v25  ;;  %v1501_v3 = vsel %vm1498_vm9, %v1468_v20, %v4338_v4 }
 0x151   : > { %v1502_v0 = vsel %vm1498_vm9, %v1469_v1, %v4339_v46  ;;  %v4344_v8 = vunpack.i.h.bf16 %v4342_v48  ;;  %v4343_v49 = vunpack.i.l.bf16 %v4342_v48  ;;  %v1499_v19 = vsel %vm1498_vm9, %v1466_v31, %v4333_v7 }
 0x152   : > { %v4362_v28 = vpop.permute.xlu0 %4361  ;;  %v1500_v58 = vsel %vm1498_vm9, %v1467_v33, %v4334_v5  ;;  %v4279_v25 = vunpack.i.h.bf16 %v6560_v45  ;;  %v4278_v48 = vunpack.i.l.bf16 %v6560_v45  ;;  %v4349_v20 = vunpack.i.h.bf16 %v6847_v55 }
 0x153   : > { %v4367_v29 = vpop.permute.xlu1 %4366  ;;  %v4364_v61 = vunpack.i.h.bf16 %v4362_v28  ;;  %v4363_v18 = vunpack.i.l.bf16 %v4362_v28  ;;  %v4348_v1 = vunpack.i.l.bf16 %v6847_v55  ;;  %v1503_v7 = vsel %vm1498_vm9, %v1470_v37, %v4343_v49 }
 0x154   : > { %v4369_v32 = vunpack.i.h.bf16 %v4367_v29  ;;  %v4368_v15 = vunpack.i.l.bf16 %v4367_v29  ;;  %v1504_v5 = vsel %vm1498_vm9, %v1471_v23, %v4344_v8  ;;  %v4223_v45 = vunpack.i.l.bf16 %v8984_v41 }
 0x155   : > { %v1532_v46 = vsel %vm1531_vm10, %v1499_v19, %v4363_v18  ;;  %v1533_v4 = vsel %vm1531_vm10, %v1500_v58, %v4364_v61  ;;  %v1472_v55 = vsel %vm1465_vm8, %v6839_v60, %v4273_v54  ;;  %v1473_v23 = vsel %vm1465_vm8, %v6843_v16, %v4274_v44 }
 0x156   : > { %v1534_v62 = vsel %vm1531_vm10, %v1501_v3, %v4368_v15  ;;  %v1535_v9 = vsel %vm1531_vm10, %v1502_v0, %v4369_v32  ;;  %v4372_v3 = vpop.permute.xlu0 %4371  ;;  %v1564_v0 = vpack.c.bf16 %v1533_v4, %v1532_v46  ;;  %v4354_v32 = vunpack.i.h.bf16 %v6892_v30 }
 0x157   : > { %v4377_v35 = vpop.permute.xlu1 %4376  ;;  %v1565_v29 = vpack.c.bf16 %v1535_v9, %v1534_v62  ;;  %v4374_v31 = vunpack.i.h.bf16 %v4372_v3  ;;  %v4373_v33 = vunpack.i.l.bf16 %v4372_v3  ;;  %v4353_v15 = vunpack.i.l.bf16 %v6892_v30 }
 0x158   : > { %v4379_v28 = vunpack.i.h.bf16 %v4377_v35  ;;  %v4378_v61 = vunpack.i.l.bf16 %v4377_v35  ;;  %3763 = vmatprep.mubr.msk.bf16.mxu0 %vm1595_vm11, %v1564_v0  ;;  %v1474_v30 = vsel %vm1465_vm8, %v6868_v21, %v4278_v48  ;;  %v1475_v49 = vsel %vm1465_vm8, %v6874_v22, %v4279_v25  ;;  %v8985_v21 = vld [vmem:[#allocation27_spill] sm:$0xff] }
 0x159   : > { %v1536_v18 = vsel %vm1531_vm10, %v1503_v7, %v4373_v33  ;;  %v1537_v37 = vsel %vm1531_vm10, %v1504_v5, %v4374_v31  ;;  %3764 = vmatmul.mubr.msk.bf16.vlgmr.msra.gmra.mxu0 %vm1595_vm11, %v1565_v29  ;;  %v1505_v54 = vsel %vm1498_vm9, %v1472_v55, %v4348_v1  ;;  %v1506_v60 = vsel %vm1498_vm9, %v1473_v23, %v4349_v20 }
 0x15a   : > { %v4382_v62 = vpop.permute.xlu0 %4381  ;;  %v1566_v9 = vpack.c.bf16 %v1537_v37, %v1536_v18  ;;  %v1507_v35 = vsel %vm1498_vm9, %v1474_v30, %v4353_v15  ;;  %v1508_v46 = vsel %vm1498_vm9, %v1475_v49, %v4354_v32  ;;  %v1538_v16 = vsel %vm1531_vm10, %v1505_v54, %v4378_v61 }
 0x15b   : > { %v4387_v8 = vpop.permute.xlu1 %4386  ;;  %v4384_v19 = vunpack.i.h.bf16 %v4382_v62  ;;  %v4383_v58 = vunpack.i.l.bf16 %v4382_v62  ;;  %v1539_v44 = vsel %vm1531_vm10, %v1506_v60, %v4379_v28  ;;  %v4219_v22 = vunpack.i.h.bf16 %v8985_v21 }
 0x15c   : > { %3767 = vmatprep.mubr.msk.bf16.mxu0 %vm1595_vm11, %v1566_v9  ;;  %v4218_v25 = vunpack.i.l.bf16 %v8985_v21  ;;  %v4284_v20 = vunpack.i.h.bf16 %v6548_v59  ;;  %v4283_v1 = vunpack.i.l.bf16 %v6548_v59  ;;  %v4289_v3 = vunpack.i.h.bf16 %v6607_v17  ;;  %v8987_v9 = vld [vmem:[#allocation32_spill] sm:$0xff] }
 0x15d   : > { %v1540_v4 = vsel %vm1531_vm10, %v1507_v35, %v4383_v58  ;;  %v1541_v29 = vsel %vm1531_vm10, %v1508_v46, %v4384_v19  ;;  %v4288_v0 = vunpack.i.l.bf16 %v6607_v17  ;;  %v4359_v5 = vunpack.i.h.bf16 %v6882_v40 }
 0x15e   : > { %v4392_v7 = vpop.permute.xlu0 %4391  ;;  %v4358_v31 = vunpack.i.l.bf16 %v6882_v40  ;;  %v4389_v33 = vunpack.i.h.bf16 %v4387_v8  ;;  %v1567_v32 = vpack.c.bf16 %v1539_v44, %v1538_v16  ;;  %v4388_v15 = vunpack.i.l.bf16 %v4387_v8 }
 0x15f   : > { %v6949_v48 = vpop.permute.xlu1 %4396  ;;  %v4394_v28 = vunpack.i.h.bf16 %v4392_v7  ;;  %v4393_v61 = vunpack.i.l.bf16 %v4392_v7  ;;  %v1568_v55 = vpack.c.bf16 %v1541_v29, %v1540_v4  ;;  %v6959_v18 = vsel %vm1432_vm7, %v6751_v39, %v4223_v45 }
 0x160   : > { %v8986_v59 = vunpack.i.h.bf16 %v8984_v41  ;;  %v1449_v37 = vsel %vm1432_vm7, %v6761_v38, %v4218_v25  ;;  %v1450_v40 = vsel %vm1432_vm7, %v6765_v6, %v4219_v22  ;;  %v1476_v23 = vsel %vm1465_vm8, %v6857_v36, %v4283_v1 }
 0x161   : > { %3768 = vmatmul.mubr.msk.bf16.gmra.mxu0 %vm1595_vm11, %v1567_v32  ;;  %v1477_v39 = vsel %vm1465_vm8, %v6864_v56, %v4284_v20  ;;  %v1478_v41 = vsel %vm1465_vm8, %v6890_v42, %v4288_v0  ;;  %v1509_v38 = vsel %vm1498_vm9, %v1476_v23, %v4358_v31  ;;  %v4234_v54 = vunpack.i.h.bf16 %v8987_v9 }
 0x162   : > { %v6965_v17 = vsel %vm1432_vm7, %v6755_v27, %v8986_v59  ;;  %v1479_v27 = vsel %vm1465_vm8, %v6896_v34, %v4289_v3  ;;  %v4402_v45 = vpop.permute.xlu0 %4401  ;;  %3771 = vmatprep.mubr.msk.bf16.mxu0 %vm1595_vm11, %v1568_v55  ;;  %v1510_v6 = vsel %vm1498_vm9, %v1477_v39, %v4359_v5  ;;  %v1542_v36 = vsel %vm1531_vm10, %v1509_v38, %v4388_v15 }
 0x163   : > { %v4407_v8 = vpop.permute.xlu1 %4406  ;;  %v4404_v30 = vunpack.i.h.bf16 %v4402_v45  ;;  %v4403_v49 = vunpack.i.l.bf16 %v4402_v45  ;;  %v1543_v62 = vsel %vm1531_vm10, %v1510_v6, %v4389_v33  ;;  %v1511_v56 = vsel %vm1498_vm9, %v1478_v41, %v4393_v61 }
 0x164   : > { %v1512_v42 = vsel %vm1498_vm9, %v1479_v27, %v4394_v28  ;;  %v4233_v34 = vunpack.i.l.bf16 %v8987_v9  ;;  %v4294_v35 = vunpack.i.h.bf16 %v6595_v14  ;;  %v4293_v46 = vunpack.i.l.bf16 %v6595_v14 }
 0x165   : > { %v1544_v60 = vsel %vm1531_vm10, %v1511_v56, %v4403_v49  ;;  %v1545_v19 = vsel %vm1531_vm10, %v1512_v42, %v4404_v30  ;;  %v4299_v16 = vunpack.i.h.bf16 %v6646_v51  ;;  %v4298_v44 = vunpack.i.l.bf16 %v6646_v51  ;;  %v8988_v51 = vld [vmem:[#allocation35_spill] sm:$0xff] }
 0x166   : > { %v4412_v21 = vpop.permute.xlu0 %4411  ;;  %v4399_v22 = vunpack.i.h.bf16 %v6949_v48  ;;  %v4398_v25 = vunpack.i.l.bf16 %v6949_v48  ;;  %v4409_v4 = vunpack.i.h.bf16 %v4407_v8  ;;  %v1569_v29 = vpack.c.bf16 %v1543_v62, %v1542_v36 }
 0x167   : > { %v6991_v58 = vpop.permute.xlu1 %4416  ;;  %v4408_v20 = vunpack.i.l.bf16 %v4407_v8  ;;  %v4414_v1 = vunpack.i.h.bf16 %v4412_v21  ;;  %v4413_v3 = vunpack.i.l.bf16 %v4412_v21  ;;  %v1570_v0 = vpack.c.bf16 %v1545_v19, %v1544_v60 }
 0x168   : > { %v7001_v7 = vsel %vm1432_vm7, %v6773_v11, %v4233_v34  ;;  %v7005_v14 = vsel %vm1432_vm7, %v6777_v2, %v4234_v54  ;;  %v4229_v5 = vunpack.i.h.bf16 %v8988_v51  ;;  %v4228_v31 = vunpack.i.l.bf16 %v8988_v51 }
 0x169   : > { %3772 = vmatmul.mubr.msk.bf16.gmra.mxu0 %vm1595_vm11, %v1569_v29  ;;  %v1480_v33 = vsel %vm1465_vm8, %v6878_v52, %v4293_v46  ;;  %v1481_v32 = vsel %vm1465_vm8, %v6886_v26, %v4294_v35  ;;  %v1482_v11 = vsel %vm1465_vm8, %v1449_v37, %v4298_v44  ;;  %v1483_v15 = vsel %vm1465_vm8, %v1450_v40, %v4299_v16 }
 0x16a   : > { %v4422_v28 = vpop.permute.xlu0 %4421  ;;  %3775 = vmatprep.mubr.msk.bf16.mxu0 %vm1595_vm11, %v1570_v0  ;;  %v1513_v2 = vsel %vm1498_vm9, %v1480_v33, %v4398_v25  ;;  %v1514_v61 = vsel %vm1498_vm9, %v1481_v32, %v4399_v22  ;;  %v1515_v23 = vsel %vm1498_vm9, %v1482_v11, %v4413_v3  ;;  %v1516_v26 = vsel %vm1498_vm9, %v1483_v15, %v4414_v1 }
 0x16b   : > { %v4427_v48 = vpop.permute.xlu1 %4426  ;;  %v4424_v55 = vunpack.i.h.bf16 %v4422_v28  ;;  %v4423_v59 = vunpack.i.l.bf16 %v4422_v28  ;;  %v1546_v8 = vsel %vm1531_vm10, %v1513_v2, %v4408_v20  ;;  %v1547_v52 = vsel %vm1531_vm10, %v1514_v61, %v4409_v4 }
 0x16c   : > { %v1453_v37 = vsel %vm1432_vm7, %v6785_v24, %v4228_v31  ;;  %v1454_v40 = vsel %vm1432_vm7, %v6792_v47, %v4229_v5  ;;  %v4304_v45 = vunpack.i.h.bf16 %v6634_v12  ;;  %v4303_v38 = vunpack.i.l.bf16 %v6634_v12 }
 0x16d   : > { %v1548_v39 = vsel %vm1531_vm10, %v1515_v23, %v4423_v59  ;;  %v1549_v41 = vsel %vm1531_vm10, %v1516_v26, %v4424_v55  ;;  %v4309_v6 = vunpack.i.h.bf16 %v6693_v53  ;;  %v4308_v30 = vunpack.i.l.bf16 %v6693_v53  ;;  %v8990_v26 = vld [vmem:[#allocation37_spill] sm:$0xff] }
 0x16e   : > { %v4432_v49 = vpop.permute.xlu0 %4431  ;;  %v4419_v24 = vunpack.i.h.bf16 %v6991_v58  ;;  %v4418_v36 = vunpack.i.l.bf16 %v6991_v58  ;;  %v4429_v47 = vunpack.i.h.bf16 %v4427_v48  ;;  %v1571_v62 = vpack.c.bf16 %v1547_v52, %v1546_v8  ;;  %v8989_v8 = vld [vmem:[#allocation34_spill] sm:$0xff] }
 0x16f   : > { %v7029_v27 = vpop.permute.xlu1 %4436  ;;  %v4428_v56 = vunpack.i.l.bf16 %v4427_v48  ;;  %v4434_v42 = vunpack.i.h.bf16 %v4432_v49  ;;  %v4433_v9 = vunpack.i.l.bf16 %v4432_v49  ;;  %v1572_v54 = vpack.c.bf16 %v1549_v41, %v1548_v39 }
 0x170   : > { %v4244_v34 = vunpack.i.h.bf16 %v6384_v10  ;;  %v4243_v60 = vunpack.i.l.bf16 %v6384_v10  ;;  %v4239_v12 = vunpack.i.h.bf16 %v6402_v43  ;;  %v4238_v19 = vunpack.i.l.bf16 %v6402_v43 }
 0x171   : > { %3776 = vmatmul.mubr.msk.bf16.gmra.mxu0 %vm1595_vm11, %v1571_v62  ;;  %v1484_v58 = vsel %vm1465_vm8, %v6959_v18, %v4303_v38  ;;  %v1485_v35 = vsel %vm1465_vm8, %v6965_v17, %v4304_v45  ;;  %v1486_v46 = vsel %vm1465_vm8, %v1453_v37, %v4308_v30  ;;  %v1487_v16 = vsel %vm1465_vm8, %v1454_v40, %v4309_v6 }
 0x172   : > { %v4442_v44 = vpop.permute.xlu0 %4441  ;;  %3779 = vmatprep.mubr.msk.bf16.mxu0 %vm1595_vm11, %v1572_v54  ;;  %v1517_v21 = vsel %vm1498_vm9, %v1484_v58, %v4418_v36  ;;  %v1518_v43 = vsel %vm1498_vm9, %v1485_v35, %v4419_v24  ;;  %v1519_v29 = vsel %vm1498_vm9, %v1486_v46, %v4433_v9  ;;  %v1520_v17 = vsel %vm1498_vm9, %v1487_v16, %v4434_v42  ;;  %v8991_v36 = vld [vmem:[#allocation40_spill] sm:$0xff] }
 0x173   : > { %v4447_v53 = vpop.permute.xlu1 %4446  ;;  %v4444_v22 = vunpack.i.h.bf16 %v4442_v44  ;;  %v4443_v25 = vunpack.i.l.bf16 %v4442_v44  ;;  %v1550_v4 = vsel %vm1531_vm10, %v1517_v21, %v4428_v56  ;;  %v1551_v18 = vsel %vm1531_vm10, %v1518_v43, %v4429_v47  ;;  %v8992_v47 = vld [vmem:[#allocation29_spill] sm:$0xff]  ;;  %v8993_v56 = vld [vmem:[#allocation55_spill] sm:$0xff] }
 0x174   : > { %v4314_v20 = vunpack.i.h.bf16 %v6681_v13  ;;  %v4313_v1 = vunpack.i.l.bf16 %v6681_v13  ;;  %v1457_v5 = vsel %vm1432_vm7, %v6806_v57, %v4238_v19  ;;  %v1458_v31 = vsel %vm1432_vm7, %v6812_v50, %v4239_v12  ;;  %v8994_v19 = vld [vmem:[#allocation39_spill] sm:$0xff] }
 0x175   : > { %v1552_v3 = vsel %vm1531_vm10, %v1519_v29, %v4443_v25  ;;  %v1553_v0 = vsel %vm1531_vm10, %v1520_v17, %v4444_v22  ;;  %v4319_v48 = vunpack.i.h.bf16 %v6734_v63  ;;  %v4318_v33 = vunpack.i.l.bf16 %v6734_v63  ;;  %v8995_v17 = vld [vmem:[#allocation33_spill] sm:$0xff] }
 0x176   : > { %v4452_v32 = vpop.permute.xlu0 %4451  ;;  %v4439_v11 = vunpack.i.h.bf16 %v7029_v27  ;;  %v4438_v13 = vunpack.i.l.bf16 %v7029_v27  ;;  %v4449_v15 = vunpack.i.h.bf16 %v4447_v53  ;;  %v1573_v28 = vpack.c.bf16 %v1551_v18, %v1550_v4 }
 0x177   : > { %v7059_v51 = vpop.permute.xlu1 %4456  ;;  %v4448_v2 = vunpack.i.l.bf16 %v4447_v53  ;;  %v4454_v61 = vunpack.i.h.bf16 %v4452_v32  ;;  %v4453_v55 = vunpack.i.l.bf16 %v4452_v32  ;;  %v1574_v59 = vpack.c.bf16 %v1553_v0, %v1552_v3  ;;  %v8997_v0 = vld [vmem:[#allocation4_spill] sm:$0xff] }
 0x178   : > { %v4249_v57 = vunpack.i.h.bf16 %v8989_v8  ;;  %v4248_v52 = vunpack.i.l.bf16 %v8989_v8  ;;  %v1488_v50 = vsel %vm1465_vm8, %v7001_v7, %v4313_v1  ;;  %v1489_v63 = vsel %vm1465_vm8, %v7005_v14, %v4314_v20  ;;  %v8996_v1 = vld [vmem:[#allocation42_spill] sm:$0xff] }
 0x179   : > { %3780 = vmatmul.mubr.msk.bf16.gmra.mxu0 %vm1595_vm11, %v1573_v28  ;;  %v4324_v37 = vunpack.i.h.bf16 %v8990_v26  ;;  %v4323_v40 = vunpack.i.l.bf16 %v8990_v26  ;;  %v1490_v39 = vsel %vm1465_vm8, %v1457_v5, %v4318_v33  ;;  %v1491_v41 = vsel %vm1465_vm8, %v1458_v31, %v4319_v48  ;;  %v7142_v26 = vld [vmem:[%s8627_s3] ss:$0 sm:$0xff] }
 0x17a   : > { %v4462_v27 = vpop.permute.xlu0 %4461  ;;  %3783 = vmatprep.mubr.msk.bf16.mxu0 %vm1595_vm11, %v1574_v59  ;;  %v1521_v45 = vsel %vm1498_vm9, %v1488_v50, %v4438_v13  ;;  %v1522_v7 = vsel %vm1498_vm9, %v1489_v63, %v4439_v11  ;;  %v1523_v49 = vsel %vm1498_vm9, %v1490_v39, %v4453_v55  ;;  %v1524_v24 = vsel %vm1498_vm9, %v1491_v41, %v4454_v61  ;;  %v7136_v50 = vld [vmem:[%s8626_s2] ss:$0 sm:$0xff] }
 0x17b   : > { %v4467_v23 = vpop.permute.xlu1 %4466  ;;  %v4464_v38 = vunpack.i.h.bf16 %v4462_v27  ;;  %v4463_v14 = vunpack.i.l.bf16 %v4462_v27  ;;  %v1554_v6 = vsel %vm1531_vm10, %v1521_v45, %v4448_v2  ;;  %v1555_v30 = vsel %vm1531_vm10, %v1522_v7, %v4449_v15 }
 0x17c   : > { %v1496_v62 = vsel %vm1465_vm8, %v8992_v47, %v8991_v36  ;;  %v1497_v42 = vsel %vm1465_vm8, %v8993_v56, %v8991_v36  ;;  %v4329_v53 = vunpack.i.h.bf16 %v8994_v19  ;;  %v4328_v58 = vunpack.i.l.bf16 %v8994_v19 }
 0x17d   : > { %v1556_v9 = vsel %vm1531_vm10, %v1523_v49, %v4463_v14  ;;  %v1557_v54 = vsel %vm1531_vm10, %v1524_v24, %v4464_v38  ;;  %v4459_v44 = vunpack.i.h.bf16 %v7059_v51  ;;  %v4458_v21 = vunpack.i.l.bf16 %v7059_v51  ;;  %v8998_v51 = vld [vmem:[#allocation3_spill] sm:$0xff] }
 0x17e   : > { %v4472_v16 = vpop.permute.xlu0 %4471  ;;  %v4469_v43 = vunpack.i.h.bf16 %v4467_v23  ;;  %v1575_v22 = vpack.c.bf16 %v1555_v30, %v1554_v6  ;;  %v4468_v25 = vunpack.i.l.bf16 %v4467_v23  ;;  %v1576_v29 = vpack.c.bf16 %v1557_v54, %v1556_v9 }
 0x17f   : > { %v1177_v12 = vpop.permute.xlu1 %1176  ;;  %v4474_v4 = vunpack.i.h.bf16 %v4472_v16  ;;  %v4473_v18 = vunpack.i.l.bf16 %v4472_v16  ;;  %v1459_v20 = vsel %vm1432_vm7, %v8995_v17, %v4243_v60  ;;  %v1460_v3 = vsel %vm1432_vm7, %v8996_v1, %v4244_v34 }
 0x180   : > { %v7098_v35 = vsel %vm1498_vm9, %v1496_v62, %v1177_v12  ;;  %v7101_v46 = vsel %vm1498_vm9, %v1497_v42, %v1177_v12  ;;  %v1461_v5 = vsel %vm1432_vm7, %v8997_v0, %v4248_v52  ;;  %v1462_v31 = vsel %vm1432_vm7, %v8998_v51, %v4249_v57  ;;  %v8999_v62 = vld [vmem:[#allocation2_spill] sm:$0xff] }
 0x181   : > { %3784 = vmatmul.mubr.msk.bf16.gmra.mxu0 %vm1595_vm11, %v1575_v22  ;;  %v1492_v48 = vsel %vm1465_vm8, %v1459_v20, %v4323_v40  ;;  %v1493_v33 = vsel %vm1465_vm8, %v1460_v3, %v4324_v37  ;;  %v1494_v32 = vsel %vm1465_vm8, %v1461_v5, %v4328_v58  ;;  %v1495_v60 = vsel %vm1465_vm8, %v1462_v31, %v4329_v53 }
 0x182   : > { %v4477_v10 = vpop.permute.xlu0 %4476  ;;  %3787 = vmatprep.mubr.msk.bf16.mxu0 %vm1595_vm11, %v1576_v29  ;;  %v1525_v34 = vsel %vm1498_vm9, %v1492_v48, %v4458_v21  ;;  %v1526_v11 = vsel %vm1498_vm9, %v1493_v33, %v4459_v44  ;;  %v1527_v61 = vsel %vm1498_vm9, %v1494_v32, %v4473_v18  ;;  %v1528_v55 = vsel %vm1498_vm9, %v1495_v60, %v4474_v4  ;;  %v9000_v60 = vld [vmem:[#allocation16_spill] sm:$0xff] }
 0x183   : > { %v4479_v13 = vunpack.i.h.bf16 %v4477_v10  ;;  %v4478_v15 = vunpack.i.l.bf16 %v4477_v10  ;;  %v1558_v28 = vsel %vm1531_vm10, %v1525_v34, %v4468_v25  ;;  %v1559_v2 = vsel %vm1531_vm10, %v1526_v11, %v4469_v43 }
 0x184   : > { %v1577_v57 = vpack.c.bf16 %v1559_v2, %v1558_v28  ;;  %vm3172_vm3 = vcmask 588800  }
 0x185   : > { %v1560_v59 = vsel %vm1531_vm10, %v1527_v61, %v4478_v15  ;;  %v1561_v8 = vsel %vm1531_vm10, %v1528_v55, %v4479_v13 }
 0x186   : > { %v1578_v52 = vpack.c.bf16 %v1561_v8, %v1560_v59 }
 0x189   : > { %3788 = vmatmul.mubr.msk.bf16.gmra.mxu0 %vm1595_vm11, %v1577_v57 }
 0x18a   : > { %3791 = vmatprep.mubr.msk.bf16.mxu0 %vm1595_vm11, %v1578_v52 }
 0x219   : > { %v3765_v63 = vpop.f32.mrf.mxu0 }
 0x21a   : > { %v1817_v23 = vmul.f32 %v3765_v63, %v7136_v50 }
 0x21b   : > { %v1682_v37 = vpop.f32.mrf.mxu0 }
 0x21c   : > { %v1815_v40 = vmul.f32 %v7136_v50, %v1682_v37  ;;  %v1855_v41 = vadd.f32 %v7142_v26, %v1817_v23 }
 0x21d   : > { %v3766_v39 = vpop.f32.mrf.mxu0 }
 0x21e   : > { %v1853_v27 = vadd.f32 %v7142_v26, %v1815_v40  ;;  %v1818_v45 = vmul.f32 %v3766_v39, %v7136_v50  ;;  %v1887_v49 = vmax.f32 %v1855_v41, 0.0 }
 0x21f   : > { %v1685_v7 = vpop.f32.mrf.mxu0 }
 0x220   : > { %v1885_v38 = vmax.f32 %v1853_v27, 0.0  ;;  %v1856_v14 = vadd.f32 %v7142_v26, %v1818_v45  ;;  %v1816_v6 = vmul.f32 %v7136_v50, %v1685_v7  ;;  %v2052_v19 = vrot.slane %v1887_v49, 1 }
 0x221   : > { %v3769_v30 = vpop.f32.mrf.mxu0  ;;  %v1962_v17 = vrot.slane %v1887_v49, 7 }
 0x222   : > { %v1888_v24 = vmax.f32 %v1856_v14, 0.0  ;;  %v1854_v36 = vadd.f32 %v7142_v26, %v1816_v6  ;;  %v4480_v56 = vpack.i.bf16 %v1885_v38, %v8999_v62  ;;  %v2048_v25 = vrot.slane %v1885_v38, 1 }
 0x223   : > { %v1698_v47 = vpop.f32.mrf.mxu0  ;;  %v1958_v51 = vrot.slane %v1885_v38, 7  ;;  %v7176_v10 = vsel %vm382_vm1, %v9000_v60, %v1962_v17  ;;  %v1821_v13 = vmul.f32 %v3769_v30, %v7136_v50 }
 0x224   : > { %v1886_v42 = vmax.f32 %v1854_v36, 0.0  ;;  %v4490_v9 = vpack.i.bf16 %v1888_v24, %v1887_v49  ;;  %4481 = vrot.lane.b32.xlu1 %v4480_v56, %s5123_s20  ;;  %v2053_v12 = vrot.slane %v1888_v24, 1  ;;  %v1964_v22 = vrot.slane %v1888_v24, 7 }
 0x225   : > { %v3770_v54 = vpop.f32.mrf.mxu0  ;;  %v1819_v4 = vmul.f32 %v7136_v50, %v1698_v47  ;;  %v7188_v28 = vsel %vm382_vm1, %v9000_v60, %v1958_v51  ;;  %v1859_v57 = vadd.f32 %v7142_v26, %v1821_v13 }
 0x226   : > { %4491 = vrot.lane.b32.xlu0 %v4490_v9, %s5124_s27  ;;  %v2049_v58 = vrot.slane %v1886_v42, 1  ;;  %v4495_v16 = vpack.i.bf16 %v1886_v42, %v1885_v38  ;;  %v2054_v44 = vsel %vm476_vm0, %v2052_v19, %v2053_v12  ;;  %v7157_v21 = vsel %vm476_vm0, %v2053_v12, %v8999_v62 }
 0x227   : > { %v1701_v53 = vpop.f32.mrf.mxu0  ;;  %v4510_v29 = vpack.i.bf16 %v7157_v21, %v2054_v44  ;;  %v1960_v20 = vrot.slane %v1886_v42, 7  ;;  %v4500_v1 = vpack.i.bf16 %v1887_v49, %v1886_v42  ;;  %v7168_v5 = vsel %vm382_vm1, %v1962_v17, %v1964_v22 }
 0x228   : > { %4486 = vrot.lane.b32.xlu1 %v4490_v9, %s5117_s8  ;;  %v2050_v3 = vsel %vm476_vm0, %v2048_v25, %v2049_v58  ;;  %v1857_v31 = vadd.f32 %v7142_v26, %v1819_v4  ;;  %v1822_v48 = vmul.f32 %v3770_v54, %v7136_v50  ;;  %v4505_v34 = vpack.i.bf16 %v7168_v5, %v7176_v10 }
 0x229   : > { %v7160_v43 = vpop.f32.mrf.mxu0  ;;  %v4525_v32 = vpack.i.bf16 %v2050_v3, %v8999_v62  ;;  %v7181_v11 = vsel %vm382_vm1, %v1958_v51, %v1960_v20  ;;  %v1820_v55 = vmul.f32 %v7136_v50, %v1701_v53  ;;  %v7203_v39 = vmax.f32 %v1859_v57, 0.0 }
 0x22a   : > { %4496 = vrot.lane.b32.xlu0 %v4495_v16, %s5117_s8  ;;  %v7190_v2 = vmax.f32 %v1857_v31, 0.0  ;;  %v1860_v61 = vadd.f32 %v7142_v26, %v1822_v48  ;;  %v4535_v8 = vpack.i.bf16 %v7181_v11, %v7188_v28  ;;  %v2051_v27 = vsel %vm476_vm0, %v2049_v58, %v8999_v62 }
 0x22b   : > { %v1714_v18 = vpop.f32.mrf.mxu0  ;;  %v1858_v23 = vadd.f32 %v7142_v26, %v1820_v55  ;;  %v4530_v14 = vpack.i.bf16 %v2054_v44, %v2051_v27  ;;  %v2060_v49 = vrot.slane %v7203_v39, 1  ;;  %v4540_v47 = vpack.i.bf16 %v2051_v27, %v2050_v3 }
 0x22c   : > { %4511 = vrot.lane.b32.xlu1 %v4510_v29, %s5125_s28  ;;  %v7199_v63 = vmax.f32 %v1860_v61, 0.0  ;;  %v4545_v40 = vpack.i.bf16 %v7190_v2, %v1888_v24  ;;  %v1823_v12 = vmul.f32 %v7136_v50, %v1714_v18  ;;  %v2056_v19 = vrot.slane %v7190_v2, 1 }
 0x22d   : > { %v3774_v0 = vpop.f32.mrf.mxu0  ;;  %v7211_v45 = vmax.f32 %v1858_v23, 0.0  ;;  %v1825_v53 = vmul.f32 %v7160_v43, %v7136_v50  ;;  %v1966_v20 = vrot.slane %v7190_v2, 7 }
 0x22e   : > { %4501 = vrot.lane.b32.xlu0 %v4500_v1, %s5123_s20  ;;  %v4550_v38 = vpack.i.bf16 %v7199_v63, %v7203_v39  ;;  %v2061_v6 = vrot.slane %v7199_v63, 1  ;;  %v1826_v44 = vmul.f32 %v3774_v0, %v7136_v50  ;;  %v1972_v48 = vrot.slane %v7199_v63, 7 }
 0x22f   : > { %v1717_v33 = vpop.f32.mrf.mxu0  ;;  %v4565_v36 = vpack.i.bf16 %v7211_v45, %v7190_v2  ;;  %v2057_v9 = vrot.slane %v7211_v45, 1  ;;  %v1968_v25 = vrot.slane %v7211_v45, 7  ;;  %v1863_v1 = vadd.f32 %v7142_v26, %v1825_v53 }
 0x230   : > { %4526 = vrot.lane.b32.xlu1 %v4525_v32, %s5119_s10  ;;  %v7228_v56 = vsel %vm476_vm0, %v2060_v49, %v2061_v6  ;;  %v7232_v42 = vsel %vm476_vm0, %v2061_v6, %v8999_v62  ;;  %v1824_v4 = vmul.f32 %v7136_v50, %v1717_v33  ;;  %v1864_v51 = vadd.f32 %v7142_v26, %v1826_v44 }
 0x231   : > { %v3777_v15 = vpop.f32.mrf.mxu0  ;;  %v7247_v16 = vpack.i.bf16 %v7232_v42, %v7228_v56  ;;  %v2058_v22 = vsel %vm476_vm0, %v2056_v19, %v2057_v9  ;;  %v7266_v31 = vsel %vm382_vm1, %v1966_v20, %v1968_v25  ;;  %v7280_v61 = vsel %vm382_vm1, %v9000_v60, %v1966_v20 }
 0x232   : > { %4506 = vrot.lane.b32.xlu0 %v4505_v34, %s5121_s12  ;;  %v1829_v18 = vmul.f32 %v3777_v15, %v7136_v50  ;;  %v4595_v0 = vpack.i.bf16 %v2058_v22, %v7157_v21  ;;  %9001 = vst [vmem:[#allocation6_spill] sm:$0xff] %v7266_v31  ;;  %v1862_v33 = vadd.f32 %v7142_v26, %v1824_v4  ;;  %v1970_v15 = vrot.slane %v7203_v39, 7 }
 0x233   : > { %v1730_v59 = vpop.f32.mrf.mxu0  ;;  %9002 = vst [vmem:[#allocation45_spill] sm:$0xff] %v7280_v61  ;;  %v7282_v55 = vmax.f32 %v1863_v1, 0.0  ;;  %v7287_v57 = vmax.f32 %v1864_v51, 0.0  ;;  %v4570_v23 = vpack.i.bf16 %v7203_v39, %v7211_v45  ;;  %v7296_v27 = vsel %vm476_vm0, %v2057_v9, %v8999_v62 }
 0x234   : > { %4536 = vrot.lane.b32.xlu1 %v4535_v8, %s5121_s12  ;;  %v1827_v17 = vmul.f32 %v7136_v50, %v1730_v59  ;;  %v1867_v32 = vadd.f32 %v7142_v26, %v1829_v18  ;;  %v4605_v8 = vpack.i.bf16 %v7266_v31, %v7280_v61  ;;  %v7306_v6 = vsel %vm382_vm1, %v9000_v60, %v1970_v15 }
 0x235   : > { %v3778_v52 = vpop.f32.mrf.mxu0  ;;  %9004 = vst [vmem:[#allocation9_spill] sm:$0xff] %v7306_v6  ;;  %v7319_v9 = vpack.i.bf16 %v7296_v27, %v2058_v22  ;;  %v2069_v53 = vrot.slane %v7287_v57, 1  ;;  %v4600_v22 = vpack.i.bf16 %v7228_v56, %v7296_v27  ;;  %v2068_v18 = vrot.slane %v7282_v55, 1 }
 0x236   : > { %4516 = vrot.lane.b32.xlu0 %v4505_v34, %s5126_s29  ;;  %v1830_v34 = vmul.f32 %v3778_v52, %v7136_v50  ;;  %v1865_v21 = vadd.f32 %v7142_v26, %v1827_v17  ;;  %v1978_v61 = vrot.slane %v7282_v55, 7 }
 0x237   : > { %v1733_v37 = vpop.f32.mrf.mxu0  ;;  %v7352_v1 = vsel %vm476_vm0, %v2068_v18, %v2069_v53 }
 0x238   : > { %4546 = vrot.lane.b32.xlu1 %v4545_v40, %s5123_s20  ;;  %v1828_v59 = vmul.f32 %v7136_v50, %v1733_v37  ;;  %v7292_v40 = vsel %vm382_vm1, %v1970_v15, %v1972_v48  ;;  %v1868_v37 = vadd.f32 %v7142_v26, %v1830_v34  ;;  %v7308_v39 = vmax.f32 %v1865_v21, 0.0 }
 0x239   : > { %v7206_v41 = vpop.f32.mrf.mxu0  ;;  %9003 = vst [vmem:[#allocation44_spill] sm:$0xff] %v7292_v40 }
 0x23a   : > { %4521 = vrot.lane.b32.xlu0 %v4510_v29, %s5127_s30  ;;  %v1861_v29 = vadd.f32 %v7142_v26, %v1823_v12  ;;  %v1833_v45 = vmul.f32 %v7206_v41, %v7136_v50  ;;  %v7327_v41 = vpack.i.bf16 %v7287_v57, %v7282_v55  ;;  %v2072_v18 = vrot.slane %v7308_v39, 1 }
 0x23b   : > { %v7213_v7 = vpop.f32.mrf.mxu0 }
 0x23c   : > { %4551 = vrot.lane.b32.xlu1 %v4550_v38, %s5117_s8  ;;  %v7274_v2 = vmax.f32 %v1861_v29, 0.0  ;;  %v1831_v12 = vmul.f32 %v7136_v50, %v7213_v7  ;;  %v1871_v25 = vadd.f32 %v7142_v26, %v1833_v45 }
 0x23d   : > { %v7219_v30 = vpop.f32.mrf.mxu0 }
 0x23e   : > { %4531 = vrot.lane.b32.xlu0 %v4530_v14, %s5119_s10  ;;  %v7300_v14 = vmax.f32 %v1867_v32, 0.0  ;;  %v4625_v49 = vpack.i.bf16 %v7274_v2, %v7199_v63  ;;  %v7330_v63 = vmax.f32 %v1868_v37, 0.0  ;;  %v1834_v4 = vmul.f32 %v7219_v30, %v7136_v50 }
 0x23f   : > { %v7223_v24 = vpop.f32.mrf.mxu0  ;;  %v1869_v56 = vadd.f32 %v7142_v26, %v1831_v12  ;;  %v2064_v30 = vrot.slane %v7274_v2, 1  ;;  %v7368_v32 = vmax.f32 %v1871_v25, 0.0  ;;  %v1974_v21 = vrot.slane %v7274_v2, 7 }
 0x240   : > { %4566 = vrot.lane.b32.xlu1 %v4565_v36, %s5124_s27  ;;  %v1832_v44 = vmul.f32 %v7136_v50, %v7223_v24  ;;  %v1872_v34 = vadd.f32 %v7142_v26, %v1834_v4 }
 0x241   : > { %v7236_v54 = vpop.f32.mrf.mxu0  ;;  %9005 = vst [vmem:[#allocation7_spill] sm:$0xff] %v7368_v32  ;;  %v7408_v25 = vsel %vm382_vm1, %v9000_v60, %v1974_v21 }
 0x242   : > { %4541 = vrot.lane.b32.xlu0 %v4540_v47, %s5125_s28  ;;  %v4575_v47 = vpack.i.bf16 %v7292_v40, %v7306_v6  ;;  %v1870_v51 = vadd.f32 %v7142_v26, %v1832_v44  ;;  %v1837_v48 = vmul.f32 %v7236_v54, %v7136_v50  ;;  %9008 = vst [vmem:[#allocation47_spill] sm:$0xff] %v7408_v25 }
 0x243   : > { %v7243_v58 = vpop.f32.mrf.mxu0 }
 0x244   : > { %4581 = vrot.lane.b32.xlu1 %v7247_v16, %s5125_s28  ;;  %v7389_v27 = vmax.f32 %v1870_v51, 0.0  ;;  %v1875_v37 = vadd.f32 %v7142_v26, %v1837_v48 }
 0x245   : > { %v7256_v43 = vpop.f32.mrf.mxu0 }
 0x246   : > { %4556 = vrot.lane.b32.xlu0 %v4550_v38, %s5124_s27  ;;  %v7298_v38 = vmax.f32 %v1862_v33, 0.0  ;;  %v1838_v33 = vmul.f32 %v7256_v43, %v7136_v50  ;;  %9006 = vst [vmem:[#allocation5_spill] sm:$0xff] %v7389_v27  ;;  %v2081_v51 = vrot.slane %v7389_v27, 1 }
 0x247   : > { %v1765_v3 = vpop.f32.mrf.mxu0 }
 0x248   : > { %4596 = vrot.lane.b32.xlu1 %v4595_v0, %s5119_s10  ;;  %v7339_v7 = vpack.i.bf16 %v7298_v38, %v7274_v2  ;;  %v8741_v24 = vrot.slane %v7298_v38, 1  ;;  %v1836_v17 = vmul.f32 %v7136_v50, %v1765_v3  ;;  %v7356_v0 = vsel %vm476_vm0, %v2069_v53, %v8999_v62 }
 0x249   : > { %v3789_v13 = vpop.f32.mrf.mxu0  ;;  %v1835_v3 = vmul.f32 %v7136_v50, %v7243_v58  ;;  %v7395_v2 = vmax.f32 %v1872_v34, 0.0 }
 0x24a   : > { %4561 = vrot.lane.b32.xlu0 %v4565_v36, %s5117_s8  ;;  %v1866_v36 = vadd.f32 %v7142_v26, %v1828_v59  ;;  %v1841_v15 = vmul.f32 %v3789_v13, %v7136_v50  ;;  %v7376_v54 = vsel %vm476_vm0, %v2064_v30, %v8741_v24  ;;  %v1874_v58 = vadd.f32 %v7142_v26, %v1836_v17 }
 0x24b   : > { %v1778_v52 = vpop.f32.mrf.mxu0  ;;  %v1976_v59 = vrot.slane %v7298_v38, 7  ;;  %v7387_v13 = vpack.i.bf16 %v7356_v0, %v7352_v1  ;;  %v1873_v45 = vadd.f32 %v7142_v26, %v1835_v3  ;;  %v2077_v17 = vrot.slane %v7330_v63, 1 }
 0x24c   : > { %4606 = vrot.lane.b32.xlu1 %v4605_v8, %s5121_s12  ;;  %v7347_v29 = vmax.f32 %v1866_v36, 0.0  ;;  %v1876_v36 = vadd.f32 %v7142_v26, %v1838_v33  ;;  %v7403_v53 = vmax.f32 %v1874_v58, 0.0  ;;  %v2076_v33 = vrot.slane %v7300_v14, 1 }
 0x24d   : > { %v7323_v19 = vpop.f32.mrf.mxu0  ;;  %v2085_v34 = vrot.slane %v7395_v2, 1 }
 0x24e   : > { %4571 = vrot.lane.b32.xlu0 %v4570_v23, %s5123_s20  ;;  %v1839_v23 = vmul.f32 %v7136_v50, %v1778_v52  ;;  %v2073_v12 = vrot.slane %v7347_v29, 1  ;;  %9007 = vst [vmem:[#allocation38_spill] sm:$0xff] %v7403_v53  ;;  %v7421_v30 = vmax.f32 %v1876_v36, 0.0  ;;  %v5099_v36 = vld [vmem:[%s8628_s4 + $0x18] sm:$0xff]   ;;  %v7520_v52 = vpack.i.bf16 %v7330_v63, %v7300_v14 }
 0x24f   : > { %v1781_v20 = vpop.f32.mrf.mxu0 }
 0x250   : > { %4611 = vrot.lane.b32.xlu1 %v4605_v8, %s5126_s29  ;;  %v1840_v43 = vmul.f32 %v7136_v50, %v1781_v20  ;;  %v7382_v8 = vmax.f32 %v1869_v56, 0.0  ;;  %v1877_v4 = vadd.f32 %v7142_v26, %v1839_v23  ;;  %v7417_v56 = vmax.f32 %v1875_v37, 0.0  ;;  %9011 = vst [vmem:[#allocation43_spill] sm:$0xff] %v7421_v30 }
 0x251   : > { %v7419_v20 = vmax.f32 %v1873_v45, 0.0  ;;  %v7430_v3 = vsel %vm476_vm0, %v2072_v18, %v2073_v12  ;;  %v7448_v23 = vsel %vm476_vm0, %v2076_v33, %v2077_v17  ;;  %v7452_v37 = vsel %vm476_vm0, %v2077_v17, %v8999_v62 }
 0x252   : > { %4576 = vrot.lane.b32.xlu0 %v4575_v47, %s5121_s12  ;;  %v1878_v44 = vadd.f32 %v7142_v26, %v1840_v43  ;;  %9010 = vst [vmem:[#allocation49_spill] sm:$0xff] %v7417_v56  ;;  %v7441_v43 = vsel %vm476_vm0, %v2073_v12, %v8999_v62  ;;  %v2084_v45 = vrot.slane %v7368_v32, 1  ;;  %v7476_v17 = vsel %vm476_vm0, %v2085_v34, %v8999_v62 }
 0x253   : > { %v2088_v12 = vrot.slane %v7419_v20, 1  ;;  %v2092_v24 = vrot.slane %v7417_v56, 1 }
 0x254   : > { %4616 = vrot.lane.b32.xlu1 %v7319_v9, %s5127_s30  ;;  %v7437_v58 = vmax.f32 %v1878_v44, 0.0  ;;  %v2093_v44 = vrot.slane %v7421_v30, 1  ;;  %v7472_v18 = vsel %vm476_vm0, %v2084_v45, %v2085_v34  ;;  %v5100_v34 = vld [vmem:[%s8628_s4 + $0x10] sm:$0xff]  }
 0x256   : > { %4586 = vrot.lane.b32.xlu0 %v4575_v47, %s5126_s29  ;;  %v1879_v47 = vadd.f32 %v7142_v26, %v1841_v15  ;;  %v5098_v15 = vld [vmem:[%s8628_s4 + $0x20] ss:$0 sps:$4 sm:$0xff]   ;;  %9013 = vst [vmem:[#allocation54_spill] sm:$0xff] %v7437_v58 }
 0x257   : > { %3838 = vmatprep.subr.msk.bf16.mxu1 %vm3221_vm12, %v5098_v15  ;;  %v3223_v33 = vsel %vm3221_vm12, %v5098_v15, 0 }
 0x258   : > { %4626 = vrot.lane.b32.xlu1 %v4625_v49, %s5123_s20  ;;  %v7411_v49 = vsel %vm382_vm1, %v1974_v21, %v1976_v59  ;;  %v7426_v48 = vmax.f32 %v1879_v47, 0.0  ;;  %v2080_v21 = vrot.slane %v7382_v8, 1  ;;  %v7445_v59 = vmax.f32 %v1877_v4, 0.0  ;;  %3796 = vmatpush3.bf16.msra.mxu1 %v3223_v33 }
 0x259   : > { %9009 = vst [vmem:[#allocation50_spill] sm:$0xff] %v7411_v49  ;;  %v7469_v4 = vsel %vm476_vm0, %v2081_v51, %v8999_v62  ;;  %3797 = vmatprep.subr.bf16.mxu1 %v5099_v36  ;;  %v7500_v33 = vpack.i.bf16 %v7441_v43, %v7430_v3 }
 0x25a   : > { %4591 = vrot.lane.b32.xlu0 %v7247_v16, %s5127_s30  ;;  %9012 = vst [vmem:[#allocation51_spill] sm:$0xff] %v7426_v48  ;;  %9014 = vst [vmem:[#allocation53_spill] sm:$0xff] %v7445_v59  ;;  %v7461_v47 = vsel %vm476_vm0, %v2080_v21, %v2081_v51  ;;  %v7509_v51 = vsel %vm476_vm0, %v2093_v44, %v8999_v62  ;;  %v2096_v15 = vrot.slane %v7445_v59, 1 }
 0x25b   : > { %v7514_v16 = vpack.i.bf16 %v7389_v27, %v7382_v8 }
 0x25c   : > { %4631 = vrot.lane.b32.xlu1 %v7327_v41, %s5117_s8  ;;  %3798 = vmatpush3.bf16.msra.mxu1 %v5099_v36  ;;  %v7550_v36 = vpack.i.bf16 %v7395_v2, %v7368_v32 }
 0x25d   : > { %3799 = vmatprep.subr.bf16.mxu1 %v5100_v34 }
 0x25e   : > { %4601 = vrot.lane.b32.xlu0 %v4600_v22, %s5119_s10  ;;  %v2089_v22 = vrot.slane %v7403_v53, 1  ;;  %9019 = vst [vmem:[#allocation11_spill] sm:$0xff] %v7550_v36 }
 0x260   : > { %4646 = vrot.lane.b32.xlu1 %v7339_v7, %s5124_s27  ;;  %v7479_v21 = vsel %vm476_vm0, %v2088_v12, %v2089_v22  ;;  %v7487_v45 = vsel %vm476_vm0, %v2089_v22, %v8999_v62  ;;  %v7496_v12 = vpack.i.bf16 %v7452_v37, %v7448_v23  ;;  %v7505_v22 = vsel %vm476_vm0, %v2092_v24, %v2093_v44  ;;  %v5101_v44 = vld [vmem:[%s8628_s4 + $0x8] sm:$0xff]  }
 0x261   : > { %v7524_v24 = vpack.i.bf16 %v7469_v4, %v7461_v47  ;;  %v7554_v6 = vpack.i.bf16 %v7487_v45, %v7479_v21  ;;  %v7566_v31 = vpack.i.bf16 %v7509_v51, %v7505_v22  ;;  %3800 = vmatpush3.bf16.msra.mxu1 %v5100_v34  ;;  %v9026_v34 = vrot.slane %v7287_v57, 7 }
 0x262   : > { %4621 = vrot.lane.b32.xlu0 %v7319_v9, %s5125_s28  ;;  %v2097_v9 = vrot.slane %v7437_v58, 1  ;;  %9015 = vst [vmem:[#allocation48_spill] sm:$0xff] %v7496_v12  ;;  %3801 = vmatprep.subr.bf16.mxu1 %v5101_v44 }
 0x263   : > { %9016 = vst [vmem:[#allocation52_spill] sm:$0xff] %v7524_v24  ;;  %9020 = vst [vmem:[#allocation8_spill] sm:$0xff] %v7554_v6  ;;  %v4685_v6 = vpack.i.bf16 %v7411_v49, %v7408_v25  ;;  %v7596_v49 = vsel %vm382_vm1, %v1978_v61, %v9026_v34  ;;  %v4735_v34 = vpack.i.bf16 %v7448_v23, %v7441_v43  ;;  %v1990_v43 = vrot.slane %v7382_v8, 7 }
 0x264   : > { %4661 = vrot.lane.b32.xlu1 %v7387_v13, %s5125_s28  ;;  %v7529_v12 = vsel %vm476_vm0, %v2096_v15, %v2097_v9  ;;  %v7539_v40 = vsel %vm476_vm0, %v2097_v9, %v8999_v62  ;;  %v7546_v15 = vpack.i.bf16 %v7403_v53, %v7419_v20  ;;  %v9021_v9 = vpack.i.bf16 %v7376_v54, %v7232_v42 }
 0x265   : > { %9022 = vst [vmem:[#allocation13_spill] sm:$0xff] %v7566_v31  ;;  %v7575_v42 = vpack.i.bf16 %v7437_v58, %v7445_v59  ;;  %v7583_v24 = vpack.i.bf16 %v7539_v40, %v7529_v12  ;;  %v5102_v31 = vld [vmem:[%s8628_s4] sm:$0xff]   ;;  %3802 = vmatpush3.bf16.msra.mxu1 %v5101_v44  ;;  %v4765_v23 = vpack.i.bf16 %v7461_v47, %v7452_v37 }
 0x266   : > { %4636 = vrot.lane.b32.xlu0 %v7327_v41, %s5124_s27  ;;  %v7535_v41 = vpack.i.bf16 %v7476_v17, %v7472_v18  ;;  %9018 = vst [vmem:[#allocation14_spill] sm:$0xff] %v7546_v15  ;;  %3803 = vmatprep.subr.bf16.mxu1 %v5102_v31 }
 0x267   : > { %9023 = vst [vmem:[#allocation15_spill] sm:$0xff] %v7575_v42  ;;  %9025 = vst [vmem:[#allocation19_spill] sm:$0xff] %v7583_v24  ;;  %v9027_v24 = vrot.slane %v7298_v38, 1 }
 0x268   : > { %9017 = vst [vmem:[#allocation10_spill] sm:$0xff] %v7535_v41  ;;  %4676 = vrot.lane.b32.xlu1 %v9021_v9, %s5119_s10  ;;  %v7579_v9 = vpack.i.bf16 %v7421_v30, %v7417_v56  ;;  %v4650_v41 = vpack.i.bf16 %v7282_v55, %v7298_v38 }
 0x269   : > { %v2067_v25 = vsel %vm476_vm0, %v9027_v24, %v8999_v62  ;;  %3804 = vmatpush3.bf16.msra.mxu1 %v5102_v31  ;;  %v4720_v31 = vpack.i.bf16 %v7347_v29, %v7308_v39 }
 0x26a   : > { %4641 = vrot.lane.b32.xlu0 %v7339_v7, %s5117_s8  ;;  %9024 = vst [vmem:[#allocation12_spill] sm:$0xff] %v7579_v9  ;;  %v7601_v7 = vsel %vm382_vm1, %v9000_v60, %v1978_v61  ;;  %v4705_v61 = vpack.i.bf16 %v7308_v39, %v7287_v57  ;;  %v4680_v38 = vpack.i.bf16 %v7352_v1, %v2067_v25  ;;  %v1988_v57 = vrot.slane %v7330_v63, 7 }
 0x26b   : > { %v4655_v55 = vpack.i.bf16 %v7596_v49, %v7601_v7  ;;  %v4730_v1 = vpack.i.bf16 %v7430_v3, %v7356_v0 }
 0x26c   : > { %4686 = vrot.lane.b32.xlu1 %v4685_v6, %s5121_s12 }
 0x26e   : > { %4651 = vrot.lane.b32.xlu0 %v4650_v41, %s5123_s20  ;;  %v4695_v41 = vpack.i.bf16 %v2067_v25, %v7376_v54  ;;  %v1982_v54 = vrot.slane %v7308_v39, 7 }
 0x270   : > { %4691 = vrot.lane.b32.xlu1 %v4685_v6, %s5126_s29  ;;  %v1984_v6 = vrot.slane %v7347_v29, 7  ;;  %v7643_v44 = vsel %vm382_vm1, %v9000_v60, %v1982_v54 }
 0x271   : > { %9029 = vst [vmem:[#allocation20_spill] sm:$0xff] %v7643_v44 }
 0x272   : > { %4656 = vrot.lane.b32.xlu0 %v4655_v55, %s5121_s12  ;;  %v7634_v25 = vsel %vm382_vm1, %v1982_v54, %v1984_v6  ;;  %v7691_v54 = vsel %vm382_vm1, %v9000_v60, %v1990_v43 }
 0x273   : > { %9028 = vst [vmem:[#allocation21_spill] sm:$0xff] %v7634_v25  ;;  %v4740_v39 = vpack.i.bf16 %v7634_v25, %v7643_v44  ;;  %v2000_v44 = vrot.slane %v7403_v53, 7  ;;  %v2008_v25 = vrot.slane %v7437_v58, 7 }
 0x274   : > { %4696 = vrot.lane.b32.xlu1 %v4695_v41, %s5127_s30 }
 0x276   : > { %4666 = vrot.lane.b32.xlu0 %v4655_v55, %s5126_s29  ;;  %v1996_v55 = vrot.slane %v7395_v2, 7 }
 0x278   : > { %4706 = vrot.lane.b32.xlu1 %v4705_v61, %s5123_s20  ;;  %v1992_v61 = vrot.slane %v7389_v27, 7 }
 0x27a   : > { %4671 = vrot.lane.b32.xlu0 %v7387_v13, %s5127_s30  ;;  %v1986_v13 = vrot.slane %v7300_v14, 7 }
 0x27c   : > { %4711 = vrot.lane.b32.xlu1 %v7520_v52, %s5117_s8  ;;  %v7638_v24 = vsel %vm382_vm1, %v1986_v13, %v1988_v57  ;;  %v7649_v0 = vsel %vm382_vm1, %v9000_v60, %v1986_v13  ;;  %v7684_v57 = vsel %vm382_vm1, %v1990_v43, %v1992_v61  ;;  %v1842_v61 = vmul.f32 %v7323_v19, %v7136_v50 }
 0x27d   : > { %v7653_v3 = vpack.i.bf16 %v7638_v24, %v7649_v0  ;;  %v7697_v47 = vpack.i.bf16 %v7684_v57, %v7691_v54 }
 0x27e   : > { %4681 = vrot.lane.b32.xlu0 %v4680_v38, %s5119_s10  ;;  %v1880_v50 = vadd.f32 %v7142_v26, %v1842_v61 }
 0x280   : > { %4721 = vrot.lane.b32.xlu1 %v4720_v31, %s5124_s27 }
 0x282   : > { %4701 = vrot.lane.b32.xlu0 %v4695_v41, %s5125_s28  ;;  %v1994_v41 = vrot.slane %v7368_v32, 7 }
 0x284   : > { %4731 = vrot.lane.b32.xlu1 %v4730_v1, %s5119_s10  ;;  %v7668_v38 = vsel %vm382_vm1, %v1994_v41, %v1996_v55 }
 0x286   : > { %4716 = vrot.lane.b32.xlu0 %v4720_v31, %s5117_s8  ;;  %v7677_v31 = vsel %vm382_vm1, %v9000_v60, %v1994_v41 }
 0x287   : > { %v7681_v6 = vpack.i.bf16 %v7668_v38, %v7677_v31 }
 0x288   : > { %4741 = vrot.lane.b32.xlu1 %v4740_v39, %s5121_s12 }
 0x289   : > { %9030 = vst [vmem:[#allocation18_spill] sm:$0xff] %v7681_v6 }
 0x28a   : > { %4726 = vrot.lane.b32.xlu0 %v7653_v3, %s5121_s12 }
 0x28c   : > { %4746 = vrot.lane.b32.xlu1 %v4740_v39, %s5126_s29  ;;  %v4770_v39 = vpack.i.bf16 %v7472_v18, %v7469_v4  ;;  %v2002_v4 = vrot.slane %v7417_v56, 7 }
 0x28e   : > { %4736 = vrot.lane.b32.xlu0 %v4735_v34, %s5119_s10  ;;  %v2004_v34 = vrot.slane %v7421_v30, 7 }
 0x290   : > { %4751 = vrot.lane.b32.xlu1 %v7550_v36, %s5117_s8 }
 0x292   : > { %4756 = vrot.lane.b32.xlu0 %v7514_v16, %s5117_s8 }
 0x294   : > { %4766 = vrot.lane.b32.xlu1 %v4765_v23, %s5119_s10 }
 0x296   : > { %4761 = vrot.lane.b32.xlu0 %v7681_v6, %s5121_s12  ;;  %v7693_v37 = vpop.permute.xlu1 %4481 }
 0x297   : > { %v4483_v1 = vunpack.i.l.bf16 %v7693_v37 }
 0x298   : > { %v7700_v13 = vpop.permute.xlu0 %4491  ;;  %4776 = vrot.lane.b32.xlu1 %v7697_v47, %s5121_s12 }
 0x299   : > { %v1562_v55 = vsel %vm1531_vm10, %v7098_v35, %v4483_v1  ;;  %v1563_v41 = vsel %vm1531_vm10, %v7101_v46, %v4483_v1  ;;  %v7724_v35 = vsel %vm382_vm1, %v2002_v4, %v2004_v34  ;;  %v1998_v46 = vrot.slane %v7419_v20, 7 }
 0x29a   : > { %4771 = vrot.lane.b32.xlu0 %v4770_v39, %s5119_s10  ;;  %v7714_v43 = vpop.permute.xlu1 %4486  ;;  %v1579_v23 = vpack.c.bf16 %v1563_v41, %v1562_v55  ;;  %v4795_v1 = vpack.i.bf16 %v7479_v21, %v7476_v17  ;;  %v7736_v39 = vsel %vm382_vm1, %v9000_v60, %v2002_v4  ;;  %v7754_v17 = vmax.f32 %v1880_v50, 0.0 }
 0x29b   : > { %v7742_v34 = vpack.i.bf16 %v7724_v35, %v7736_v39  ;;  %v7745_v41 = vsel %vm382_vm1, %v1998_v46, %v2000_v44  ;;  %v7752_v26 = vsel %vm382_vm1, %v9000_v60, %v1998_v46  ;;  %v4800_v44 = vpack.i.bf16 %v7505_v22, %v7487_v45 }
 0x29c   : > { %v7717_v18 = vpop.permute.xlu0 %4496  ;;  %3792 = vmatmul.mubr.msk.bf16.gmra.mxu0 %vm1595_vm11, %v1579_v23  ;;  %4781 = vrot.lane.b32.xlu1 %v7579_v9, %s5117_s8  ;;  %v7760_v61 = vpack.i.bf16 %v7745_v41, %v7752_v26  ;;  %v7771_v46 = vpack.i.bf16 %v7754_v17, %v7426_v48  ;;  %v8765_v50 = vrot.slane %v7754_v17, 1  ;;  %v2100_v45 = vrot.slane %v7426_v48, 1 }
 0x29d   : > { %9031 = vst [vmem:[#allocation23_spill] sm:$0xff] %v7742_v34  ;;  %v2006_v22 = vrot.slane %v7445_v59, 7  ;;  %v4820_v9 = vpack.i.bf16 %v7529_v12, %v7509_v51 }
 0x29e   : > { %4786 = vrot.lane.b32.xlu0 %v7546_v15, %s5117_s8  ;;  %v7730_v19 = vpop.permute.xlu1 %4511  ;;  %9032 = vst [vmem:[#allocation22_spill] sm:$0xff] %v7760_v61  ;;  %9033 = vst [vmem:[#allocation36_spill] sm:$0xff] %v7771_v46 }
 0x29f   : > { %v7793_v48 = vsel %vm382_vm1, %v2006_v22, %v2008_v25  ;;  %v7801_v51 = vsel %vm382_vm1, %v9000_v60, %v2006_v22 }
 0x2a0   : > { %v7738_v55 = vpop.permute.xlu0 %4501  ;;  %4796 = vrot.lane.b32.xlu1 %v4795_v1, %s5119_s10  ;;  %9035 = vst [vmem:[#allocation46_spill] sm:$0xff] %v7793_v48 }
 0x2a2   : > { %4791 = vrot.lane.b32.xlu0 %v7742_v34, %s5121_s12  ;;  %v7756_v21 = vpop.permute.xlu1 %4526  ;;  %v7788_v34 = vsel %vm476_vm0, %v2100_v45, %v8765_v50 }
 0x2a3   : > { %9034 = vst [vmem:[#allocation41_spill] sm:$0xff] %v7788_v34  ;;  %v4528_v56 = vunpack.i.l.bf16 %v7756_v21 }
 0x2a4   : > { %v7762_v23 = vpop.permute.xlu0 %4506  ;;  %4806 = vrot.lane.b32.xlu1 %v7760_v61, %s5121_s12 }
 0x2a6   : > { %4801 = vrot.lane.b32.xlu0 %v4800_v44, %s5119_s10  ;;  %v4537_v4 = vpop.permute.xlu1 %4536 }
 0x2a7   : > { %v4539_v12 = vunpack.i.h.bf16 %v4537_v4  ;;  %v4538_v45 = vunpack.i.l.bf16 %v4537_v4 }
 0x2a8   : > { %v4517_v1 = vpop.permute.xlu0 %4516  ;;  %4811 = vrot.lane.b32.xlu1 %v7771_v46, %s5117_s8  ;;  %v4825_v46 = vpack.i.bf16 %v7788_v34, %v7539_v40  ;;  %v7807_v40 = vpack.i.bf16 %v7793_v48, %v7801_v51  ;;  %v4484_v48 = vunpack.i.h.bf16 %v7693_v37  ;;  %v4494_v34 = vunpack.i.h.bf16 %v7700_v13 }
 0x2aa   : > { %4816 = vrot.lane.b32.xlu0 %v7575_v42, %s5117_s8  ;;  %v7781_v44 = vpop.permute.xlu1 %4546  ;;  %v9036_v42 = vld [vmem:[#allocation17_spill] sm:$0xff]  ;;  %9037 = vst [vmem:[#allocation56_spill] sm:$0xff] %v7807_v40 }
 0x2ab   : > { %v4014_v53 = vunpack.i.h.bf16 %v9036_v42 }
 0x2ac   : > { %v4522_v58 = vpop.permute.xlu0 %4521  ;;  %4821 = vrot.lane.b32.xlu1 %v4820_v9, %s5119_s10 }
 0x2ad   : > { %v2871_v42 = vsel %vm1334_vm4, %v9000_v60, %v4014_v53  ;;  %v4493_v53 = vunpack.i.l.bf16 %v7700_v13  ;;  %v4529_v13 = vunpack.i.h.bf16 %v7756_v21  ;;  %v4524_v15 = vunpack.i.h.bf16 %v4522_v58 }
 0x2ae   : > { %4826 = vrot.lane.b32.xlu0 %v4825_v46, %s5119_s10  ;;  %v7803_v50 = vpop.permute.xlu1 %4551  ;;  %v2902_v9 = vsel %vm1399_vm6, %v2871_v42, %v4528_v56  ;;  %v4499_v56 = vunpack.i.h.bf16 %v7717_v18  ;;  %v4498_v42 = vunpack.i.l.bf16 %v7717_v18  ;;  %v4523_v18 = vunpack.i.l.bf16 %v4522_v58 }
 0x2af   : > { %v2934_v4 = vsel %vm1465_vm8, %v2902_v9, %v4539_v12  ;;  %v2933_v46 = vsel %vm1465_vm8, %v2902_v9, %v4538_v45  ;;  %v4519_v45 = vunpack.i.h.bf16 %v4517_v1  ;;  %v4518_v9 = vunpack.i.l.bf16 %v4517_v1 }
 0x2b0   : > { %v7809_v25 = vpop.permute.xlu0 %4531  ;;  %4831 = vrot.lane.b32.xlu1 %v7807_v40, %s5121_s12  ;;  %v4503_v40 = vunpack.i.l.bf16 %v7738_v55  ;;  %v2965_v37 = vsel %vm1531_vm10, %v2933_v46, %v4484_v48  ;;  %v2872_v58 = vsel %vm1334_vm4, %v7188_v28, %v4498_v42  ;;  %v4508_v46 = vunpack.i.l.bf16 %v7762_v23 }
 0x2b2   : > { %v7818_v22 = vpop.permute.xlu1 %4566  ;;  %v2966_v36 = vsel %vm1531_vm10, %v2934_v4, %v4503_v40 }
 0x2b4   : > { %v4542_v30 = vpop.permute.xlu0 %4541  ;;  %4836 = vrot.lane.b32.xlu1 %v7500_v33, %s5127_s30 }
 0x2b5   : > { %v4544_v12 = vunpack.i.h.bf16 %v4542_v30  ;;  %v4543_v59 = vunpack.i.l.bf16 %v4542_v30  ;;  %v4533_v30 = vunpack.i.l.bf16 %v7809_v25 }
 0x2b6   : > { %v7833_v27 = vpop.permute.xlu1 %4581 }
 0x2b7   : > { %v2998_v6 = vsel %vm2997_vm13, %v2965_v37, %v4543_v59  ;;  %v2999_v61 = vsel %vm2997_vm13, %v2966_v36, %v4544_v12  ;;  %v2873_v36 = vsel %vm1334_vm4, %v7181_v11, %v4499_v56  ;;  %v4504_v56 = vunpack.i.h.bf16 %v7738_v55 }
 0x2b8   : > { %v7836_v32 = vpop.permute.xlu0 %4556  ;;  %v3031_v1 = vsel %vm3030_vm14, %v2998_v6, %v4518_v9  ;;  %v3032_v48 = vsel %vm3030_vm14, %v2999_v61, %v4519_v45  ;;  %v4548_v45 = vunpack.i.l.bf16 %v7781_v44 }
 0x2b9   : > { %v3064_v40 = vsel %vm3063_vm15, %v3031_v1, %v4493_v53  ;;  %v3065_v21 = vsel %vm3063_vm15, %v3032_v48, %v4494_v34  ;;  %v2903_v53 = vsel %vm1399_vm6, %v2872_v58, %v4529_v13  ;;  %v2904_v34 = vsel %vm1399_vm6, %v2873_v36, %v4533_v30 }
 0x2ba   : > { %v3097_v4 = vsel %vm3096_vm2, %v3064_v40, %v4523_v18  ;;  %v3098_v59 = vsel %vm3096_vm2, %v3065_v21, %v4524_v15  ;;  %v7849_v6 = vpop.permute.xlu1 %4596  ;;  %v4509_v15 = vunpack.i.h.bf16 %v7762_v23  ;;  %v2935_v28 = vsel %vm1465_vm8, %v2903_v53, %v4508_v46 }
 0x2bb   : > { %v3129_v61 = vpack.c.bf16 %v3098_v59, %v3097_v4  ;;  %v2967_v37 = vsel %vm1531_vm10, %v2935_v28, %v4504_v56  ;;  %v4514_v18 = vunpack.i.h.bf16 %v7730_v19  ;;  %v4513_v23 = vunpack.i.l.bf16 %v7730_v19 }
 0x2bc   : > { %v7853_v12 = vpop.permute.xlu0 %4561  ;;  %v2936_v42 = vsel %vm1465_vm8, %v2904_v34, %v4509_v15  ;;  %v4569_v58 = vunpack.i.h.bf16 %v7818_v22  ;;  %v4568_v36 = vunpack.i.l.bf16 %v7818_v22  ;;  %v4488_v22 = vunpack.i.l.bf16 %v7714_v43 }
 0x2bd   : > { %3805 = vmatprep.mubr.msk.bf16.mxu1 %vm3172_vm3, %v3129_v61  ;;  %v2968_v13 = vsel %vm1531_vm10, %v2936_v42, %v4548_v45  ;;  %v3000_v21 = vsel %vm2997_vm13, %v2967_v37, %v4513_v23  ;;  %v4598_v23 = vunpack.i.l.bf16 %v7849_v6 }
 0x2be   : > { %v4607_v11 = vpop.permute.xlu1 %4606  ;;  %v3001_v55 = vsel %vm2997_vm13, %v2968_v13, %v4514_v18  ;;  %v4489_v13 = vunpack.i.h.bf16 %v7714_v43  ;;  %v4534_v18 = vunpack.i.h.bf16 %v7809_v25 }
 0x2c0   : > { %v7861_v9 = vpop.permute.xlu0 %4571 }
 0x2c1   : > { %v4573_v25 = vunpack.i.l.bf16 %v7861_v9 }
 0x2c2   : > { %v4612_v30 = vpop.permute.xlu1 %4611 }
 0x2c3   : > { %v4614_v1 = vunpack.i.h.bf16 %v4612_v30  ;;  %v4613_v48 = vunpack.i.l.bf16 %v4612_v30  ;;  %v4609_v30 = vunpack.i.h.bf16 %v4607_v11 }
 0x2c4   : > { %v7867_v40 = vpop.permute.xlu0 %4576 }
 0x2c5   : > { %v3034_v4 = vsel %vm3030_vm14, %v3001_v55, %v4614_v1  ;;  %v3033_v59 = vsel %vm3030_vm14, %v3000_v21, %v4613_v48  ;;  %v4608_v1 = vunpack.i.l.bf16 %v4607_v11  ;;  %v2874_v55 = vsel %vm1334_vm4, %v7176_v10, %v4488_v22 }
 0x2c6   : > { %v4617_v46 = vpop.permute.xlu1 %4616  ;;  %v3066_v34 = vsel %vm3063_vm15, %v3033_v59, %v4568_v36  ;;  %v3067_v15 = vsel %vm3063_vm15, %v3034_v4, %v4569_v58  ;;  %v2875_v4 = vsel %vm1334_vm4, %v7168_v5, %v4489_v13  ;;  %v2905_v43 = vsel %vm1399_vm6, %v2874_v55, %v4534_v18 }
 0x2c7   : > { %v4619_v61 = vunpack.i.h.bf16 %v4617_v46  ;;  %v4618_v19 = vunpack.i.l.bf16 %v4617_v46  ;;  %v2906_v59 = vsel %vm1399_vm6, %v2875_v4, %v4598_v23  ;;  %v2937_v11 = vsel %vm1465_vm8, %v2905_v43, %v4608_v1 }
 0x2c8   : > { %v4587_v53 = vpop.permute.xlu0 %4586  ;;  %v2938_v58 = vsel %vm1465_vm8, %v2906_v59, %v4609_v30  ;;  %v4549_v46 = vunpack.i.h.bf16 %v7781_v44  ;;  %v4564_v5 = vunpack.i.h.bf16 %v7853_v12  ;;  %v4563_v22 = vunpack.i.l.bf16 %v7853_v12 }
 0x2c9   : > { %v3099_v28 = vsel %vm3096_vm2, %v3066_v34, %v4618_v19  ;;  %v3100_v42 = vsel %vm3096_vm2, %v3067_v15, %v4619_v61  ;;  %v4559_v61 = vunpack.i.h.bf16 %v7836_v32  ;;  %v4558_v19 = vunpack.i.l.bf16 %v7836_v32 }
 0x2ca   : > { %v7879_v56 = vpop.permute.xlu1 %4626  ;;  %v3130_v45 = vpack.c.bf16 %v3100_v42, %v3099_v28  ;;  %v2970_v28 = vsel %vm1531_vm10, %v2938_v58, %v4573_v25  ;;  %v4589_v42 = vunpack.i.h.bf16 %v4587_v53  ;;  %v2969_v13 = vsel %vm1531_vm10, %v2937_v11, %v4549_v46  ;;  %v9038_v58 = vld [vmem:[#allocation45_spill] sm:$0xff] }
 0x2cb   : > { %v2876_v11 = vsel %vm1334_vm4, %v9038_v58, %v4563_v22 }
 0x2cc   : > { %v4592_v37 = vpop.permute.xlu0 %4591  ;;  %3806 = vmatmul.mubr.msk.bf16.vlgmr.msra.gmra.mxu1 %vm3172_vm3, %v3130_v45  ;;  %v4588_v45 = vunpack.i.l.bf16 %v4587_v53 }
 0x2cd   : > { %v4594_v18 = vunpack.i.h.bf16 %v4592_v37  ;;  %v4593_v32 = vunpack.i.l.bf16 %v4592_v37  ;;  %v9039_v37 = vld [vmem:[#allocation6_spill] sm:$0xff] }
 0x2ce   : > { %v7886_v48 = vpop.permute.xlu1 %4631  ;;  %v2877_v46 = vsel %vm1334_vm4, %v9039_v37, %v4564_v5 }
 0x2d0   : > { %v7888_v21 = vpop.permute.xlu0 %4601 }
 0x2d1   : > { %v4603_v1 = vunpack.i.l.bf16 %v7888_v21 }
 0x2d2   : > { %v7899_v36 = vpop.permute.xlu1 %4646 }
 0x2d4   : > { %v4622_v10 = vpop.permute.xlu0 %4621 }
 0x2d5   : > { %v4624_v34 = vunpack.i.h.bf16 %v4622_v10  ;;  %v4623_v15 = vunpack.i.l.bf16 %v4622_v10  ;;  %v4578_v10 = vunpack.i.l.bf16 %v7867_v40 }
 0x2d6   : > { %v7910_v30 = vpop.permute.xlu1 %4661 }
 0x2d7   : > { %v3002_v44 = vsel %vm2997_vm13, %v2969_v13, %v4623_v15  ;;  %v3003_v23 = vsel %vm2997_vm13, %v2970_v28, %v4624_v34  ;;  %v4599_v28 = vunpack.i.h.bf16 %v7849_v6 }
 0x2d8   : > { %v3035_v55 = vsel %vm3030_vm14, %v3002_v44, %v4588_v45  ;;  %v3036_v4 = vsel %vm3030_vm14, %v3003_v23, %v4589_v42  ;;  %v7915_v43 = vpop.permute.xlu0 %4636  ;;  %v4579_v42 = vunpack.i.h.bf16 %v7867_v40  ;;  %v9040_v44 = vld [vmem:[#allocation47_spill] sm:$0xff]  ;;  %v4628_v40 = vunpack.i.l.bf16 %v7879_v56 }
 0x2d9   : > { %v3068_v53 = vsel %vm3063_vm15, %v3035_v55, %v4558_v19  ;;  %v3069_v12 = vsel %vm3063_vm15, %v3036_v4, %v4559_v61  ;;  %v2908_v19 = vsel %vm1399_vm6, %v2877_v46, %v4603_v1  ;;  %v2907_v13 = vsel %vm1399_vm6, %v2876_v11, %v4599_v28 }
 0x2da   : > { %v3101_v59 = vsel %vm3096_vm2, %v3068_v53, %v4593_v32  ;;  %v3102_v25 = vsel %vm3096_vm2, %v3069_v12, %v4594_v18  ;;  %v7926_v34 = vpop.permute.xlu1 %4676  ;;  %v2939_v22 = vsel %vm1465_vm8, %v2907_v13, %v4578_v10  ;;  %v2940_v18 = vsel %vm1465_vm8, %v2908_v19, %v4579_v42 }
 0x2db   : > { %v3131_v15 = vpack.c.bf16 %v3102_v25, %v3101_v59  ;;  %v4679_v5 = vunpack.i.h.bf16 %v7926_v34  ;;  %v4574_v32 = vunpack.i.h.bf16 %v7861_v9  ;;  %v2972_v53 = vsel %vm1531_vm10, %v2940_v18, %v4628_v40 }
 0x2dc   : > { %v7930_v61 = vpop.permute.xlu0 %4641  ;;  %v4584_v12 = vunpack.i.h.bf16 %v7833_v27  ;;  %v4583_v59 = vunpack.i.l.bf16 %v7833_v27  ;;  %v4649_v42 = vunpack.i.h.bf16 %v7899_v36  ;;  %v4663_v27 = vunpack.i.l.bf16 %v7910_v30 }
 0x2dd   : > { %v4643_v45 = vunpack.i.l.bf16 %v7930_v61  ;;  %3809 = vmatprep.mubr.msk.bf16.mxu1 %vm3172_vm3, %v3131_v15  ;;  %v2971_v4 = vsel %vm1531_vm10, %v2939_v22, %v4574_v32 }
 0x2de   : > { %v4687_v23 = vpop.permute.xlu1 %4686  ;;  %v3004_v9 = vsel %vm2997_vm13, %v2971_v4, %v4583_v59  ;;  %v3005_v46 = vsel %vm2997_vm13, %v2972_v53, %v4584_v12 }
 0x2df   : > { %v2880_v6 = vsel %vm1334_vm4, %v9040_v44, %v4643_v45  ;;  %v4648_v45 = vunpack.i.l.bf16 %v7899_v36 }
 0x2e0   : > { %v7943_v1 = vpop.permute.xlu0 %4651  ;;  %v2911_v55 = vsel %vm1399_vm6, %v2880_v6, %v4679_v5 }
 0x2e1   : > { %v4654_v15 = vunpack.i.h.bf16 %v7943_v1 }
 0x2e2   : > { %v4692_v25 = vpop.permute.xlu1 %4691 }
 0x2e3   : > { %v4694_v58 = vunpack.i.h.bf16 %v4692_v25  ;;  %v4693_v11 = vunpack.i.l.bf16 %v4692_v25 }
 0x2e4   : > { %v4657_v37 = vpop.permute.xlu0 %4656 }
 0x2e5   : > { %v4658_v10 = vunpack.i.l.bf16 %v4657_v37  ;;  %v3038_v28 = vsel %vm3030_vm14, %v3005_v46, %v4694_v58  ;;  %v3037_v19 = vsel %vm3030_vm14, %v3004_v9, %v4693_v11  ;;  %v4553_v58 = vunpack.i.l.bf16 %v7803_v50 }
 0x2e6   : > { %v4697_v5 = vpop.permute.xlu1 %4696  ;;  %v3070_v32 = vsel %vm3063_vm15, %v3037_v19, %v4648_v45  ;;  %v3071_v40 = vsel %vm3063_vm15, %v3038_v28, %v4649_v42  ;;  %v4678_v11 = vunpack.i.l.bf16 %v7926_v34  ;;  %v4604_v9 = vunpack.i.h.bf16 %v7888_v21  ;;  %v9041_v19 = vld [vmem:[#allocation44_spill] sm:$0xff] }
 0x2e7   : > { %v2943_v13 = vsel %vm1465_vm8, %v2911_v55, %v4658_v10  ;;  %v4699_v18 = vunpack.i.h.bf16 %v4697_v5  ;;  %v4698_v44 = vunpack.i.l.bf16 %v4697_v5  ;;  %v4554_v55 = vunpack.i.h.bf16 %v7803_v50 }
 0x2e8   : > { %v2975_v22 = vsel %vm1531_vm10, %v2943_v13, %v4654_v15  ;;  %v4667_v6 = vpop.permute.xlu0 %4666  ;;  %v4644_v46 = vunpack.i.h.bf16 %v7930_v61  ;;  %v4689_v10 = vunpack.i.h.bf16 %v4687_v23  ;;  %v4688_v15 = vunpack.i.l.bf16 %v4687_v23 }
 0x2e9   : > { %v7963_v4 = vsel %vm2997_vm13, %v2975_v22, %v4663_v27  ;;  %v3103_v53 = vsel %vm3096_vm2, %v3070_v32, %v4698_v44  ;;  %v3104_v36 = vsel %vm3096_vm2, %v3071_v40, %v4699_v18  ;;  %v2879_v42 = vsel %vm1334_vm4, %v9041_v19, %v4554_v55  ;;  %v9042_v27 = vld [vmem:[#allocation9_spill] sm:$0xff]  ;;  %v9043_v22 = vld [vmem:[#allocation50_spill] sm:$0xff] }
 0x2ea   : > { %v3132_v12 = vpack.c.bf16 %v3104_v36, %v3103_v53  ;;  %v7967_v59 = vpop.permute.xlu1 %4706  ;;  %v2878_v13 = vsel %vm1334_vm4, %v9042_v27, %v4553_v58  ;;  %v2910_v50 = vsel %vm1399_vm6, %v2879_v42, %v4678_v11  ;;  %v4653_v34 = vunpack.i.l.bf16 %v7943_v1 }
 0x2eb   : > { %v2909_v21 = vsel %vm1399_vm6, %v2878_v13, %v4604_v9  ;;  %v2881_v61 = vsel %vm1334_vm4, %v9043_v22, %v4644_v46  ;;  %v2942_v23 = vsel %vm1465_vm8, %v2910_v50, %v4689_v10  ;;  %v4659_v18 = vunpack.i.h.bf16 %v4657_v37 }
 0x2ec   : > { %v4672_v25 = vpop.permute.xlu0 %4671  ;;  %3810 = vmatmul.mubr.msk.bf16.gmra.mxu1 %vm3172_vm3, %v3132_v12  ;;  %v4629_v44 = vunpack.i.h.bf16 %v7879_v56  ;;  %v2941_v32 = vsel %vm1465_vm8, %v2909_v21, %v4688_v15  ;;  %v4708_v40 = vunpack.i.l.bf16 %v7967_v59  ;;  %v4634_v1 = vunpack.i.h.bf16 %v7886_v48 }
 0x2ed   : > { %v4633_v12 = vunpack.i.l.bf16 %v7886_v48  ;;  %v4664_v55 = vunpack.i.h.bf16 %v7910_v30  ;;  %v2974_v37 = vsel %vm1531_vm10, %v2942_v23, %v4653_v34  ;;  %v4669_v10 = vunpack.i.h.bf16 %v4667_v6 }
 0x2ee   : > { %v7975_v28 = vpop.permute.xlu1 %4711  ;;  %v4668_v15 = vunpack.i.l.bf16 %v4667_v6  ;;  %v2973_v19 = vsel %vm1531_vm10, %v2941_v32, %v4629_v44  ;;  %v4639_v48 = vunpack.i.h.bf16 %v7915_v43  ;;  %v4638_v30 = vunpack.i.l.bf16 %v7915_v43 }
 0x2ef   : > { %v4674_v34 = vunpack.i.h.bf16 %v4672_v25 }
 0x2f0   : > { %v4682_v45 = vpop.permute.xlu0 %4681 }
 0x2f1   : > { %v4683_v5 = vunpack.i.l.bf16 %v4682_v45 }
 0x2f2   : > { %v7991_v36 = vpop.permute.xlu1 %4721 }
 0x2f3   : > { %v2912_v53 = vsel %vm1399_vm6, %v2881_v61, %v4683_v5  ;;  %v4673_v5 = vunpack.i.l.bf16 %v4672_v25  ;;  %v4684_v61 = vunpack.i.h.bf16 %v4682_v45  ;;  %v2882_v25 = vsel %vm1334_vm4, %v7601_v7, %v4633_v12 }
 0x2f4   : > { %v2944_v58 = vsel %vm1465_vm8, %v2912_v53, %v4659_v18  ;;  %v4702_v11 = vpop.permute.xlu0 %4701 }
 0x2f5   : > { %v4704_v56 = vunpack.i.h.bf16 %v4702_v11  ;;  %v4703_v9 = vunpack.i.l.bf16 %v4702_v11  ;;  %v2976_v46 = vsel %vm1531_vm10, %v2944_v58, %v4708_v40 }
 0x2f6   : > { %v8001_v42 = vsel %vm2997_vm13, %v2976_v46, %v4664_v55  ;;  %v8007_v50 = vpop.permute.xlu1 %4731  ;;  %v2883_v55 = vsel %vm1334_vm4, %v7596_v49, %v4634_v1  ;;  %v4713_v46 = vunpack.i.l.bf16 %v7975_v28 }
 0x2f7   : > { %v3006_v27 = vsel %vm2997_vm13, %v2973_v19, %v4703_v9  ;;  %v3007_v13 = vsel %vm2997_vm13, %v2974_v37, %v4704_v56  ;;  %v4733_v23 = vunpack.i.l.bf16 %v8007_v50  ;;  %v4709_v37 = vunpack.i.h.bf16 %v7967_v59 }
 0x2f8   : > { %v3039_v21 = vsel %vm3030_vm14, %v3006_v27, %v4668_v15  ;;  %v3040_v6 = vsel %vm3030_vm14, %v3007_v13, %v4669_v10  ;;  %v8011_v22 = vpop.permute.xlu0 %4716  ;;  %v2913_v56 = vsel %vm1399_vm6, %v2882_v25, %v4684_v61  ;;  %v2886_v15 = vsel %vm1334_vm4, %v7649_v0, %v4713_v46 }
 0x2f9   : > { %v3072_v18 = vsel %vm3063_vm15, %v3039_v21, %v4638_v30  ;;  %v3073_v43 = vsel %vm3063_vm15, %v3040_v6, %v4639_v48  ;;  %v2914_v9 = vsel %vm1399_vm6, %v2883_v55, %v4733_v23  ;;  %v4714_v27 = vunpack.i.h.bf16 %v7975_v28 }
 0x2fa   : > { %v3105_v44 = vsel %vm3096_vm2, %v3072_v18, %v4673_v5  ;;  %v3106_v32 = vsel %vm3096_vm2, %v3073_v43, %v4674_v34  ;;  %v4742_v40 = vpop.permute.xlu1 %4741 }
 0x2fb   : > { %v3133_v53 = vpack.c.bf16 %v3106_v32, %v3105_v44  ;;  %v4744_v58 = vunpack.i.h.bf16 %v4742_v40  ;;  %v4743_v45 = vunpack.i.l.bf16 %v4742_v40  ;;  %v2887_v23 = vsel %vm1334_vm4, %v7638_v24, %v4714_v27 }
 0x2fc   : > { %v8022_v11 = vpop.permute.xlu0 %4726 }
 0x2fd   : > { %3813 = vmatprep.mubr.msk.bf16.mxu1 %vm3172_vm3, %v3133_v53  ;;  %v8030_v10 = vsel %vm1465_vm8, %v2914_v9, %v4744_v58  ;;  %v2945_v7 = vsel %vm1465_vm8, %v2913_v56, %v4743_v45 }
 0x2fe   : > { %v8033_v49 = vpop.permute.xlu1 %4746  ;;  %v8036_v1 = vsel %vm1531_vm10, %v2945_v7, %v4709_v37 }
 0x300   : > { %v8038_v12 = vpop.permute.xlu0 %4736 }
 0x301   : > { %v4739_v59 = vunpack.i.h.bf16 %v8038_v12 }
 0x302   : > { %v4752_v48 = vpop.permute.xlu1 %4751 }
 0x303   : > { %v2917_v19 = vsel %vm1399_vm6, %v2886_v15, %v4739_v59  ;;  %v4753_v18 = vunpack.i.l.bf16 %v4752_v48 }
 0x304   : > { %v4757_v30 = vpop.permute.xlu0 %4756 }
 0x305   : > { %v4758_v13 = vunpack.i.l.bf16 %v4757_v30  ;;  %v4759_v0 = vunpack.i.h.bf16 %v4757_v30  ;;  %v2890_v55 = vsel %vm1334_vm4, %v7677_v31, %v4753_v18  ;;  %v4754_v30 = vunpack.i.h.bf16 %v4752_v48 }
 0x306   : > { %v4767_v5 = vpop.permute.xlu1 %4766 }
 0x307   : > { %v2888_v34 = vsel %vm1334_vm4, %v7691_v54, %v4758_v13  ;;  %v4769_v21 = vunpack.i.h.bf16 %v4767_v5  ;;  %v4768_v6 = vunpack.i.l.bf16 %v4767_v5  ;;  %v2889_v24 = vsel %vm1334_vm4, %v7684_v57, %v4759_v0 }
 0x308   : > { %v4762_v61 = vpop.permute.xlu0 %4761 }
 0x309   : > { %v4763_v43 = vunpack.i.l.bf16 %v4762_v61  ;;  %v2919_v44 = vsel %vm1399_vm6, %v2888_v34, %v4769_v21  ;;  %v2918_v32 = vsel %vm1399_vm6, %v2887_v23, %v4768_v6  ;;  %v4764_v37 = vunpack.i.h.bf16 %v4762_v61 }
 0x30a   : > { %v4777_v40 = vpop.permute.xlu1 %4776 }
 0x30b   : > { %v8052_v28 = vsel %vm1465_vm8, %v2919_v44, %v4763_v43  ;;  %v4779_v53 = vunpack.i.h.bf16 %v4777_v40  ;;  %v4778_v54 = vunpack.i.l.bf16 %v4777_v40 }
 0x30c   : > { %v4772_v25 = vpop.permute.xlu0 %4771 }
 0x30d   : > { %v4774_v58 = vunpack.i.h.bf16 %v4772_v25  ;;  %v4773_v45 = vunpack.i.l.bf16 %v4772_v25  ;;  %v8059_v56 = vsel %vm1465_vm8, %v2918_v32, %v4779_v53  ;;  %v8062_v9 = vsel %vm1465_vm8, %v2917_v19, %v4778_v54 }
 0x30e   : > { %v4782_v59 = vpop.permute.xlu1 %4781  ;;  %v2891_v19 = vsel %vm1334_vm4, %v7668_v38, %v4754_v30 }
 0x30f   : > { %v2921_v46 = vsel %vm1399_vm6, %v2890_v55, %v4774_v58  ;;  %v2920_v7 = vsel %vm1399_vm6, %v2889_v24, %v4773_v45  ;;  %v4783_v6 = vunpack.i.l.bf16 %v4782_v59 }
 0x310   : > { %v4787_v15 = vpop.permute.xlu0 %4786  ;;  %v8067_v31 = vsel %vm1465_vm8, %v2920_v7, %v4764_v37 }
 0x311   : > { %v4788_v27 = vunpack.i.l.bf16 %v4787_v15  ;;  %v4789_v23 = vunpack.i.h.bf16 %v4787_v15  ;;  %v2894_v40 = vsel %vm1334_vm4, %v7736_v39, %v4783_v6  ;;  %v4784_v15 = vunpack.i.h.bf16 %v4782_v59 }
 0x312   : > { %v4797_v13 = vpop.permute.xlu1 %4796 }
 0x313   : > { %v2892_v57 = vsel %vm1334_vm4, %v7752_v26, %v4788_v27  ;;  %v4799_v34 = vunpack.i.h.bf16 %v4797_v13  ;;  %v4798_v5 = vunpack.i.l.bf16 %v4797_v13  ;;  %v2893_v38 = vsel %vm1334_vm4, %v7745_v41, %v4789_v23 }
 0x314   : > { %v4792_v21 = vpop.permute.xlu0 %4791  ;;  %v2895_v13 = vsel %vm1334_vm4, %v7724_v35, %v4784_v15 }
 0x315   : > { %v4793_v61 = vunpack.i.l.bf16 %v4792_v21  ;;  %v2923_v18 = vsel %vm1399_vm6, %v2892_v57, %v4799_v34  ;;  %v2922_v43 = vsel %vm1399_vm6, %v2891_v19, %v4798_v5  ;;  %v4794_v25 = vunpack.i.h.bf16 %v4792_v21 }
 0x316   : > { %v4807_v0 = vpop.permute.xlu1 %4806  ;;  %v4749_v34 = vunpack.i.h.bf16 %v8033_v49  ;;  %v4748_v5 = vunpack.i.l.bf16 %v8033_v49  ;;  %v4724_v49 = vunpack.i.h.bf16 %v7991_v36 }
 0x317   : > { %v8076_v48 = vsel %vm1465_vm8, %v2923_v18, %v4793_v61  ;;  %v4809_v44 = vunpack.i.h.bf16 %v4807_v0  ;;  %v4808_v26 = vunpack.i.l.bf16 %v4807_v0 }
 0x318   : > { %v4802_v32 = vpop.permute.xlu0 %4801  ;;  %v3041_v23 = vsel %vm3030_vm14, %v7963_v4, %v4748_v5 }
 0x319   : > { %v4804_v53 = vunpack.i.h.bf16 %v4802_v32  ;;  %v4803_v54 = vunpack.i.l.bf16 %v4802_v32  ;;  %v8083_v55 = vsel %vm1465_vm8, %v2922_v43, %v4809_v44  ;;  %v8086_v58 = vsel %vm1465_vm8, %v2921_v46, %v4808_v26 }
 0x31a   : > { %v8090_v37 = vpop.permute.xlu1 %4811  ;;  %v4723_v43 = vunpack.i.l.bf16 %v7991_v36 }
 0x31b   : > { %v2925_v45 = vsel %vm1399_vm6, %v2894_v40, %v4804_v53  ;;  %v2924_v24 = vsel %vm1399_vm6, %v2893_v38, %v4803_v54  ;;  %v5103_v38 = vld [vmem:[%s8626_s2] ss:$0 sm:$0xff] }
 0x31c   : > { %v8092_v7 = vpop.permute.xlu0 %4816  ;;  %v8095_v39 = vsel %vm1465_vm8, %v2924_v24, %v4794_v25  ;;  %v3074_v32 = vsel %vm3063_vm15, %v3041_v23, %v4723_v43 }
 0x31d   : > { %v4818_v41 = vunpack.i.l.bf16 %v8092_v7 }
 0x31e   : > { %v4822_v27 = vpop.permute.xlu1 %4821 }
 0x31f   : > { %v2896_v30 = vsel %vm1334_vm4, %v7801_v51, %v4818_v41  ;;  %v4824_v46 = vunpack.i.h.bf16 %v4822_v27  ;;  %v4823_v57 = vunpack.i.l.bf16 %v4822_v27  ;;  %v3042_v51 = vsel %vm3030_vm14, %v8001_v42, %v4749_v34 }
 0x320   : > { %v3075_v42 = vsel %vm3063_vm15, %v3042_v51, %v4724_v49 }
 0x321   : > { %v8105_v21 = vsel %vm1399_vm6, %v2896_v30, %v4824_v46  ;;  %v2926_v59 = vsel %vm1399_vm6, %v2895_v13, %v4823_v57 }
 0x322   : > { %v4832_v19 = vpop.permute.xlu1 %4831 }
 0x323   : > { %v4834_v6 = vunpack.i.h.bf16 %v4832_v19  ;;  %v4833_v61 = vunpack.i.l.bf16 %v4832_v19 }
 0x325   : > { %v8113_v35 = vsel %vm1465_vm8, %v2926_v59, %v4834_v6  ;;  %v8116_v18 = vsel %vm1465_vm8, %v2925_v45, %v4833_v61  ;;  %v5104_v45 = vld [vmem:[%s8627_s3] ss:$0 sm:$0xff] }
 0x326   : > { %v4837_v0 = vpop.permute.xlu1 %4836 }
 0x327   : > { %v4839_v44 = vunpack.i.h.bf16 %v4837_v0  ;;  %v4838_v26 = vunpack.i.l.bf16 %v4837_v0  ;;  %v9044_v0 = vrot.slane %v7754_v17, 1 }
 0x329   : > { %v3108_v40 = vsel %vm3096_vm2, %v3075_v42, %v4839_v44  ;;  %v3107_v4 = vsel %vm3096_vm2, %v3074_v32, %v4838_v26  ;;  %v8149_v44 = vsel %vm476_vm0, %v9044_v0, %v8999_v62 }
 0x32a   : > { %v3134_v53 = vpack.c.bf16 %v3108_v40, %v3107_v4 }
 0x32c   : > { %3814 = vmatmul.mubr.msk.bf16.gmra.mxu1 %vm3172_vm3, %v3134_v53 }
 0x35c   : > { %v3793_v54 = vpop.f32.mrf.mxu0 }
 0x35d   : > { %v1845_v36 = vmul.f32 %v5103_v38, %v3793_v54 }
 0x35e   : > { %v1794_v25 = vpop.f32.mrf.mxu0 }
 0x35f   : > { %v1883_v24 = vadd.f32 %v5104_v45, %v1845_v36  ;;  %v1843_v15 = vmul.f32 %v5103_v38, %v1794_v25 }
 0x360   : > { %v3794_v41 = vpop.f32.mrf.mxu0 }
 0x361   : > { %v8131_v30 = vmax.f32 %v1883_v24, 0.0  ;;  %v1881_v27 = vadd.f32 %v5104_v45, %v1843_v15  ;;  %v1846_v46 = vmul.f32 %v5103_v38, %v3794_v41 }
 0x362   : > { %v1797_v57 = vpop.f32.mrf.mxu0 }
 0x363   : > { %v1884_v13 = vadd.f32 %v5104_v45, %v1846_v46  ;;  %v8133_v34 = vmax.f32 %v1881_v27, 0.0  ;;  %v1844_v5 = vmul.f32 %v5103_v38, %v1797_v57  ;;  %v2110_v59 = vrot.slane %v8131_v30, 7 }
 0x364   : > { %v2114_v61 = vrot.slane %v8131_v30, 1 }
 0x365   : > { %v8136_v19 = vmax.f32 %v1884_v13, 0.0  ;;  %v1882_v6 = vadd.f32 %v5104_v45, %v1844_v5  ;;  %v2104_v26 = vrot.slane %v8133_v34, 1  ;;  %v2014_v32 = vrot.slane %v8133_v34, 7 }
 0x366   : > { %v2111_v42 = vsel %vm382_vm1, %v9000_v60, %v2110_v59  ;;  %v9045_v13 = vpack.i.bf16 %v7382_v8, %v7330_v63  ;;  %v9046_v5 = vpack.i.bf16 %v7300_v14, %v7347_v29  ;;  %v9048_v14 = vld [vmem:[#allocation52_spill] sm:$0xff]  ;;  %v9049_v63 = vpack.i.bf16 %v7419_v20, %v7395_v2  ;;  %v9050_v29 = vld [vmem:[#allocation7_spill] sm:$0xff]  ;;  %v9051_v8 = vld [vmem:[#allocation5_spill] sm:$0xff] }
 0x367   : > { %v2112_v51 = vrot.slane %v8136_v19, 7  ;;  %v2115_v23 = vrot.slane %v8136_v19, 1  ;;  %v5085_v49 = vpack.i.bf16 %v8136_v19, %v8131_v30  ;;  %v8143_v43 = vmax.f32 %v1882_v6, 0.0  ;;  %v8230_v2 = vld [vmem:[%s8630_s6] ss:$0 sm:$0xff] }
 0x369   : > { %v2113_v40 = vsel %vm382_vm1, %v2110_v59, %v2112_v51  ;;  %v2116_v4 = vsel %vm476_vm0, %v2114_v61, %v2115_v23  ;;  %v2117_v53 = vsel %vm476_vm0, %v2115_v23, %v8999_v62  ;;  %v8161_v54 = vpack.i.bf16 %v8143_v43, %v8133_v34  ;;  %v9047_v59 = vld [vmem:[#allocation48_spill] sm:$0xff]  ;;  %v9054_v51 = vld [vmem:[#allocation22_spill] sm:$0xff] }
 0x36a   : > { %v2105_v38 = vrot.slane %v8143_v43, 1  ;;  %v2016_v36 = vrot.slane %v8143_v43, 7  ;;  %v5065_v25 = vpack.i.bf16 %v8131_v30, %v8143_v43  ;;  %v8167_v45 = vpack.i.bf16 %v2113_v40, %v2111_v42  ;;  %v9055_v23 = vld [vmem:[#allocation18_spill] sm:$0xff]  ;;  %v8361_v43 = vpop.permute.xlu0 %4826 }
 0x36b   : > { %v8169_v24 = vpack.i.bf16 %v2117_v53, %v2116_v4  ;;  %4841 = vrot.lane.b32.xlu0 %v8161_v54, %s5117_s8 }
 0x36c   : > { %v2106_v15 = vsel %vm476_vm0, %v2104_v26, %v2105_v38  ;;  %v2107_v41 = vsel %vm476_vm0, %v2105_v38, %v8999_v62  ;;  %v8179_v27 = vsel %vm382_vm1, %v2014_v32, %v2016_v36 }
 0x36d   : > { %v4845_v46 = vpack.i.bf16 %v2106_v15, %v8149_v44  ;;  %v8182_v57 = vpack.i.bf16 %v2107_v41, %v2106_v15  ;;  %v9056_v15 = vld [vmem:[#allocation14_spill] sm:$0xff] }
 0x36f   : > { %4846 = vrot.lane.b32.xlu1 %v4845_v46, %s5119_s10  ;;  %2271 = vrot.lane.b32.xlu0 %v2107_v41, %s5119_s10  ;;  %v9057_v41 = vld [vmem:[#allocation11_spill] sm:$0xff] }
 0x373   : > { %4856 = vrot.lane.b32.xlu1 %v9045_v13, %s5123_s20  ;;  %4851 = vrot.lane.b32.xlu0 %v9046_v5, %s5123_s20 }
 0x377   : > { %4866 = vrot.lane.b32.xlu1 %v9047_v59, %s5125_s28  ;;  %4861 = vrot.lane.b32.xlu0 %v7500_v33, %s5125_s28  ;;  %v9052_v33 = vpack.i.bf16 %v9050_v29, %v9051_v8  ;;  %v9062_v8 = vld [vmem:[#allocation49_spill] sm:$0xff] }
 0x37b   : > { %4876 = vrot.lane.b32.xlu1 %v7697_v47, %s5126_s29  ;;  %4871 = vrot.lane.b32.xlu0 %v7653_v3, %s5126_s29 }
 0x37f   : > { %4886 = vrot.lane.b32.xlu1 %v7514_v16, %s5124_s27  ;;  %4881 = vrot.lane.b32.xlu0 %v7520_v52, %s5124_s27  ;;  %v8221_v52 = vld [vmem:[%s8629_s5] ss:$0 sm:$0xff] }
 0x380   : > { %v9053_v16 = vld [vmem:[#allocation10_spill] sm:$0xff] }
 0x383   : > { %4896 = vrot.lane.b32.xlu1 %v9048_v14, %s5127_s30  ;;  %4891 = vrot.lane.b32.xlu0 %v9047_v59, %s5127_s30  ;;  %v9058_v59 = vld [vmem:[#allocation8_spill] sm:$0xff] }
 0x387   : > { %4906 = vrot.lane.b32.xlu1 %v9049_v63, %s5123_s20  ;;  %4901 = vrot.lane.b32.xlu0 %v9052_v33, %s5123_s20  ;;  %v9060_v63 = vld [vmem:[#allocation43_spill] sm:$0xff]  ;;  %v9063_v33 = vld [vmem:[#allocation38_spill] sm:$0xff] }
 0x38b   : > { %4916 = vrot.lane.b32.xlu1 %v9053_v16, %s5125_s28  ;;  %4911 = vrot.lane.b32.xlu0 %v9048_v14, %s5125_s28  ;;  %v9059_v14 = vld [vmem:[#allocation53_spill] sm:$0xff] }
 0x38c   : > { %v3807_v20 = vpop.f32.mrf.mxu1  ;;  %v9061_v29 = vpack.i.bf16 %v9059_v14, %v9060_v63 }
 0x38d   : > { %v3394_v3 = vmul.f32 %v3807_v20, %v8221_v52  ;;  %v9064_v20 = vpack.i.bf16 %v9062_v8, %v9063_v33  ;;  %v5010_v8 = vpack.i.bf16 %v8133_v34, %v7754_v17  ;;  %v9076_v34 = vmov 0.0  }
 0x38e   : > { %v3259_v47 = vpop.f32.mrf.mxu1 }
 0x38f   : > { %v3432_v6 = vadd.f32 %v8230_v2, %v3394_v3  ;;  %v3392_v61 = vmul.f32 %v8221_v52, %v3259_v47  ;;  %4926 = vrot.lane.b32.xlu1 %v9054_v51, %s5126_s29  ;;  %4921 = vrot.lane.b32.xlu0 %v9055_v23, %s5126_s29  ;;  %v9065_v3 = vld [vmem:[#allocation13_spill] sm:$0xff]  ;;  %v9066_v47 = vld [vmem:[#allocation56_spill] sm:$0xff]  ;;  %v9070_v23 = vld [vmem:[#allocation51_spill] sm:$0xff] }
 0x390   : > { %v3808_v0 = vpop.f32.mrf.mxu1  ;;  %v9069_v51 = vld [vmem:[#allocation12_spill] sm:$0xff] }
 0x391   : > { %v3464_v26 = vmax.f32 %v3432_v6, 0.0  ;;  %v3430_v42 = vadd.f32 %v8230_v2, %v3392_v61  ;;  %v3395_v40 = vmul.f32 %v3808_v0, %v8221_v52  ;;  %v2012_v6 = vrot.slane %v7754_v17, 7  ;;  %v9068_v61 = vld [vmem:[#allocation15_spill] sm:$0xff] }
 0x392   : > { %v3262_v4 = vpop.f32.mrf.mxu1  ;;  %v2010_v0 = vrot.slane %v9070_v23, 7 }
 0x393   : > { %3496 = vst [vmem:[%s8241_s17 + $0x10] sm:$0xff] %v3464_v26  ;;  %v3462_v53 = vmax.f32 %v3430_v42, 0.0  ;;  %v3433_v38 = vadd.f32 %v8230_v2, %v3395_v40  ;;  %v3393_v36 = vmul.f32 %v8221_v52, %v3262_v4  ;;  %4936 = vrot.lane.b32.xlu1 %v9056_v15, %s5124_s27  ;;  %4931 = vrot.lane.b32.xlu0 %v9057_v41, %s5124_s27  ;;  %v9071_v42 = vld [vmem:[#allocation19_spill] sm:$0xff] }
 0x394   : > { %v8285_v26 = vsel %vm382_vm1, %v2010_v0, %v2012_v6  ;;  %v8293_v4 = vsel %vm382_vm1, %v9000_v60, %v2010_v0  ;;  %v9074_v6 = vld [vmem:[#allocation41_spill] sm:$0xff]  ;;  %v9075_v0 = vld [vmem:[#allocation36_spill] sm:$0xff] }
 0x395   : > { %3494 = vst [vmem:[%s8241_s17] sm:$0xff] %v3462_v53  ;;  %v3465_v46 = vmax.f32 %v3433_v38, 0.0  ;;  %v3431_v13 = vadd.f32 %v8230_v2, %v3393_v36  ;;  %v5000_v36 = vpack.i.bf16 %v8285_v26, %v8293_v4 }
 0x397   : > { %3497 = vst [vmem:[%s8241_s17 + $0x18] sm:$0xff] %v3465_v46  ;;  %v3463_v5 = vmax.f32 %v3431_v13, 0.0  ;;  %4946 = vrot.lane.b32.xlu1 %v9058_v59, %s5127_s30  ;;  %4941 = vrot.lane.b32.xlu0 %v9053_v16, %s5127_s30  ;;  %v9067_v16 = vld [vmem:[#allocation23_spill] sm:$0xff]  ;;  %v9072_v46 = vld [vmem:[#allocation54_spill] sm:$0xff] }
 0x398   : > { %v9073_v13 = vpack.i.bf16 %v9070_v23, %v9072_v46 }
 0x399   : > { %3495 = vst [vmem:[%s8241_s17 + $0x8] sm:$0xff] %v3463_v5 }
 0x39b   : > { %4956 = vrot.lane.b32.xlu1 %v9061_v29, %s5123_s20  ;;  %4951 = vrot.lane.b32.xlu0 %v9064_v20, %s5123_s20 }
 0x39f   : > { %4966 = vrot.lane.b32.xlu1 %v9065_v3, %s5125_s28  ;;  %4961 = vrot.lane.b32.xlu0 %v9058_v59, %s5125_s28 }
 0x3a3   : > { %4976 = vrot.lane.b32.xlu1 %v9066_v47, %s5126_s29  ;;  %4971 = vrot.lane.b32.xlu0 %v9067_v16, %s5126_s29 }
 0x3a7   : > { %4986 = vrot.lane.b32.xlu1 %v9068_v61, %s5124_s27  ;;  %4981 = vrot.lane.b32.xlu0 %v9069_v51, %s5124_s27  ;;  %v5020_v61 = vpack.i.bf16 %v8149_v44, %v9074_v6  ;;  %v2015_v51 = vsel %vm382_vm1, %v9000_v60, %v2014_v32  ;;  %v4814_v32 = vunpack.i.h.bf16 %v8090_v37 }
 0x3a8   : > { %v5030_v23 = vpack.i.bf16 %v8179_v27, %v2015_v51 }
 0x3ab   : > { %4996 = vrot.lane.b32.xlu1 %v9071_v42, %s5127_s30  ;;  %4991 = vrot.lane.b32.xlu0 %v9065_v3, %s5127_s30 }
 0x3ac   : > { %v3811_v40 = vpop.f32.mrf.mxu1 }
 0x3ad   : > { %v3398_v53 = vmul.f32 %v3811_v40, %v8221_v52 }
 0x3ae   : > { %v3275_v38 = vpop.f32.mrf.mxu1 }
 0x3af   : > { %v3436_v15 = vadd.f32 %v8230_v2, %v3398_v53  ;;  %v3396_v41 = vmul.f32 %v8221_v52, %v3275_v38  ;;  %5006 = vrot.lane.b32.xlu1 %v9073_v13, %s5123_s20  ;;  %5001 = vrot.lane.b32.xlu0 %v5000_v36, %s5121_s12  ;;  %v4719_v53 = vunpack.i.h.bf16 %v8011_v22  ;;  %v4718_v38 = vunpack.i.l.bf16 %v8011_v22  ;;  %v9078_v13 = vld [vmem:[#allocation20_spill] sm:$0xff] }
 0x3b0   : > { %v3812_v5 = vpop.f32.mrf.mxu1  ;;  %v4729_v22 = vunpack.i.h.bf16 %v8022_v11 }
 0x3b1   : > { %v3468_v59 = vmax.f32 %v3436_v15, 0.0  ;;  %v3434_v14 = vadd.f32 %v8230_v2, %v3396_v41  ;;  %v3399_v63 = vmul.f32 %v3812_v5, %v8221_v52  ;;  %v9077_v15 = vld [vmem:[#allocation21_spill] sm:$0xff]  ;;  %v2884_v5 = vsel %vm1334_vm4, %v9078_v13, %v4718_v38 }
 0x3b2   : > { %v3278_v29 = vpop.f32.mrf.mxu1  ;;  %v2885_v41 = vsel %vm1334_vm4, %v9077_v15, %v4719_v53 }
 0x3b3   : > { %3500 = vst [vmem:[%s8241_s17 + $0x30] sm:$0xff] %v3468_v59  ;;  %v3466_v33 = vmax.f32 %v3434_v14, 0.0  ;;  %v3437_v20 = vadd.f32 %v8230_v2, %v3399_v63  ;;  %v3397_v3 = vmul.f32 %v8221_v52, %v3278_v29  ;;  %5016 = vrot.lane.b32.xlu1 %v9071_v42, %s5125_s28  ;;  %5011 = vrot.lane.b32.xlu0 %v5010_v8, %s5123_s20  ;;  %v4728_v59 = vunpack.i.l.bf16 %v8022_v11 }
 0x3b4   : > { %v4734_v8 = vunpack.i.h.bf16 %v8007_v50 }
 0x3b5   : > { %3498 = vst [vmem:[%s8241_s17 + $0x20] sm:$0xff] %v3466_v33  ;;  %v3469_v47 = vmax.f32 %v3437_v20, 0.0  ;;  %v3435_v16 = vadd.f32 %v8230_v2, %v3397_v3 }
 0x3b7   : > { %3501 = vst [vmem:[%s8241_s17 + $0x38] sm:$0xff] %v3469_v47  ;;  %v3467_v17 = vmax.f32 %v3435_v16, 0.0  ;;  %5026 = vrot.lane.b32.xlu1 %v5000_v36, %s5126_s29  ;;  %5021 = vrot.lane.b32.xlu0 %v5020_v61, %s5125_s28  ;;  %v4738_v36 = vunpack.i.l.bf16 %v8038_v12  ;;  %v2915_v47 = vsel %vm1399_vm6, %v2884_v5, %v4734_v8 }
 0x3b9   : > { %3499 = vst [vmem:[%s8241_s17 + $0x28] sm:$0xff] %v3467_v17  ;;  %v2916_v14 = vsel %vm1399_vm6, %v2885_v41, %v4738_v36  ;;  %v2947_v17 = vsel %vm1465_vm8, %v2915_v47, %v4728_v59 }
 0x3ba   : > { %v2948_v16 = vsel %vm1465_vm8, %v2916_v14, %v4729_v22 }
 0x3bb   : > { %5036 = vrot.lane.b32.xlu1 %v9075_v0, %s5124_s27  ;;  %5031 = vrot.lane.b32.xlu0 %v5030_v23, %s5126_s29 }
 0x3bf   : > { %5046 = vrot.lane.b32.xlu1 %v5020_v61, %s5127_s30  ;;  %5041 = vrot.lane.b32.xlu0 %v8161_v54, %s5124_s27 }
 0x3c3   : > { %5056 = vrot.lane.b32.xlu1 %v5030_v23, %s5121_s12  ;;  %5051 = vrot.lane.b32.xlu0 %v8182_v57, %s5127_s30 }
 0x3c7   : > { %5066 = vrot.lane.b32.xlu1 %v5065_v25, %s5123_s20  ;;  %5061 = vrot.lane.b32.xlu0 %v8167_v45, %s5121_s12 }
 0x3cb   : > { %5071 = vrot.lane.b32.xlu1 %v8182_v57, %s5125_s28  ;;  %2462 = vrot.lane.b32.xlu0 %v8136_v19, %s5123_s20 }
 0x3cf   : > { %5081 = vrot.lane.b32.xlu1 %v8167_v45, %s5126_s29  ;;  %5076 = vrot.lane.b32.xlu0 %v8169_v24, %s5125_s28 }
 0x3d3   : > { %5086 = vrot.lane.b32.xlu1 %v5085_v49, %s5124_s27  ;;  %2652 = vrot.lane.b32.xlu0 %v9000_v60, %s5126_s29 }
 0x3d7   : > { %5091 = vrot.lane.b32.xlu1 %v8169_v24, %s5127_s30  ;;  %2745 = vrot.lane.b32.xlu0 %v9076_v34, %s5124_s27  ;;  %v2899_v24 = vsel %vm1334_vm4, %v8285_v26, %v4814_v32 }
 0x3db   : > { %2838 = vrot.lane.b32.xlu0 %v8999_v62, %s5127_s30 }
 0x3dd   : > { %v4842_v44 = vpop.permute.xlu0 %4841 }
 0x3de   : > { %v4844_v54 = vunpack.i.h.bf16 %v4842_v44  ;;  %v4843_v30 = vunpack.i.l.bf16 %v4842_v44 }
 0x3e0   : > { %v2901_v60 = vsel %vm1334_vm4, %v8179_v27, %v4844_v54  ;;  %v2900_v57 = vsel %vm1334_vm4, %v2015_v51, %v4843_v30 }
 0x3e1   : > { %v4847_v19 = vpop.permute.xlu1 %4846  ;;  %v2272_v45 = vpop.permute.xlu0 %2271 }
 0x3e2   : > { %v4849_v49 = vunpack.i.h.bf16 %v4847_v19  ;;  %v4848_v25 = vunpack.i.l.bf16 %v4847_v19  ;;  %v8372_v42 = vsel %vm1399_vm6, %v2901_v60, %v2272_v45 }
 0x3e4   : > { %v8375_v62 = vsel %vm1399_vm6, %v2900_v57, %v4849_v49  ;;  %v8378_v40 = vsel %vm1399_vm6, %v2899_v24, %v4848_v25 }
 0x3e5   : > { %v8381_v27 = vpop.permute.xlu1 %4856  ;;  %v4852_v26 = vpop.permute.xlu0 %4851 }
 0x3e6   : > { %v4858_v63 = vunpack.i.l.bf16 %v8381_v27  ;;  %v4854_v12 = vunpack.i.h.bf16 %v4852_v26  ;;  %v4853_v33 = vunpack.i.l.bf16 %v4852_v26 }
 0x3e8   : > { %v2980_v51 = vsel %vm1531_vm10, %v2948_v16, %v4858_v63  ;;  %v2979_v11 = vsel %vm1531_vm10, %v2947_v17, %v4854_v12  ;;  %v2978_v30 = vsel %vm1531_vm10, %v8030_v10, %v4853_v33 }
 0x3e9   : > { %v4867_v46 = vpop.permute.xlu1 %4866  ;;  %v4862_v29 = vpop.permute.xlu0 %4861 }
 0x3ea   : > { %v4868_v20 = vunpack.i.l.bf16 %v4867_v46  ;;  %v4869_v23 = vunpack.i.h.bf16 %v4867_v46  ;;  %v4863_v0 = vunpack.i.l.bf16 %v4862_v29  ;;  %v4864_v44 = vunpack.i.h.bf16 %v4862_v29 }
 0x3ec   : > { %v3815_v3 = vpop.f32.mrf.mxu1  ;;  %v3012_v19 = vsel %vm2997_vm13, %v2979_v11, %v4868_v20  ;;  %v3013_v36 = vsel %vm2997_vm13, %v2980_v51, %v4869_v23  ;;  %v3010_v26 = vsel %vm2997_vm13, %v8036_v1, %v4863_v0  ;;  %v3011_v13 = vsel %vm2997_vm13, %v2978_v30, %v4864_v44 }
 0x3ed   : > { %v3402_v6 = vmul.f32 %v3815_v3, %v8221_v52  ;;  %v4877_v61 = vpop.permute.xlu1 %4876  ;;  %v4872_v50 = vpop.permute.xlu0 %4871 }
 0x3ee   : > { %v3291_v34 = vpop.f32.mrf.mxu1  ;;  %v4879_v60 = vunpack.i.h.bf16 %v4877_v61  ;;  %v4878_v49 = vunpack.i.l.bf16 %v4877_v61  ;;  %v4874_v24 = vunpack.i.h.bf16 %v4872_v50  ;;  %v4873_v57 = vunpack.i.l.bf16 %v4872_v50 }
 0x3ef   : > { %v3440_v32 = vadd.f32 %v8230_v2, %v3402_v6  ;;  %v3400_v54 = vmul.f32 %v8221_v52, %v3291_v34 }
 0x3f0   : > { %v3816_v25 = vpop.f32.mrf.mxu1  ;;  %v3045_v63 = vsel %vm3030_vm14, %v3012_v19, %v4878_v49  ;;  %v3046_v1 = vsel %vm3030_vm14, %v3013_v36, %v4879_v60  ;;  %v3043_v12 = vsel %vm3030_vm14, %v3010_v26, %v4873_v57  ;;  %v3044_v33 = vsel %vm3030_vm14, %v3011_v13, %v4874_v24 }
 0x3f1   : > { %v3472_v45 = vmax.f32 %v3440_v32, 0.0  ;;  %v3438_v53 = vadd.f32 %v8230_v2, %v3400_v54  ;;  %v4887_v38 = vpop.permute.xlu1 %4886  ;;  %v3403_v15 = vmul.f32 %v3816_v25, %v8221_v52  ;;  %v4882_v41 = vpop.permute.xlu0 %4881 }
 0x3f2   : > { %v4888_v10 = vunpack.i.l.bf16 %v4887_v38  ;;  %v3294_v46 = vpop.f32.mrf.mxu1  ;;  %v4889_v59 = vunpack.i.h.bf16 %v4887_v38  ;;  %v4884_v8 = vunpack.i.h.bf16 %v4882_v41  ;;  %v4883_v22 = vunpack.i.l.bf16 %v4882_v41 }
 0x3f3   : > { %3504 = vst [vmem:[%s8241_s17 + $0x50] sm:$0xff] %v3472_v45  ;;  %v3470_v5 = vmax.f32 %v3438_v53, 0.0  ;;  %v3401_v14 = vmul.f32 %v8221_v52, %v3294_v46  ;;  %v3441_v29 = vadd.f32 %v8230_v2, %v3403_v15  ;;  %v4859_v53 = vunpack.i.h.bf16 %v8381_v27 }
 0x3f4   : > { %v3078_v16 = vsel %vm3063_vm15, %v3045_v63, %v4888_v10  ;;  %v3079_v51 = vsel %vm3063_vm15, %v3046_v1, %v4889_v59  ;;  %v3076_v34 = vsel %vm3063_vm15, %v3043_v12, %v4883_v22  ;;  %v3077_v11 = vsel %vm3063_vm15, %v3044_v33, %v4884_v8 }
 0x3f5   : > { %3502 = vst [vmem:[%s8241_s17 + $0x40] sm:$0xff] %v3470_v5  ;;  %v3439_v20 = vadd.f32 %v8230_v2, %v3401_v14  ;;  %v4897_v3 = vpop.permute.xlu1 %4896  ;;  %v3473_v47 = vmax.f32 %v3441_v29, 0.0  ;;  %v4892_v17 = vpop.permute.xlu0 %4891  ;;  %v2981_v63 = vsel %vm1531_vm10, %v8062_v9, %v4859_v53 }
 0x3f6   : > { %v4899_v6 = vunpack.i.h.bf16 %v4897_v3  ;;  %v4898_v61 = vunpack.i.l.bf16 %v4897_v3  ;;  %v4894_v0 = vunpack.i.h.bf16 %v4892_v17  ;;  %v4893_v50 = vunpack.i.l.bf16 %v4892_v17 }
 0x3f7   : > { %v3471_v23 = vmax.f32 %v3439_v20, 0.0  ;;  %3505 = vst [vmem:[%s8241_s17 + $0x58] sm:$0xff] %v3473_v47 }
 0x3f8   : > { %v3111_v44 = vsel %vm3096_vm2, %v3078_v16, %v4898_v61  ;;  %v3112_v32 = vsel %vm3096_vm2, %v3079_v51, %v4899_v6  ;;  %v3109_v54 = vsel %vm3096_vm2, %v3076_v34, %v4893_v50  ;;  %v3110_v30 = vsel %vm3096_vm2, %v3077_v11, %v4894_v0 }
 0x3f9   : > { %3503 = vst [vmem:[%s8241_s17 + $0x48] sm:$0xff] %v3471_v23  ;;  %v8430_v19 = vpop.permute.xlu1 %4906  ;;  %v3135_v60 = vpack.c.bf16 %v3110_v30, %v3109_v54  ;;  %v4902_v49 = vpop.permute.xlu0 %4901  ;;  %v3136_v25 = vpack.c.bf16 %v3112_v32, %v3111_v44 }
 0x3fa   : > { %v4908_v38 = vunpack.i.l.bf16 %v8430_v19  ;;  %v4904_v26 = vunpack.i.h.bf16 %v4902_v49  ;;  %v4903_v15 = vunpack.i.l.bf16 %v4902_v49 }
 0x3fb   : > { %3817 = vmatprep.mubr.msk.bf16.mxu1 %vm3172_vm3, %v3135_v60 }
 0x3fc   : > { %3818 = vmatmul.mubr.msk.bf16.gmra.mxu1 %vm3172_vm3, %v3136_v25  ;;  %v2984_v29 = vsel %vm1531_vm10, %v8067_v31, %v4908_v38  ;;  %v2983_v1 = vsel %vm1531_vm10, %v8052_v28, %v4904_v26  ;;  %v2982_v12 = vsel %vm1531_vm10, %v8059_v56, %v4903_v15 }
 0x3fd   : > { %v4917_v45 = vpop.permute.xlu1 %4916  ;;  %v4912_v24 = vpop.permute.xlu0 %4911 }
 0x3fe   : > { %v4919_v10 = vunpack.i.h.bf16 %v4917_v45  ;;  %v4918_v41 = vunpack.i.l.bf16 %v4917_v45  ;;  %v4914_v46 = vunpack.i.h.bf16 %v4912_v24  ;;  %v4913_v13 = vunpack.i.l.bf16 %v4912_v24 }
 0x400   : > { %v3016_v3 = vsel %vm2997_vm13, %v2983_v1, %v4918_v41  ;;  %v3017_v47 = vsel %vm2997_vm13, %v2984_v29, %v4919_v10  ;;  %v3014_v6 = vsel %vm2997_vm13, %v2981_v63, %v4913_v13  ;;  %v3015_v31 = vsel %vm2997_vm13, %v2982_v12, %v4914_v46 }
 0x401   : > { %v4927_v57 = vpop.permute.xlu1 %4926  ;;  %v4922_v36 = vpop.permute.xlu0 %4921  ;;  %v4909_v10 = vunpack.i.h.bf16 %v8430_v19 }
 0x402   : > { %v4929_v5 = vunpack.i.h.bf16 %v4927_v57  ;;  %v4928_v59 = vunpack.i.l.bf16 %v4927_v57  ;;  %v4924_v8 = vunpack.i.h.bf16 %v4922_v36  ;;  %v4923_v27 = vunpack.i.l.bf16 %v4922_v36 }
 0x403   : > { %v2985_v1 = vsel %vm1531_vm10, %v8086_v58, %v4909_v10  ;;  %v4819_v10 = vunpack.i.h.bf16 %v8092_v7 }
 0x404   : > { %v3049_v61 = vsel %vm3030_vm14, %v3016_v3, %v4928_v59  ;;  %v3050_v17 = vsel %vm3030_vm14, %v3017_v47, %v4929_v5  ;;  %v3047_v51 = vsel %vm3030_vm14, %v3014_v6, %v4923_v27  ;;  %v3048_v56 = vsel %vm3030_vm14, %v3015_v31, %v4924_v8 }
 0x405   : > { %v4937_v14 = vpop.permute.xlu1 %4936  ;;  %v4932_v22 = vpop.permute.xlu0 %4931 }
 0x406   : > { %v4939_v33 = vunpack.i.h.bf16 %v4937_v14  ;;  %v4938_v20 = vunpack.i.l.bf16 %v4937_v14  ;;  %v4934_v16 = vunpack.i.h.bf16 %v4932_v22  ;;  %v4933_v9 = vunpack.i.l.bf16 %v4932_v22 }
 0x408   : > { %v3082_v34 = vsel %vm3063_vm15, %v3049_v61, %v4938_v20  ;;  %v3083_v11 = vsel %vm3063_vm15, %v3050_v17, %v4939_v33  ;;  %v3080_v54 = vsel %vm3063_vm15, %v3047_v51, %v4933_v9  ;;  %v3081_v30 = vsel %vm3063_vm15, %v3048_v56, %v4934_v16 }
 0x409   : > { %v4947_v28 = vpop.permute.xlu1 %4946  ;;  %v4942_v50 = vpop.permute.xlu0 %4941 }
 0x40a   : > { %v4949_v23 = vunpack.i.h.bf16 %v4947_v28  ;;  %v4948_v0 = vunpack.i.l.bf16 %v4947_v28  ;;  %v4944_v44 = vunpack.i.h.bf16 %v4942_v50  ;;  %v4943_v32 = vunpack.i.l.bf16 %v4942_v50 }
 0x40c   : > { %v3115_v60 = vsel %vm3096_vm2, %v3082_v34, %v4948_v0  ;;  %v3116_v49 = vsel %vm3096_vm2, %v3083_v11, %v4949_v23  ;;  %v3113_v45 = vsel %vm3096_vm2, %v3080_v54, %v4943_v32  ;;  %v3114_v24 = vsel %vm3096_vm2, %v3081_v30, %v4944_v44 }
 0x40d   : > { %v3138_v25 = vpack.c.bf16 %v3116_v49, %v3115_v60  ;;  %v8460_v57 = vpop.permute.xlu1 %4956  ;;  %v3137_v53 = vpack.c.bf16 %v3114_v24, %v3113_v45  ;;  %v4952_v38 = vpop.permute.xlu0 %4951 }
 0x40e   : > { %v4958_v41 = vunpack.i.l.bf16 %v8460_v57  ;;  %v4954_v13 = vunpack.i.h.bf16 %v4952_v38  ;;  %v4953_v5 = vunpack.i.l.bf16 %v4952_v38 }
 0x40f   : > { %3821 = vmatprep.mubr.msk.bf16.mxu1 %vm3172_vm3, %v3137_v53 }
 0x410   : > { %3822 = vmatmul.mubr.msk.bf16.gmra.mxu1 %vm3172_vm3, %v3138_v25  ;;  %v2988_v12 = vsel %vm1531_vm10, %v8095_v39, %v4958_v41  ;;  %v2987_v3 = vsel %vm1531_vm10, %v8076_v48, %v4954_v13  ;;  %v2986_v47 = vsel %vm1531_vm10, %v8083_v55, %v4953_v5  ;;  %v4959_v5 = vunpack.i.h.bf16 %v8460_v57 }
 0x411   : > { %v4967_v36 = vpop.permute.xlu1 %4966  ;;  %v4962_v26 = vpop.permute.xlu0 %4961 }
 0x412   : > { %v4969_v59 = vunpack.i.h.bf16 %v4967_v36  ;;  %v4968_v14 = vunpack.i.l.bf16 %v4967_v36  ;;  %v4964_v63 = vunpack.i.h.bf16 %v4962_v26  ;;  %v4963_v29 = vunpack.i.l.bf16 %v4962_v26 }
 0x414   : > { %v3020_v6 = vsel %vm2997_vm13, %v2987_v3, %v4968_v14  ;;  %v3021_v31 = vsel %vm2997_vm13, %v2988_v12, %v4969_v59  ;;  %v3018_v17 = vsel %vm2997_vm13, %v2985_v1, %v4963_v29  ;;  %v3019_v39 = vsel %vm2997_vm13, %v2986_v47, %v4964_v63  ;;  %v9079_v29 = vld [vmem:[#allocation46_spill] sm:$0xff] }
 0x415   : > { %v4977_v15 = vpop.permute.xlu1 %4976  ;;  %v4972_v46 = vpop.permute.xlu0 %4971 }
 0x416   : > { %v4979_v8 = vunpack.i.h.bf16 %v4977_v15  ;;  %v4978_v27 = vunpack.i.l.bf16 %v4977_v15  ;;  %v4974_v33 = vunpack.i.h.bf16 %v4972_v46  ;;  %v4973_v19 = vunpack.i.l.bf16 %v4972_v46 }
 0x417   : > { %v4828_v46 = vunpack.i.l.bf16 %v8361_v43 }
 0x418   : > { %v3053_v28 = vsel %vm3030_vm14, %v3020_v6, %v4978_v27  ;;  %v3054_v51 = vsel %vm3030_vm14, %v3021_v31, %v4979_v8  ;;  %v3051_v56 = vsel %vm3030_vm14, %v3018_v17, %v4973_v19  ;;  %v3052_v55 = vsel %vm3030_vm14, %v3019_v39, %v4974_v33 }
 0x419   : > { %v4987_v22 = vpop.permute.xlu1 %4986  ;;  %v4982_v20 = vpop.permute.xlu0 %4981  ;;  %v2897_v8 = vsel %vm1334_vm4, %v9079_v29, %v4819_v10 }
 0x41a   : > { %v4989_v16 = vunpack.i.h.bf16 %v4987_v22  ;;  %v4988_v9 = vunpack.i.l.bf16 %v4987_v22  ;;  %v4984_v61 = vunpack.i.h.bf16 %v4982_v20  ;;  %v4983_v58 = vunpack.i.l.bf16 %v4982_v20 }
 0x41b   : > { %v2928_v12 = vsel %vm1399_vm6, %v2897_v8, %v4828_v46  ;;  %v2989_v20 = vsel %vm1531_vm10, %v8116_v18, %v4959_v5 }
 0x41c   : > { %v3086_v34 = vsel %vm3063_vm15, %v3053_v28, %v4988_v9  ;;  %v3087_v11 = vsel %vm3063_vm15, %v3054_v51, %v4989_v16  ;;  %v3084_v54 = vsel %vm3063_vm15, %v3051_v56, %v4983_v58  ;;  %v3085_v30 = vsel %vm3063_vm15, %v3052_v55, %v4984_v61 }
 0x41d   : > { %v4997_v48 = vpop.permute.xlu1 %4996  ;;  %v4992_v50 = vpop.permute.xlu0 %4991 }
 0x41e   : > { %v4999_v23 = vunpack.i.h.bf16 %v4997_v48  ;;  %v4998_v0 = vunpack.i.l.bf16 %v4997_v48  ;;  %v4994_v44 = vunpack.i.h.bf16 %v4992_v50  ;;  %v4993_v32 = vunpack.i.l.bf16 %v4992_v50 }
 0x420   : > { %v3119_v60 = vsel %vm3096_vm2, %v3086_v34, %v4998_v0  ;;  %v3120_v49 = vsel %vm3096_vm2, %v3087_v11, %v4999_v23  ;;  %v3117_v45 = vsel %vm3096_vm2, %v3084_v54, %v4993_v32  ;;  %v3118_v24 = vsel %vm3096_vm2, %v3085_v30, %v4994_v44 }
 0x421   : > { %v3140_v25 = vpack.c.bf16 %v3120_v49, %v3119_v60  ;;  %v5007_v53 = vpop.permute.xlu1 %5006  ;;  %v3139_v38 = vpack.c.bf16 %v3118_v24, %v3117_v45  ;;  %v5002_v36 = vpop.permute.xlu0 %5001 }
 0x422   : > { %v5008_v59 = vunpack.i.l.bf16 %v5007_v53  ;;  %v5004_v14 = vunpack.i.h.bf16 %v5002_v36  ;;  %v5003_v63 = vunpack.i.l.bf16 %v5002_v36  ;;  %v5009_v3 = vunpack.i.h.bf16 %v5007_v53 }
 0x423   : > { %3825 = vmatprep.mubr.msk.bf16.mxu1 %vm3172_vm3, %v3139_v38 }
 0x424   : > { %3826 = vmatmul.mubr.msk.bf16.gmra.mxu1 %vm3172_vm3, %v3140_v25  ;;  %v2990_v16 = vsel %vm1531_vm10, %v8113_v35, %v5008_v59  ;;  %v2960_v9 = vsel %vm1465_vm8, %v2928_v12, %v5004_v14  ;;  %v2959_v6 = vsel %vm1465_vm8, %v8105_v21, %v5003_v63  ;;  %v4813_v14 = vunpack.i.l.bf16 %v8090_v37 }
 0x425   : > { %v5017_v26 = vpop.permute.xlu1 %5016  ;;  %v8492_v15 = vpop.permute.xlu0 %5011  ;;  %v2991_v54 = vsel %vm1531_vm10, %v2959_v6, %v5009_v3  ;;  %v4829_v63 = vunpack.i.h.bf16 %v8361_v43 }
 0x426   : > { %v5019_v27 = vunpack.i.h.bf16 %v5017_v26  ;;  %v5018_v22 = vunpack.i.l.bf16 %v5017_v26  ;;  %v5013_v31 = vunpack.i.l.bf16 %v8492_v15  ;;  %v5014_v37 = vunpack.i.h.bf16 %v8492_v15 }
 0x428   : > { %v3022_v61 = vsel %vm2997_vm13, %v2989_v20, %v5018_v22  ;;  %v3023_v58 = vsel %vm2997_vm13, %v2990_v16, %v5019_v27  ;;  %v2992_v32 = vsel %vm1531_vm10, %v2960_v9, %v5013_v31  ;;  %v2898_v22 = vsel %vm1334_vm4, %v8293_v4, %v4813_v14 }
 0x429   : > { %v5027_v41 = vpop.permute.xlu1 %5026  ;;  %v5022_v13 = vpop.permute.xlu0 %5021 }
 0x42a   : > { %v5029_v33 = vunpack.i.h.bf16 %v5027_v41  ;;  %v5028_v19 = vunpack.i.l.bf16 %v5027_v41  ;;  %v5024_v17 = vunpack.i.h.bf16 %v5022_v13  ;;  %v5023_v39 = vunpack.i.l.bf16 %v5022_v13 }
 0x42c   : > { %v3055_v28 = vsel %vm3030_vm14, %v3022_v61, %v5028_v19  ;;  %v3056_v51 = vsel %vm3030_vm14, %v3023_v58, %v5029_v33  ;;  %v3024_v49 = vsel %vm2997_vm13, %v2991_v54, %v5023_v39  ;;  %v3025_v25 = vsel %vm2997_vm13, %v2992_v32, %v5024_v17 }
 0x42d   : > { %v5037_v1 = vpop.permute.xlu1 %5036  ;;  %v5032_v7 = vpop.permute.xlu0 %5031 }
 0x42e   : > { %v5039_v47 = vunpack.i.h.bf16 %v5037_v1  ;;  %v5038_v57 = vunpack.i.l.bf16 %v5037_v1  ;;  %v5034_v23 = vunpack.i.h.bf16 %v5032_v7  ;;  %v5033_v0 = vunpack.i.l.bf16 %v5032_v7 }
 0x42f   : > { %v2929_v1 = vsel %vm1399_vm6, %v2898_v22, %v4829_v63 }
 0x430   : > { %v3088_v55 = vsel %vm3063_vm15, %v3055_v28, %v5038_v57  ;;  %v3089_v21 = vsel %vm3063_vm15, %v3056_v51, %v5039_v47  ;;  %v3058_v24 = vsel %vm3030_vm14, %v3025_v25, %v5034_v23  ;;  %v3057_v53 = vsel %vm3030_vm14, %v3024_v49, %v5033_v0 }
 0x431   : > { %v5047_v18 = vpop.permute.xlu1 %5046  ;;  %v5042_v56 = vpop.permute.xlu0 %5041 }
 0x432   : > { %v5049_v48 = vunpack.i.h.bf16 %v5047_v18  ;;  %v5048_v35 = vunpack.i.l.bf16 %v5047_v18  ;;  %v5044_v11 = vunpack.i.h.bf16 %v5042_v56  ;;  %v5043_v44 = vunpack.i.l.bf16 %v5042_v56 }
 0x434   : > { %v3121_v50 = vsel %vm3096_vm2, %v3088_v55, %v5048_v35  ;;  %v3122_v34 = vsel %vm3096_vm2, %v3089_v21, %v5049_v48  ;;  %v3090_v26 = vsel %vm3063_vm15, %v3057_v53, %v5043_v44  ;;  %v3091_v10 = vsel %vm3063_vm15, %v3058_v24, %v5044_v11 }
 0x435   : > { %v3141_v30 = vpack.c.bf16 %v3122_v34, %v3121_v50  ;;  %v5057_v60 = vpop.permute.xlu1 %5056  ;;  %v5052_v45 = vpop.permute.xlu0 %5051 }
 0x436   : > { %v5054_v38 = vunpack.i.h.bf16 %v5052_v45  ;;  %v5053_v36 = vunpack.i.l.bf16 %v5052_v45  ;;  %v5058_v8 = vunpack.i.l.bf16 %v5057_v60  ;;  %v5059_v12 = vunpack.i.h.bf16 %v5057_v60 }
 0x437   : > { %3829 = vmatprep.mubr.msk.bf16.mxu1 %vm3172_vm3, %v3141_v30 }
 0x438   : > { %v3123_v41 = vsel %vm3096_vm2, %v3090_v26, %v5053_v36  ;;  %v3124_v46 = vsel %vm3096_vm2, %v3091_v10, %v5054_v38  ;;  %v2961_v19 = vsel %vm1465_vm8, %v2929_v1, %v5058_v8  ;;  %v2962_v16 = vsel %vm1465_vm8, %v8378_v40, %v5059_v12 }
 0x439   : > { %v5067_v13 = vpop.permute.xlu1 %5066  ;;  %v3142_v5 = vpack.c.bf16 %v3124_v46, %v3123_v41  ;;  %v5062_v59 = vpop.permute.xlu0 %5061  ;;  %v2993_v9 = vsel %vm1531_vm10, %v2961_v19, %v5014_v37 }
 0x43a   : > { %v5064_v7 = vunpack.i.h.bf16 %v5062_v59  ;;  %v5063_v20 = vunpack.i.l.bf16 %v5062_v59  ;;  %v5068_v47 = vunpack.i.l.bf16 %v5067_v13  ;;  %v5069_v18 = vunpack.i.h.bf16 %v5067_v13 }
 0x43b   : > { %3830 = vmatmul.mubr.msk.bf16.gmra.mxu1 %vm3172_vm3, %v3142_v5 }
 0x43c   : > { %v2963_v61 = vsel %vm1465_vm8, %v8375_v62, %v5063_v20  ;;  %v2964_v58 = vsel %vm1465_vm8, %v8372_v42, %v5064_v7  ;;  %v2994_v28 = vsel %vm1531_vm10, %v2962_v16, %v5068_v47 }
 0x43d   : > { %v5072_v29 = vpop.permute.xlu1 %5071  ;;  %v2463_v27 = vpop.permute.xlu0 %2462  ;;  %v2995_v42 = vsel %vm1531_vm10, %v2963_v61, %v5069_v18 }
 0x43e   : > { %v5074_v57 = vunpack.i.h.bf16 %v5072_v29  ;;  %v5073_v43 = vunpack.i.l.bf16 %v5072_v29  ;;  %v2996_v56 = vsel %vm1531_vm10, %v2964_v58, %v2463_v27 }
 0x440   : > { %v3026_v40 = vsel %vm2997_vm13, %v2993_v9, %v5073_v43  ;;  %v3027_v35 = vsel %vm2997_vm13, %v2994_v28, %v5074_v57 }
 0x441   : > { %v5082_v33 = vpop.permute.xlu1 %5081  ;;  %v5077_v3 = vpop.permute.xlu0 %5076 }
 0x442   : > { %v5084_v4 = vunpack.i.h.bf16 %v5082_v33  ;;  %v5083_v6 = vunpack.i.l.bf16 %v5082_v33  ;;  %v5079_v17 = vunpack.i.h.bf16 %v5077_v3  ;;  %v5078_v39 = vunpack.i.l.bf16 %v5077_v3 }
 0x444   : > { %v3059_v55 = vsel %vm3030_vm14, %v3026_v40, %v5083_v6  ;;  %v3060_v62 = vsel %vm3030_vm14, %v3027_v35, %v5084_v4  ;;  %v3028_v23 = vsel %vm2997_vm13, %v2995_v42, %v5078_v39  ;;  %v3029_v0 = vsel %vm2997_vm13, %v2996_v56, %v5079_v17 }
 0x445   : > { %v5087_v31 = vpop.permute.xlu1 %5086  ;;  %v2653_v15 = vpop.permute.xlu0 %2652 }
 0x446   : > { %v5089_v51 = vunpack.i.h.bf16 %v5087_v31  ;;  %v5088_v48 = vunpack.i.l.bf16 %v5087_v31  ;;  %v3061_v60 = vsel %vm3030_vm14, %v3028_v23, %v2653_v15  ;;  %v3062_v49 = vsel %vm3030_vm14, %v3029_v0, %v2653_v15 }
 0x448   : > { %v3092_v44 = vsel %vm3063_vm15, %v3059_v55, %v5088_v48  ;;  %v3093_v32 = vsel %vm3063_vm15, %v3060_v62, %v5089_v51 }
 0x449   : > { %v5092_v21 = vpop.permute.xlu1 %5091  ;;  %v2746_v11 = vpop.permute.xlu0 %2745 }
 0x44a   : > { %v5094_v50 = vunpack.i.h.bf16 %v5092_v21  ;;  %v5093_v34 = vunpack.i.l.bf16 %v5092_v21  ;;  %v3094_v45 = vsel %vm3063_vm15, %v3061_v60, %v2746_v11  ;;  %v3095_v24 = vsel %vm3063_vm15, %v3062_v49, %v2746_v11 }
 0x44c   : > { %v3125_v54 = vsel %vm3096_vm2, %v3092_v44, %v5093_v34  ;;  %v3126_v30 = vsel %vm3096_vm2, %v3093_v32, %v5094_v50 }
 0x44d   : > { %v3143_v25 = vpack.c.bf16 %v3126_v30, %v3125_v54  ;;  %v2839_v53 = vpop.permute.xlu0 %2838 }
 0x44e   : > { %v3127_v38 = vsel %vm3096_vm2, %v3094_v45, %v2839_v53  ;;  %v3128_v36 = vsel %vm3096_vm2, %v3095_v24, %v2839_v53 }
 0x44f   : > { %3833 = vmatprep.mubr.msk.bf16.mxu1 %vm3172_vm3, %v3143_v25  ;;  %v3144_v26 = vpack.c.bf16 %v3128_v36, %v3127_v38 }
 0x451   : > { %3834 = vmatmul.mubr.msk.bf16.gmra.mxu1 %vm3172_vm3, %v3144_v26 }
 0x4bc   : > { %v3819_v10 = vpop.f32.mrf.mxu1 }
 0x4bd   : > { %v3406_v41 = vmul.f32 %v3819_v10, %v8221_v52 }
 0x4be   : > { %v3307_v46 = vpop.f32.mrf.mxu1 }
 0x4bf   : > { %v3444_v13 = vadd.f32 %v8230_v2, %v3406_v41  ;;  %v3404_v5 = vmul.f32 %v8221_v52, %v3307_v46 }
 0x4c0   : > { %v3820_v59 = vpop.f32.mrf.mxu1 }
 0x4c1   : > { %v3476_v14 = vmax.f32 %v3444_v13, 0.0  ;;  %v3442_v63 = vadd.f32 %v8230_v2, %v3404_v5  ;;  %v3407_v29 = vmul.f32 %v3820_v59, %v8221_v52  ;;  %v5105_v13 = vld [vmem:[%s8629_s5] ss:$0 sm:$0xff] }
 0x4c2   : > { %v3310_v8 = vpop.f32.mrf.mxu1 }
 0x4c3   : > { %3508 = vst [vmem:[%s8241_s17 + $0x70] sm:$0xff] %v3476_v14  ;;  %v3474_v27 = vmax.f32 %v3442_v63, 0.0  ;;  %v3445_v22 = vadd.f32 %v8230_v2, %v3407_v29  ;;  %v3405_v1 = vmul.f32 %v8221_v52, %v3310_v8 }
 0x4c5   : > { %3506 = vst [vmem:[%s8241_s17 + $0x60] sm:$0xff] %v3474_v27  ;;  %v3477_v12 = vmax.f32 %v3445_v22, 0.0  ;;  %v3443_v33 = vadd.f32 %v8230_v2, %v3405_v1 }
 0x4c7   : > { %3509 = vst [vmem:[%s8241_s17 + $0x78] sm:$0xff] %v3477_v12  ;;  %v3475_v19 = vmax.f32 %v3443_v33, 0.0 }
 0x4c9   : > { %3507 = vst [vmem:[%s8241_s17 + $0x68] sm:$0xff] %v3475_v19 }
 0x4d0   : > { %v3823_v7 = vpop.f32.mrf.mxu1 }
 0x4d1   : > { %v3410_v20 = vmul.f32 %v3823_v7, %v8221_v52 }
 0x4d2   : > { %v3323_v3 = vpop.f32.mrf.mxu1 }
 0x4d3   : > { %v3448_v37 = vadd.f32 %v8230_v2, %v3410_v20  ;;  %v3408_v47 = vmul.f32 %v8221_v52, %v3323_v3 }
 0x4d4   : > { %v3824_v57 = vpop.f32.mrf.mxu1 }
 0x4d5   : > { %v3480_v43 = vmax.f32 %v3448_v37, 0.0  ;;  %v3446_v16 = vadd.f32 %v8230_v2, %v3408_v47  ;;  %v3411_v9 = vmul.f32 %v3824_v57, %v8221_v52 }
 0x4d6   : > { %v3326_v4 = vpop.f32.mrf.mxu1 }
 0x4d7   : > { %3512 = vst [vmem:[%s8241_s17 + $0x90] sm:$0xff] %v3480_v43  ;;  %v3478_v6 = vmax.f32 %v3446_v16, 0.0  ;;  %v3449_v31 = vadd.f32 %v8230_v2, %v3411_v9  ;;  %v3409_v61 = vmul.f32 %v8221_v52, %v3326_v4 }
 0x4d9   : > { %3510 = vst [vmem:[%s8241_s17 + $0x80] sm:$0xff] %v3478_v6  ;;  %v3481_v58 = vmax.f32 %v3449_v31, 0.0  ;;  %v3447_v17 = vadd.f32 %v8230_v2, %v3409_v61 }
 0x4db   : > { %3513 = vst [vmem:[%s8241_s17 + $0x98] sm:$0xff] %v3481_v58  ;;  %v3479_v39 = vmax.f32 %v3447_v17, 0.0 }
 0x4dd   : > { %3511 = vst [vmem:[%s8241_s17 + $0x88] sm:$0xff] %v3479_v39 }
 0x4e4   : > { %v3827_v15 = vpop.f32.mrf.mxu1 }
 0x4e5   : > { %v3414_v18 = vmul.f32 %v3827_v15, %v8221_v52 }
 0x4e6   : > { %v3339_v28 = vpop.f32.mrf.mxu1 }
 0x4e7   : > { %v3452_v51 = vadd.f32 %v8230_v2, %v3414_v18  ;;  %v3412_v48 = vmul.f32 %v8221_v52, %v3339_v28 }
 0x4e8   : > { %v3828_v40 = vpop.f32.mrf.mxu1 }
 0x4e9   : > { %v3484_v35 = vmax.f32 %v3452_v51, 0.0  ;;  %v3450_v56 = vadd.f32 %v8230_v2, %v3412_v48  ;;  %v3415_v55 = vmul.f32 %v3828_v40, %v8221_v52 }
 0x4ea   : > { %v3342_v62 = vpop.f32.mrf.mxu1 }
 0x4eb   : > { %3516 = vst [vmem:[%s8241_s17 + $0xb0] sm:$0xff] %v3484_v35  ;;  %v3482_v42 = vmax.f32 %v3450_v56, 0.0  ;;  %v3453_v21 = vadd.f32 %v8230_v2, %v3415_v55  ;;  %v3413_v23 = vmul.f32 %v8221_v52, %v3342_v62 }
 0x4ed   : > { %3514 = vst [vmem:[%s8241_s17 + $0xa0] sm:$0xff] %v3482_v42  ;;  %v3485_v0 = vmax.f32 %v3453_v21, 0.0  ;;  %v3451_v50 = vadd.f32 %v8230_v2, %v3413_v23 }
 0x4ef   : > { %3517 = vst [vmem:[%s8241_s17 + $0xb8] sm:$0xff] %v3485_v0  ;;  %v3483_v34 = vmax.f32 %v3451_v50, 0.0 }
 0x4f1   : > { %3515 = vst [vmem:[%s8241_s17 + $0xa8] sm:$0xff] %v3483_v34 }
 0x4fb   : > { %v3831_v11 = vpop.f32.mrf.mxu1 }
 0x4fc   : > { %v3418_v44 = vmul.f32 %v3831_v11, %v8221_v52 }
 0x4fd   : > { %v3355_v32 = vpop.f32.mrf.mxu1 }
 0x4fe   : > { %v3456_v54 = vadd.f32 %v8230_v2, %v3418_v44  ;;  %v3416_v30 = vmul.f32 %v8221_v52, %v3355_v32 }
 0x4ff   : > { %v3832_v60 = vpop.f32.mrf.mxu1 }
 0x500   : > { %v3488_v49 = vmax.f32 %v3456_v54, 0.0  ;;  %v3454_v25 = vadd.f32 %v8230_v2, %v3416_v30  ;;  %v3419_v45 = vmul.f32 %v3832_v60, %v8221_v52 }
 0x501   : > { %v3358_v24 = vpop.f32.mrf.mxu1 }
 0x502   : > { %3520 = vst [vmem:[%s8241_s17 + $0xd0] sm:$0xff] %v3488_v49  ;;  %v3486_v53 = vmax.f32 %v3454_v25, 0.0  ;;  %v3457_v38 = vadd.f32 %v8230_v2, %v3419_v45  ;;  %v3417_v36 = vmul.f32 %v8221_v52, %v3358_v24  ;;  %v5106_v52 = vld [vmem:[%s8630_s6] ss:$0 sm:$0xff] }
 0x504   : > { %3518 = vst [vmem:[%s8241_s17 + $0xc0] sm:$0xff] %v3486_v53  ;;  %v3489_v26 = vmax.f32 %v3457_v38, 0.0  ;;  %v3455_v10 = vadd.f32 %v8230_v2, %v3417_v36 }
 0x506   : > { %3521 = vst [vmem:[%s8241_s17 + $0xd8] sm:$0xff] %v3489_v26  ;;  %v3487_v41 = vmax.f32 %v3455_v10, 0.0 }
 0x508   : > { %3519 = vst [vmem:[%s8241_s17 + $0xc8] sm:$0xff] %v3487_v41 }
 0x511   : > { %v3835_v46 = vpop.f32.mrf.mxu1 }
 0x512   : > { %v3422_v5 = vmul.f32 %v5105_v13, %v3835_v46 }
 0x513   : > { %v3371_v59 = vpop.f32.mrf.mxu1 }
 0x514   : > { %v3460_v14 = vadd.f32 %v5106_v52, %v3422_v5  ;;  %v3420_v2 = vmul.f32 %v5105_v13, %v3371_v59 }
 0x515   : > { %v3836_v63 = vpop.f32.mrf.mxu1 }
 0x516   : > { %v3492_v29 = vmax.f32 %v3460_v14, 0.0  ;;  %v3458_v8 = vadd.f32 %v5106_v52, %v3420_v2  ;;  %v3423_v27 = vmul.f32 %v5105_v13, %v3836_v63 }
 0x517   : > { %v3374_v22 = vpop.f32.mrf.mxu1 }
 0x518   : > { %3524 = vst [vmem:[%s8241_s17 + $0xf0] sm:$0xff] %v3492_v29  ;;  %v3490_v1 = vmax.f32 %v3458_v8, 0.0  ;;  %v3461_v12 = vadd.f32 %v5106_v52, %v3423_v27  ;;  %v3421_v33 = vmul.f32 %v5105_v13, %v3374_v22 }
 0x51a   : > { %3522 = vst [vmem:[%s8241_s17 + $0xe0] sm:$0xff] %v3490_v1  ;;  %v3493_v19 = vmax.f32 %v3461_v12, 0.0  ;;  %v3459_v7 = vadd.f32 %v5106_v52, %v3421_v33 }
 0x51c   : > { %3525 = vst [vmem:[%s8241_s17 + $0xf8] sm:$0xff] %v3493_v19  ;;  %v3491_v20 = vmax.f32 %v3459_v7, 0.0 }
 0x51e   : > { %3523 = vst [vmem:[%s8241_s17 + $0xe8] sm:$0xff] %v3491_v20 }
 0x51f PF: > { %s17_s24 = sadd.s32 1, %s5113_s24  }
 0x520   : > { %p14_p4 = scmp.ge.s32.totalorder %s17_s24, 4  }
 0x522   :  { %16 = sbr.rel (!%p14_p4) target bundleno = 1 (0x1), region = 78 }

</bundles_post_ra>
